<compile_context>
chip_gen: v7x
topology: tpu7x:2x2x1
jax: 0.10.0
libtpu: 0.0.40
codegen_flags: <defaults>
</compile_context>

<pallas_src>
import jax
import jax.numpy as jnp
from jax.experimental import pallas as pl
from jax.experimental.pallas import tpu as pltpu

INPUT_SIZE = 784           # 1 * 28 * 28 (decoder hardcodes Unflatten(1, (1, 28, 28)))
INPUT_PAD = 896            # 7 * 128, lane-dense x_hat output
NUM_CLASSES = 10
LATENT_SIZE = 15
LATENT_PAD = 128           # padded latent width (zero rows in decoder weight => exact)
HEAD_WIDTH = 2 * LATENT_PAD  # fused mu/logvar head output width
HIDDEN_DIM = 400


def _round_up(a, b):
    return (a + b - 1) // b * b


def cvae_kernel(
    # streamed activations
    xf_ref, c_ref, eps_ref,
    # encoder weights (first layer split into x-part / c-part)
    we0x_ref, we0c_ref, be0_ref,
    we1_ref, be1_ref,
    we2_ref, be2_ref,
    # fused mu/logvar head (mu lanes [0:15], logvar lanes [128:143])
    whead_ref, bhead_ref,
    # decoder weights (first layer split into z-part / c-part)
    wd0z_ref, wd0c_ref, bd0_ref,
    wd1_ref, bd1_ref,
    wd2_ref, bd2_ref,
    wd3_ref, bd3_ref,
    # outputs
    xhat_ref, head_ref,
):
    f32 = jnp.float32
    bf16 = jnp.bfloat16

    xf = xf_ref[...].astype(bf16)
    c = c_ref[...].astype(bf16)
    eps = eps_ref[...]                       # f32, (TILE_N, LATENT_PAD), zeros past 15

    # ---- encoder: Linear(794->400)+ReLU, 2x (Linear(400->400)+ReLU)
    h = (jnp.dot(xf, we0x_ref[...], preferred_element_type=f32)
         + jnp.dot(c, we0c_ref[...], preferred_element_type=f32)
         + be0_ref[...])
    h = jnp.maximum(h, 0.0)
    h = jnp.dot(h.astype(bf16), we1_ref[...], preferred_element_type=f32) + be1_ref[...]
    h = jnp.maximum(h, 0.0)
    h = jnp.dot(h.astype(bf16), we2_ref[...], preferred_element_type=f32) + be2_ref[...]
    h = jnp.maximum(h, 0.0)

    # ---- fused mu / logvar head: single Linear(400 -> 256)
    head = jnp.dot(h.astype(bf16), whead_ref[...], preferred_element_type=f32) + bhead_ref[...]
    head_ref[...] = head                     # lane-dense store; wrapper slices mu/logvar

    mu_pad = head[:, :LATENT_PAD]            # 128-aligned slices: free
    logvar_pad = head[:, LATENT_PAD:]

    # ---- reparametrize: z = sqrt(exp(logvar)) * eps + mu  (padded lanes stay 0)
    z = jnp.exp(0.5 * logvar_pad) * eps + mu_pad

    # ---- decoder: Linear(25->400)+ReLU, 2x(Linear(400->400)+ReLU),
    #               Linear(400->784)+Sigmoid  (output padded to 896 lanes)
    d = (jnp.dot(z.astype(bf16), wd0z_ref[...], preferred_element_type=f32)
         + jnp.dot(c, wd0c_ref[...], preferred_element_type=f32)
         + bd0_ref[...])
    d = jnp.maximum(d, 0.0)
    d = jnp.dot(d.astype(bf16), wd1_ref[...], preferred_element_type=f32) + bd1_ref[...]
    d = jnp.maximum(d, 0.0)
    d = jnp.dot(d.astype(bf16), wd2_ref[...], preferred_element_type=f32) + bd2_ref[...]
    d = jnp.maximum(d, 0.0)
    d = jnp.dot(d.astype(bf16), wd3_ref[...], preferred_element_type=f32) + bd3_ref[...]
    xhat_ref[...] = jax.nn.sigmoid(d)


def init_params(key):
    """Deterministic synthetic parameters, already split/padded/cast for the kernel.

    Weights are (in, out); matmul weights are bf16, biases f32.
    """
    def lin(k, fan_in, fan_out):
        kw, kb = jax.random.split(k)
        scale = 1.0 / jnp.sqrt(jnp.float32(fan_in))
        w = jax.random.uniform(kw, (fan_in, fan_out), jnp.float32, -scale, scale)
        b = jax.random.uniform(kb, (1, fan_out), jnp.float32, -scale, scale)
        return w, b

    keys = jax.random.split(key, 9)
    # encoder
    we0, be0 = lin(keys[0], INPUT_SIZE + NUM_CLASSES, HIDDEN_DIM)
    we1, be1 = lin(keys[1], HIDDEN_DIM, HIDDEN_DIM)
    we2, be2 = lin(keys[2], HIDDEN_DIM, HIDDEN_DIM)
    # mu / logvar heads -> fused, lane-padded
    wmu, bmu = lin(keys[3], HIDDEN_DIM, LATENT_SIZE)
    wlv, blv = lin(keys[4], HIDDEN_DIM, LATENT_SIZE)
    whead = jnp.zeros((HIDDEN_DIM, HEAD_WIDTH), jnp.float32)
    whead = whead.at[:, :LATENT_SIZE].set(wmu)
    whead = whead.at[:, LATENT_PAD:LATENT_PAD + LATENT_SIZE].set(wlv)
    bhead = jnp.zeros((1, HEAD_WIDTH), jnp.float32)
    bhead = bhead.at[:, :LATENT_SIZE].set(bmu)
    bhead = bhead.at[:, LATENT_PAD:LATENT_PAD + LATENT_SIZE].set(blv)
    # decoder
    wd0, bd0 = lin(keys[5], LATENT_SIZE + NUM_CLASSES, HIDDEN_DIM)
    wd1, bd1 = lin(keys[6], HIDDEN_DIM, HIDDEN_DIM)
    wd2, bd2 = lin(keys[7], HIDDEN_DIM, HIDDEN_DIM)
    wd3, bd3 = lin(keys[8], HIDDEN_DIM, INPUT_SIZE)

    # split first layers, pad z-part rows 15->128 (zero rows => exact)
    wd0z = jnp.zeros((LATENT_PAD, HIDDEN_DIM), jnp.float32).at[:LATENT_SIZE].set(
        wd0[:LATENT_SIZE])
    wd0c = wd0[LATENT_SIZE:]
    # pad decoder output 784 -> 896 for lane-dense stores (extra lanes sliced off)
    wd3p = jnp.zeros((HIDDEN_DIM, INPUT_PAD), jnp.float32).at[:, :INPUT_SIZE].set(wd3)
    bd3p = jnp.zeros((1, INPUT_PAD), jnp.float32).at[:, :INPUT_SIZE].set(bd3)

    bf16 = jnp.bfloat16
    return [
        we0[:INPUT_SIZE].astype(bf16), we0[INPUT_SIZE:].astype(bf16), be0,
        we1.astype(bf16), be1,
        we2.astype(bf16), be2,
        whead.astype(bf16), bhead,
        wd0z.astype(bf16), wd0c.astype(bf16), bd0,
        wd1.astype(bf16), bd1,
        wd2.astype(bf16), bd2,
        wd3p.astype(bf16), bd3p,
    ]


def cvae_forward(x, c, eps, params):
    """x: (N, 1, 28, 28) f32, c: (N, 10) f32 one-hot, eps: (N, 15) f32 ~ N(0,1)."""
    N = x.shape[0]

    # Batch tile: big tiles for real batches, padded to a multiple of 8 when tiny.
    tile_n = min(256, _round_up(max(N, 1), 8))
    n_pad = _round_up(N, tile_n)
    grid = (n_pad // tile_n,)

    xf = jnp.zeros((n_pad, INPUT_SIZE), jnp.float32).at[:N].set(
        x.reshape(N, -1).astype(jnp.float32))
    c_pad = jnp.zeros((n_pad, NUM_CLASSES), jnp.float32).at[:N].set(
        c.astype(jnp.float32))
    eps_pad = jnp.zeros((n_pad, LATENT_PAD), jnp.float32).at[:N, :LATENT_SIZE].set(
        eps.astype(jnp.float32))

    def act_spec(feat):
        return pl.BlockSpec((tile_n, feat), lambda i: (i, 0))

    def const_spec(shape):
        return pl.BlockSpec(shape, lambda i: (0, 0))   # resident weights / biases

    in_specs = (
        [act_spec(INPUT_SIZE), act_spec(NUM_CLASSES), act_spec(LATENT_PAD)]
        + [const_spec(p.shape) for p in params]
    )
    out_specs = (act_spec(INPUT_PAD), act_spec(HEAD_WIDTH))
    out_shape = (
        jax.ShapeDtypeStruct((n_pad, INPUT_PAD), jnp.float32),   # x_hat (lane-padded)
        jax.ShapeDtypeStruct((n_pad, HEAD_WIDTH), jnp.float32),  # fused mu/logvar head
    )

    x_hat_pad, head = pl.pallas_call(
        cvae_kernel,
        grid=grid,
        in_specs=in_specs,
        out_specs=out_specs,
        out_shape=out_shape,
        compiler_params=pltpu.CompilerParams(
            dimension_semantics=("parallel",),          # shards across TCs on v7x
            vmem_limit_bytes=48 * 1024 * 1024,          # fits v7x's 64 MiB VMEM
        ),
    )(xf, c_pad, eps_pad, *params)

    x_hat = x_hat_pad[:N, :INPUT_SIZE].reshape(N, 1, 28, 28)
    mu = head[:N, :LATENT_SIZE]
    logvar = head[:N, LATENT_PAD:LATENT_PAD + LATENT_SIZE]
    return x_hat, mu, logvar


if __name__ == "__main__":
    key = jax.random.PRNGKey(0)
    k_x, k_c, k_eps, k_params = jax.random.split(key, 4)

    N = 2
    # x in [0, 1] like MNIST pixels, NCHW
    x = jax.random.uniform(k_x, (N, 1, 28, 28), jnp.float32)
    # one-hot class labels
    labels = jax.random.randint(k_c, (N,), 0, NUM_CLASSES)
    c = jax.nn.one_hot(labels, NUM_CLASSES, dtype=jnp.float32)
    # standard-normal noise for the reparameterization trick
    eps = jax.random.normal(k_eps, (N, LATENT_SIZE), jnp.float32)

    params = init_params(k_params)

    x_hat, mu, logvar = cvae_forward(x, c, eps, params)
    jax.block_until_ready((x_hat, mu, logvar))

    assert x_hat.shape == (N, 1, 28, 28)
    assert mu.shape == (N, LATENT_SIZE)
    assert logvar.shape == (N, LATENT_SIZE)
    assert bool(jnp.all(jnp.isfinite(x_hat)))
    assert bool(jnp.all(jnp.isfinite(mu)))
    assert bool(jnp.all(jnp.isfinite(logvar)))
    assert bool(jnp.all((x_hat >= 0.0) & (x_hat <= 1.0)))

    print("KERNEL_OK")
</pallas_src>

<mosaic_0001>
module attributes {stable_mosaic.version = 11 : i64} {
  func.func @cvae_kernel(%arg0: i32, %arg1: memref<8x784xf32, #tpu.memory_space<vmem>>, %arg2: memref<8x10xf32, #tpu.memory_space<vmem>>, %arg3: memref<8x128xf32, #tpu.memory_space<vmem>>, %arg4: memref<784x400xbf16, #tpu.memory_space<vmem>>, %arg5: memref<10x400xbf16, #tpu.memory_space<vmem>>, %arg6: memref<1x400xf32, #tpu.memory_space<vmem>>, %arg7: memref<400x400xbf16, #tpu.memory_space<vmem>>, %arg8: memref<1x400xf32, #tpu.memory_space<vmem>>, %arg9: memref<400x400xbf16, #tpu.memory_space<vmem>>, %arg10: memref<1x400xf32, #tpu.memory_space<vmem>>, %arg11: memref<400x256xbf16, #tpu.memory_space<vmem>>, %arg12: memref<1x256xf32, #tpu.memory_space<vmem>>, %arg13: memref<128x400xbf16, #tpu.memory_space<vmem>>, %arg14: memref<10x400xbf16, #tpu.memory_space<vmem>>, %arg15: memref<1x400xf32, #tpu.memory_space<vmem>>, %arg16: memref<400x400xbf16, #tpu.memory_space<vmem>>, %arg17: memref<1x400xf32, #tpu.memory_space<vmem>>, %arg18: memref<400x400xbf16, #tpu.memory_space<vmem>>, %arg19: memref<1x400xf32, #tpu.memory_space<vmem>>, %arg20: memref<400x896xbf16, #tpu.memory_space<vmem>>, %arg21: memref<1x896xf32, #tpu.memory_space<vmem>>, %arg22: memref<8x896xf32, #tpu.memory_space<vmem>>, %arg23: memref<8x256xf32, #tpu.memory_space<vmem>>) attributes {dimension_semantics = [#tpu.dimension_semantics<parallel>], iteration_bounds = array<i64: 1>, scalar_prefetch = 0 : i64, scratch_operands = 0 : i64, tpu.core_type = #tpu.core_type<tc>, window_params = [{transform_indices = @transform_0, window_bounds = array<i64: 8, 784>}, {transform_indices = @transform_1, window_bounds = array<i64: 8, 10>}, {transform_indices = @transform_2, window_bounds = array<i64: 8, 128>}, {pipeline_mode = #tpu.pipeline_mode<synchronous>, transform_indices = @transform_3, window_bounds = array<i64: 784, 400>}, {pipeline_mode = #tpu.pipeline_mode<synchronous>, transform_indices = @transform_4, window_bounds = array<i64: 10, 400>}, {pipeline_mode = #tpu.pipeline_mode<synchronous>, transform_indices = @transform_5, window_bounds = array<i64: 1, 400>}, {pipeline_mode = #tpu.pipeline_mode<synchronous>, transform_indices = @transform_6, window_bounds = array<i64: 400, 400>}, {pipeline_mode = #tpu.pipeline_mode<synchronous>, transform_indices = @transform_7, window_bounds = array<i64: 1, 400>}, {pipeline_mode = #tpu.pipeline_mode<synchronous>, transform_indices = @transform_8, window_bounds = array<i64: 400, 400>}, {pipeline_mode = #tpu.pipeline_mode<synchronous>, transform_indices = @transform_9, window_bounds = array<i64: 1, 400>}, {pipeline_mode = #tpu.pipeline_mode<synchronous>, transform_indices = @transform_10, window_bounds = array<i64: 400, 256>}, {pipeline_mode = #tpu.pipeline_mode<synchronous>, transform_indices = @transform_11, window_bounds = array<i64: 1, 256>}, {pipeline_mode = #tpu.pipeline_mode<synchronous>, transform_indices = @transform_12, window_bounds = array<i64: 128, 400>}, {pipeline_mode = #tpu.pipeline_mode<synchronous>, transform_indices = @transform_13, window_bounds = array<i64: 10, 400>}, {pipeline_mode = #tpu.pipeline_mode<synchronous>, transform_indices = @transform_14, window_bounds = array<i64: 1, 400>}, {pipeline_mode = #tpu.pipeline_mode<synchronous>, transform_indices = @transform_15, window_bounds = array<i64: 400, 400>}, {pipeline_mode = #tpu.pipeline_mode<synchronous>, transform_indices = @transform_16, window_bounds = array<i64: 1, 400>}, {pipeline_mode = #tpu.pipeline_mode<synchronous>, transform_indices = @transform_17, window_bounds = array<i64: 400, 400>}, {pipeline_mode = #tpu.pipeline_mode<synchronous>, transform_indices = @transform_18, window_bounds = array<i64: 1, 400>}, {pipeline_mode = #tpu.pipeline_mode<synchronous>, transform_indices = @transform_19, window_bounds = array<i64: 400, 896>}, {pipeline_mode = #tpu.pipeline_mode<synchronous>, transform_indices = @transform_20, window_bounds = array<i64: 1, 896>}, {transform_indices = @transform_21, window_bounds = array<i64: 8, 896>}, {transform_indices = @transform_22, window_bounds = array<i64: 8, 256>}]} {
    %c0 = arith.constant 0 : index
    %c0_0 = arith.constant 0 : index
    %0 = vector.load %arg1[%c0, %c0_0] : memref<8x784xf32, #tpu.memory_space<vmem>>, vector<8x784xf32>
    %1 = arith.truncf %0 : vector<8x784xf32> to vector<8x784xbf16>
    %c0_1 = arith.constant 0 : index
    %c0_2 = arith.constant 0 : index
    %2 = vector.load %arg2[%c0_1, %c0_2] : memref<8x10xf32, #tpu.memory_space<vmem>>, vector<8x10xf32>
    %3 = arith.truncf %2 : vector<8x10xf32> to vector<8x10xbf16>
    %c0_3 = arith.constant 0 : index
    %c0_4 = arith.constant 0 : index
    %4 = vector.load %arg3[%c0_3, %c0_4] : memref<8x128xf32, #tpu.memory_space<vmem>>, vector<8x128xf32>
    %c0_5 = arith.constant 0 : index
    %c0_6 = arith.constant 0 : index
    %5 = vector.load %arg4[%c0_5, %c0_6] : memref<784x400xbf16, #tpu.memory_space<vmem>>, vector<784x400xbf16>
    %cst = arith.constant dense<0.000000e+00> : vector<8x400xf32>
    %6 = tpu.matmul %1, %5, %cst {dimension_numbers = #tpu.dot_dimension_numbers<[1], [0], [0], [1], [0, 0, 1, 1], [], []>} : vector<8x784xbf16>, vector<784x400xbf16>, vector<8x400xf32> -> vector<8x400xf32>
    %c0_7 = arith.constant 0 : index
    %c0_8 = arith.constant 0 : index
    %7 = vector.load %arg5[%c0_7, %c0_8] : memref<10x400xbf16, #tpu.memory_space<vmem>>, vector<10x400xbf16>
    %cst_9 = arith.constant dense<0.000000e+00> : vector<8x400xf32>
    %8 = tpu.matmul %3, %7, %cst_9 {dimension_numbers = #tpu.dot_dimension_numbers<[1], [0], [0], [1], [0, 0, 1, 1], [], []>} : vector<8x10xbf16>, vector<10x400xbf16>, vector<8x400xf32> -> vector<8x400xf32>
    %9 = arith.addf %6, %8 : vector<8x400xf32>
    %c0_10 = arith.constant 0 : index
    %c0_11 = arith.constant 0 : index
    %10 = vector.load %arg6[%c0_10, %c0_11] : memref<1x400xf32, #tpu.memory_space<vmem>>, vector<1x400xf32>
    %11 = vector.broadcast %10 : vector<1x400xf32> to vector<8x400xf32>
    %12 = arith.addf %9, %11 : vector<8x400xf32>
    %cst_12 = arith.constant 0.000000e+00 : f32
    %13 = vector.broadcast %cst_12 : f32 to vector<8x400xf32>
    %14 = arith.maximumf %12, %13 : vector<8x400xf32>
    %15 = arith.truncf %14 : vector<8x400xf32> to vector<8x400xbf16>
    %c0_13 = arith.constant 0 : index
    %c0_14 = arith.constant 0 : index
    %16 = vector.load %arg7[%c0_13, %c0_14] : memref<400x400xbf16, #tpu.memory_space<vmem>>, vector<400x400xbf16>
    %cst_15 = arith.constant dense<0.000000e+00> : vector<8x400xf32>
    %17 = tpu.matmul %15, %16, %cst_15 {dimension_numbers = #tpu.dot_dimension_numbers<[1], [0], [0], [1], [0, 0, 1, 1], [], []>} : vector<8x400xbf16>, vector<400x400xbf16>, vector<8x400xf32> -> vector<8x400xf32>
    %c0_16 = arith.constant 0 : index
    %c0_17 = arith.constant 0 : index
    %18 = vector.load %arg8[%c0_16, %c0_17] : memref<1x400xf32, #tpu.memory_space<vmem>>, vector<1x400xf32>
    %19 = vector.broadcast %18 : vector<1x400xf32> to vector<8x400xf32>
    %20 = arith.addf %17, %19 : vector<8x400xf32>
    %cst_18 = arith.constant 0.000000e+00 : f32
    %21 = vector.broadcast %cst_18 : f32 to vector<8x400xf32>
    %22 = arith.maximumf %20, %21 : vector<8x400xf32>
    %23 = arith.truncf %22 : vector<8x400xf32> to vector<8x400xbf16>
    %c0_19 = arith.constant 0 : index
    %c0_20 = arith.constant 0 : index
    %24 = vector.load %arg9[%c0_19, %c0_20] : memref<400x400xbf16, #tpu.memory_space<vmem>>, vector<400x400xbf16>
    %cst_21 = arith.constant dense<0.000000e+00> : vector<8x400xf32>
    %25 = tpu.matmul %23, %24, %cst_21 {dimension_numbers = #tpu.dot_dimension_numbers<[1], [0], [0], [1], [0, 0, 1, 1], [], []>} : vector<8x400xbf16>, vector<400x400xbf16>, vector<8x400xf32> -> vector<8x400xf32>
    %c0_22 = arith.constant 0 : index
    %c0_23 = arith.constant 0 : index
    %26 = vector.load %arg10[%c0_22, %c0_23] : memref<1x400xf32, #tpu.memory_space<vmem>>, vector<1x400xf32>
    %27 = vector.broadcast %26 : vector<1x400xf32> to vector<8x400xf32>
    %28 = arith.addf %25, %27 : vector<8x400xf32>
    %cst_24 = arith.constant 0.000000e+00 : f32
    %29 = vector.broadcast %cst_24 : f32 to vector<8x400xf32>
    %30 = arith.maximumf %28, %29 : vector<8x400xf32>
    %31 = arith.truncf %30 : vector<8x400xf32> to vector<8x400xbf16>
    %c0_25 = arith.constant 0 : index
    %c0_26 = arith.constant 0 : index
    %32 = vector.load %arg11[%c0_25, %c0_26] : memref<400x256xbf16, #tpu.memory_space<vmem>>, vector<400x256xbf16>
    %cst_27 = arith.constant dense<0.000000e+00> : vector<8x256xf32>
    %33 = tpu.matmul %31, %32, %cst_27 {dimension_numbers = #tpu.dot_dimension_numbers<[1], [0], [0], [1], [0, 0, 1, 1], [], []>} : vector<8x400xbf16>, vector<400x256xbf16>, vector<8x256xf32> -> vector<8x256xf32>
    %c0_28 = arith.constant 0 : index
    %c0_29 = arith.constant 0 : index
    %34 = vector.load %arg12[%c0_28, %c0_29] : memref<1x256xf32, #tpu.memory_space<vmem>>, vector<1x256xf32>
    %35 = vector.broadcast %34 : vector<1x256xf32> to vector<8x256xf32>
    %36 = arith.addf %33, %35 : vector<8x256xf32>
    %c0_30 = arith.constant 0 : index
    %c0_31 = arith.constant 0 : index
    %37 = vector.load %arg23[%c0_30, %c0_31] : memref<8x256xf32, #tpu.memory_space<vmem>>, vector<8x256xf32>
    tpu.vector_store %arg23[%c0_30, %c0_31], %36 {strides = array<i32>} : memref<8x256xf32, #tpu.memory_space<vmem>>, vector<8x256xf32>,
    %38 = vector.extract_strided_slice %36 {offsets = [0, 0], sizes = [8, 128], strides = [1, 1]} : vector<8x256xf32> to vector<8x128xf32>
    %39 = vector.extract_strided_slice %36 {offsets = [0, 128], sizes = [8, 128], strides = [1, 1]} : vector<8x256xf32> to vector<8x128xf32>
    %cst_32 = arith.constant 5.000000e-01 : f32
    %40 = vector.broadcast %cst_32 : f32 to vector<8x128xf32>
    %41 = arith.mulf %40, %39 : vector<8x128xf32>
    %42 = math.exp %41 : vector<8x128xf32>
    %43 = arith.mulf %42, %4 : vector<8x128xf32>
    %44 = arith.addf %43, %38 : vector<8x128xf32>
    %45 = arith.truncf %44 : vector<8x128xf32> to vector<8x128xbf16>
    %c0_33 = arith.constant 0 : index
    %c0_34 = arith.constant 0 : index
    %46 = vector.load %arg13[%c0_33, %c0_34] : memref<128x400xbf16, #tpu.memory_space<vmem>>, vector<128x400xbf16>
    %cst_35 = arith.constant dense<0.000000e+00> : vector<8x400xf32>
    %47 = tpu.matmul %45, %46, %cst_35 {dimension_numbers = #tpu.dot_dimension_numbers<[1], [0], [0], [1], [0, 0, 1, 1], [], []>} : vector<8x128xbf16>, vector<128x400xbf16>, vector<8x400xf32> -> vector<8x400xf32>
    %c0_36 = arith.constant 0 : index
    %c0_37 = arith.constant 0 : index
    %48 = vector.load %arg14[%c0_36, %c0_37] : memref<10x400xbf16, #tpu.memory_space<vmem>>, vector<10x400xbf16>
    %cst_38 = arith.constant dense<0.000000e+00> : vector<8x400xf32>
    %49 = tpu.matmul %3, %48, %cst_38 {dimension_numbers = #tpu.dot_dimension_numbers<[1], [0], [0], [1], [0, 0, 1, 1], [], []>} : vector<8x10xbf16>, vector<10x400xbf16>, vector<8x400xf32> -> vector<8x400xf32>
    %50 = arith.addf %47, %49 : vector<8x400xf32>
    %c0_39 = arith.constant 0 : index
    %c0_40 = arith.constant 0 : index
    %51 = vector.load %arg15[%c0_39, %c0_40] : memref<1x400xf32, #tpu.memory_space<vmem>>, vector<1x400xf32>
    %52 = vector.broadcast %51 : vector<1x400xf32> to vector<8x400xf32>
    %53 = arith.addf %50, %52 : vector<8x400xf32>
    %cst_41 = arith.constant 0.000000e+00 : f32
    %54 = vector.broadcast %cst_41 : f32 to vector<8x400xf32>
    %55 = arith.maximumf %53, %54 : vector<8x400xf32>
    %56 = arith.truncf %55 : vector<8x400xf32> to vector<8x400xbf16>
    %c0_42 = arith.constant 0 : index
    %c0_43 = arith.constant 0 : index
    %57 = vector.load %arg16[%c0_42, %c0_43] : memref<400x400xbf16, #tpu.memory_space<vmem>>, vector<400x400xbf16>
    %cst_44 = arith.constant dense<0.000000e+00> : vector<8x400xf32>
    %58 = tpu.matmul %56, %57, %cst_44 {dimension_numbers = #tpu.dot_dimension_numbers<[1], [0], [0], [1], [0, 0, 1, 1], [], []>} : vector<8x400xbf16>, vector<400x400xbf16>, vector<8x400xf32> -> vector<8x400xf32>
    %c0_45 = arith.constant 0 : index
    %c0_46 = arith.constant 0 : index
    %59 = vector.load %arg17[%c0_45, %c0_46] : memref<1x400xf32, #tpu.memory_space<vmem>>, vector<1x400xf32>
    %60 = vector.broadcast %59 : vector<1x400xf32> to vector<8x400xf32>
    %61 = arith.addf %58, %60 : vector<8x400xf32>
    %cst_47 = arith.constant 0.000000e+00 : f32
    %62 = vector.broadcast %cst_47 : f32 to vector<8x400xf32>
    %63 = arith.maximumf %61, %62 : vector<8x400xf32>
    %64 = arith.truncf %63 : vector<8x400xf32> to vector<8x400xbf16>
    %c0_48 = arith.constant 0 : index
    %c0_49 = arith.constant 0 : index
    %65 = vector.load %arg18[%c0_48, %c0_49] : memref<400x400xbf16, #tpu.memory_space<vmem>>, vector<400x400xbf16>
    %cst_50 = arith.constant dense<0.000000e+00> : vector<8x400xf32>
    %66 = tpu.matmul %64, %65, %cst_50 {dimension_numbers = #tpu.dot_dimension_numbers<[1], [0], [0], [1], [0, 0, 1, 1], [], []>} : vector<8x400xbf16>, vector<400x400xbf16>, vector<8x400xf32> -> vector<8x400xf32>
    %c0_51 = arith.constant 0 : index
    %c0_52 = arith.constant 0 : index
    %67 = vector.load %arg19[%c0_51, %c0_52] : memref<1x400xf32, #tpu.memory_space<vmem>>, vector<1x400xf32>
    %68 = vector.broadcast %67 : vector<1x400xf32> to vector<8x400xf32>
    %69 = arith.addf %66, %68 : vector<8x400xf32>
    %cst_53 = arith.constant 0.000000e+00 : f32
    %70 = vector.broadcast %cst_53 : f32 to vector<8x400xf32>
    %71 = arith.maximumf %69, %70 : vector<8x400xf32>
    %72 = arith.truncf %71 : vector<8x400xf32> to vector<8x400xbf16>
    %c0_54 = arith.constant 0 : index
    %c0_55 = arith.constant 0 : index
    %73 = vector.load %arg20[%c0_54, %c0_55] : memref<400x896xbf16, #tpu.memory_space<vmem>>, vector<400x896xbf16>
    %cst_56 = arith.constant dense<0.000000e+00> : vector<8x896xf32>
    %74 = tpu.matmul %72, %73, %cst_56 {dimension_numbers = #tpu.dot_dimension_numbers<[1], [0], [0], [1], [0, 0, 1, 1], [], []>} : vector<8x400xbf16>, vector<400x896xbf16>, vector<8x896xf32> -> vector<8x896xf32>
    %c0_57 = arith.constant 0 : index
    %c0_58 = arith.constant 0 : index
    %75 = vector.load %arg21[%c0_57, %c0_58] : memref<1x896xf32, #tpu.memory_space<vmem>>, vector<1x896xf32>
    %76 = vector.broadcast %75 : vector<1x896xf32> to vector<8x896xf32>
    %77 = arith.addf %74, %76 : vector<8x896xf32>
    %78 = arith.negf %77 : vector<8x896xf32>
    %79 = math.exp %78 : vector<8x896xf32>
    %cst_59 = arith.constant 1.000000e+00 : f32
    %80 = vector.broadcast %cst_59 : f32 to vector<8x896xf32>
    %81 = arith.addf %80, %79 : vector<8x896xf32>
    %82 = arith.divf %80, %81 : vector<8x896xf32>
    %c0_60 = arith.constant 0 : index
    %c0_61 = arith.constant 0 : index
    %83 = vector.load %arg22[%c0_60, %c0_61] : memref<8x896xf32, #tpu.memory_space<vmem>>, vector<8x896xf32>
    tpu.vector_store %arg22[%c0_60, %c0_61], %82 {strides = array<i32>} : memref<8x896xf32, #tpu.memory_space<vmem>>, vector<8x896xf32>,
    return
  }
  func.func @transform_0(%arg0: i32) -> (i32, i32) {
    %c0_i32 = arith.constant 0 : i32
    %c0_i32_0 = arith.constant 0 : i32
    return %arg0, %c0_i32 : i32, i32
  }
  func.func @transform_1(%arg0: i32) -> (i32, i32) {
    %c0_i32 = arith.constant 0 : i32
    %c0_i32_0 = arith.constant 0 : i32
    return %arg0, %c0_i32 : i32, i32
  }
  func.func @transform_2(%arg0: i32) -> (i32, i32) {
    %c0_i32 = arith.constant 0 : i32
    %c0_i32_0 = arith.constant 0 : i32
    return %arg0, %c0_i32 : i32, i32
  }
  func.func @transform_3(%arg0: i32) -> (i32, i32) {
    %c0_i32 = arith.constant 0 : i32
    %c0_i32_0 = arith.constant 0 : i32
    %c0_i32_1 = arith.constant 0 : i32
    return %c0_i32, %c0_i32_0 : i32, i32
  }
  func.func @transform_4(%arg0: i32) -> (i32, i32) {
    %c0_i32 = arith.constant 0 : i32
    %c0_i32_0 = arith.constant 0 : i32
    %c0_i32_1 = arith.constant 0 : i32
    return %c0_i32, %c0_i32_0 : i32, i32
  }
  func.func @transform_5(%arg0: i32) -> (i32, i32) {
    %c0_i32 = arith.constant 0 : i32
    %c0_i32_0 = arith.constant 0 : i32
    %c0_i32_1 = arith.constant 0 : i32
    return %c0_i32, %c0_i32_0 : i32, i32
  }
  func.func @transform_6(%arg0: i32) -> (i32, i32) {
    %c0_i32 = arith.constant 0 : i32
    %c0_i32_0 = arith.constant 0 : i32
    %c0_i32_1 = arith.constant 0 : i32
    return %c0_i32, %c0_i32_0 : i32, i32
  }
  func.func @transform_7(%arg0: i32) -> (i32, i32) {
    %c0_i32 = arith.constant 0 : i32
    %c0_i32_0 = arith.constant 0 : i32
    %c0_i32_1 = arith.constant 0 : i32
    return %c0_i32, %c0_i32_0 : i32, i32
  }
  func.func @transform_8(%arg0: i32) -> (i32, i32) {
    %c0_i32 = arith.constant 0 : i32
    %c0_i32_0 = arith.constant 0 : i32
    %c0_i32_1 = arith.constant 0 : i32
    return %c0_i32, %c0_i32_0 : i32, i32
  }
  func.func @transform_9(%arg0: i32) -> (i32, i32) {
    %c0_i32 = arith.constant 0 : i32
    %c0_i32_0 = arith.constant 0 : i32
    %c0_i32_1 = arith.constant 0 : i32
    return %c0_i32, %c0_i32_0 : i32, i32
  }
  func.func @transform_10(%arg0: i32) -> (i32, i32) {
    %c0_i32 = arith.constant 0 : i32
    %c0_i32_0 = arith.constant 0 : i32
    %c0_i32_1 = arith.constant 0 : i32
    return %c0_i32, %c0_i32_0 : i32, i32
  }
  func.func @transform_11(%arg0: i32) -> (i32, i32) {
    %c0_i32 = arith.constant 0 : i32
    %c0_i32_0 = arith.constant 0 : i32
    %c0_i32_1 = arith.constant 0 : i32
    return %c0_i32, %c0_i32_0 : i32, i32
  }
  func.func @transform_12(%arg0: i32) -> (i32, i32) {
    %c0_i32 = arith.constant 0 : i32
    %c0_i32_0 = arith.constant 0 : i32
    %c0_i32_1 = arith.constant 0 : i32
    return %c0_i32, %c0_i32_0 : i32, i32
  }
  func.func @transform_13(%arg0: i32) -> (i32, i32) {
    %c0_i32 = arith.constant 0 : i32
    %c0_i32_0 = arith.constant 0 : i32
    %c0_i32_1 = arith.constant 0 : i32
    return %c0_i32, %c0_i32_0 : i32, i32
  }
  func.func @transform_14(%arg0: i32) -> (i32, i32) {
    %c0_i32 = arith.constant 0 : i32
    %c0_i32_0 = arith.constant 0 : i32
    %c0_i32_1 = arith.constant 0 : i32
    return %c0_i32, %c0_i32_0 : i32, i32
  }
  func.func @transform_15(%arg0: i32) -> (i32, i32) {
    %c0_i32 = arith.constant 0 : i32
    %c0_i32_0 = arith.constant 0 : i32
    %c0_i32_1 = arith.constant 0 : i32
    return %c0_i32, %c0_i32_0 : i32, i32
  }
  func.func @transform_16(%arg0: i32) -> (i32, i32) {
    %c0_i32 = arith.constant 0 : i32
    %c0_i32_0 = arith.constant 0 : i32
    %c0_i32_1 = arith.constant 0 : i32
    return %c0_i32, %c0_i32_0 : i32, i32
  }
  func.func @transform_17(%arg0: i32) -> (i32, i32) {
    %c0_i32 = arith.constant 0 : i32
    %c0_i32_0 = arith.constant 0 : i32
    %c0_i32_1 = arith.constant 0 : i32
    return %c0_i32, %c0_i32_0 : i32, i32
  }
  func.func @transform_18(%arg0: i32) -> (i32, i32) {
    %c0_i32 = arith.constant 0 : i32
    %c0_i32_0 = arith.constant 0 : i32
    %c0_i32_1 = arith.constant 0 : i32
    return %c0_i32, %c0_i32_0 : i32, i32
  }
  func.func @transform_19(%arg0: i32) -> (i32, i32) {
    %c0_i32 = arith.constant 0 : i32
    %c0_i32_0 = arith.constant 0 : i32
    %c0_i32_1 = arith.constant 0 : i32
    return %c0_i32, %c0_i32_0 : i32, i32
  }
  func.func @transform_20(%arg0: i32) -> (i32, i32) {
    %c0_i32 = arith.constant 0 : i32
    %c0_i32_0 = arith.constant 0 : i32
    %c0_i32_1 = arith.constant 0 : i32
    return %c0_i32, %c0_i32_0 : i32, i32
  }
  func.func @transform_21(%arg0: i32) -> (i32, i32) {
    %c0_i32 = arith.constant 0 : i32
    %c0_i32_0 = arith.constant 0 : i32
    return %arg0, %c0_i32 : i32, i32
  }
  func.func @transform_22(%arg0: i32) -> (i32, i32) {
    %c0_i32 = arith.constant 0 : i32
    %c0_i32_0 = arith.constant 0 : i32
    return %arg0, %c0_i32 : i32, i32
  }
}

</mosaic_0001>

<bundles_post_ra>
// kernel: tpu_custom_call.1
= control target key start
LH: loop header
LB: loop body
LE: loop exit
PB: predicated region body
PF: predicated region fallthrough
CT: control target
= control target key end

     0   :  { %s12467_s0 = inlined_call_operand.hbm [shape: f32[8,784], index: 0, kind: input, shape index: {}]   ;;  %s12468_s1 = inlined_call_operand.vmem [shape: f32[8,10], index: 1, kind: input, shape index: {}]   ;;  %s12469_s2 = inlined_call_operand.vmem [shape: f32[8,128], index: 2, kind: input, shape index: {}]   ;;  %s12470_s3 = inlined_call_operand.vmem [shape: bf16[784,400], index: 3, kind: input, shape index: {}]   ;;  %s12471_s4 = inlined_call_operand.hbm [shape: bf16[10,400], index: 4, kind: input, shape index: {}]   ;;  %s12472_s5 = inlined_call_operand.hbm [shape: f32[1,400], index: 5, kind: input, shape index: {}]   ;;  %s12473_s6 = inlined_call_operand.vmem [shape: bf16[400,400], index: 6, kind: input, shape index: {}]   ;;  %s12474_s7 = inlined_call_operand.hbm [shape: f32[1,400], index: 7, kind: input, shape index: {}]   ;;  %s12475_s8 = inlined_call_operand.vmem [shape: bf16[400,400], index: 8, kind: input, shape index: {}]   ;;  %s12476_s9 = inlined_call_operand.hbm [shape: f32[1,400], index: 9, kind: input, shape index: {}]   ;;  %s12477_s10 = inlined_call_operand.vmem [shape: bf16[400,256], index: 10, kind: input, shape index: {}]   ;;  %s12478_s11 = inlined_call_operand.vmem [shape: f32[1,256], index: 11, kind: input, shape index: {}]   ;;  %s12479_s12 = inlined_call_operand.vmem [shape: bf16[128,400], index: 12, kind: input, shape index: {}]   ;;  %s12480_s13 = inlined_call_operand.vmem [shape: bf16[10,400], index: 13, kind: input, shape index: {}]   ;;  %s12481_s14 = inlined_call_operand.vmem [shape: f32[1,400], index: 14, kind: input, shape index: {}]   ;;  %s12482_s15 = inlined_call_operand.hbm [shape: bf16[400,400], index: 15, kind: input, shape index: {}]   ;;  %s12483_s16 = inlined_call_operand.hbm [shape: f32[1,400], index: 16, kind: input, shape index: {}]   ;;  %s12484_s17 = inlined_call_operand.hbm [shape: bf16[400,400], index: 17, kind: input, shape index: {}]   ;;  %s12485_s18 = inlined_call_operand.hbm [shape: f32[1,400], index: 18, kind: input, shape index: {}]   ;;  %s12486_s19 = inlined_call_operand.vmem [shape: bf16[400,896], index: 19, kind: input, shape index: {}]   ;;  %s12487_s20 = inlined_call_operand.vmem [shape: f32[1,896], index: 20, kind: input, shape index: {}]   ;;  %s12488_s21 = inlined_call_operand.hbm [shape: f32[8,896], index: 21, kind: output, shape index: {0}]   ;;  %s12489_s22 = inlined_call_operand.hbm [shape: f32[8,256], index: 22, kind: output, shape index: {1}]  }
   0x1   :  { %12497 = sst [smem:[#allocation27_spill]] %s12467_s0 }
   0x2   :  { %12498 = sst [smem:[#allocation28_spill]] %s12468_s1 }
   0x3   :  { %12499 = sst [smem:[#allocation29_spill]] %s12469_s2 }
   0x4   :  { %12500 = sst [smem:[#allocation30_spill]] %s12470_s3 }
   0x5   :  { %12501 = sst [smem:[#allocation31_spill]] %s12471_s4 }
   0x6   :  { %12502 = sst [smem:[#allocation32_spill]] %s12472_s5 }
   0x7   :  { %12503 = sst [smem:[#allocation33_spill]] %s12473_s6 }
   0x8   :  { %12504 = sst [smem:[#allocation34_spill]] %s12488_s21 }
   0x9   :  { %12505 = sst [smem:[#allocation35_spill]] %s12489_s22 }
   0xa   :  { %28 = vsyncpa [#allocation3], 0 }
   0xb   :  { %29 = vsyncpa [#allocation6], 0 }
   0xc   :  { %30 = vsyncpa [#allocation9], 0 }
   0xd   :  { %31 = vsyncpa [#allocation12], 0 }
   0xe   :  { %32 = vsyncpa [#allocation15], 0 }
   0xf   :  { %33 = vsyncpa [#allocation4], 0 }
  0x10   :  { %34 = vsyncpa [#allocation19], 0  ;;  %s9988_s3 = smov [#allocation5]   ;;  %s12506_s4 = sld [smem:[#allocation31_spill]] }
  0x11   :  { %s56_s28 = sshll.u32 %s9988_s3, 4  ;;  %s57_s28 = int_to_ptr.vmem [resolvable:$true] %s56_s28 }
  0x16   :  { %s9732_s0 = scalar_lea.hbm %s12506_s4, 512 }
  0x17   :  { %p9733_p0 = scmp.ne.s32.totalorder %s12506_s4, %s9732_s0  ;;  %p9736_p1 = scmp.lt.u32.totalorder %s9732_s0, %s12506_s4 }
  0x19   :  { %p9738_p2 = pnand %p9736_p1, %p9733_p0 }
  0x1b   :  { %9741 = shalt.err (!%p9738_p2)
}
  0x1c   :  { %s9742_s6 = scalar_lea.vmem %s57_s28, 512  ;;  %p9747_p4 = scmp.lt.s32.totalorder %s57_s28, %s57_s28 }
  0x1d   :  { %p9743_p3 = scmp.ne.s32.totalorder %s57_s28, %s9742_s6  ;;  %p9748_p5 = scmp.lt.s32.totalorder %s9742_s6, %s9742_s6 }
  0x1f   :  { %p9749_p6 = por %p9748_p5, %p9747_p4 }
  0x21   :  { %p9750_p7 = pnand %p9749_p6, %p9743_p3 }
  0x23   :  { %9753 = shalt.err (!%p9750_p7)
}
  0x24   :  { %s9989_s25 = smov 256   ;;  %s9990_s26 = smov 16  }
  0x25   :  { %62 = dma.hbm_to_vmem [thread:$0]  %s12506_s4, 512, %s57_s28, [#allocation6], %s9989_s25, %s9989_s25, %s9990_s26  }
  0x26   :  { %s9991_s3 = smov [#allocation8]   ;;  %s9992_s30 = smov [#allocation11]  }
  0x27   :  { %s81_s29 = sshll.u32 %s9991_s3, 4  ;;  %s112_s0 = sshll.u32 %s9992_s30, 4  ;;  %s82_s29 = int_to_ptr.vmem [resolvable:$true] %s81_s29  ;;  %s113_s0 = int_to_ptr.vmem [resolvable:$true] %s112_s0 }
  0x28   :  { %s9754_s5 = scalar_lea.hbm %s12474_s7, 64 }
  0x29   :  { %p9755_p8 = scmp.ne.s32.totalorder %s12474_s7, %s9754_s5  ;;  %p9758_p9 = scmp.lt.u32.totalorder %s9754_s5, %s12474_s7 }
  0x2b   :  { %p9760_p10 = pnand %p9758_p9, %p9755_p8 }
  0x2d   :  { %9763 = shalt.err (!%p9760_p10)
}
  0x2e   :  { %s9764_s28 = scalar_lea.vmem %s82_s29, 64  ;;  %p9769_p12 = scmp.lt.s32.totalorder %s82_s29, %s82_s29 }
  0x2f   :  { %p9765_p11 = scmp.ne.s32.totalorder %s82_s29, %s9764_s28  ;;  %p9770_p13 = scmp.lt.s32.totalorder %s9764_s28, %s9764_s28 }
  0x31   :  { %p9771_p0 = por %p9770_p13, %p9769_p12 }
  0x33   :  { %p9772_p1 = pnand %p9771_p0, %p9765_p11 }
  0x35   :  { %9775 = shalt.err (!%p9772_p1)
}
  0x36   :  { %84 = dma.hbm_to_vmem [thread:$0]  %s12474_s7, 64, %s82_s29, [#allocation9]  }
  0x37   :  { %s9776_s30 = scalar_lea.hbm %s12482_s15, 12800 }
  0x38   :  { %p9777_p2 = scmp.ne.s32.totalorder %s12482_s15, %s9776_s30  ;;  %p9780_p3 = scmp.lt.u32.totalorder %s9776_s30, %s12482_s15 }
  0x3a   :  { %p9782_p4 = pnand %p9780_p3, %p9777_p2 }
  0x3c   :  { %9785 = shalt.err (!%p9782_p4)
}
  0x3d   :  { %s9786_s5 = scalar_lea.vmem %s113_s0, 12800  ;;  %p9791_p6 = scmp.lt.s32.totalorder %s113_s0, %s113_s0 }
  0x3e   :  { %p9787_p5 = scmp.ne.s32.totalorder %s113_s0, %s9786_s5  ;;  %p9792_p7 = scmp.lt.s32.totalorder %s9786_s5, %s9786_s5 }
  0x40   :  { %p9793_p8 = por %p9792_p7, %p9791_p6 }
  0x42   :  { %p9794_p9 = pnand %p9793_p8, %p9787_p5 }
  0x44   :  { %9797 = shalt.err (!%p9794_p9)
}
  0x45   :  { %118 = dma.hbm_to_vmem [thread:$0]  %s12482_s15, 12800, %s113_s0, [#allocation12], %s9989_s25, %s9989_s25, %s9990_s26  }
  0x46   :  { %s9993_s24 = smov [#allocation14]   ;;  %s9994_s28 = smov [#allocation2]  }
  0x47   :  { %s134_s6 = sshll.u32 %s9993_s24, 4  ;;  %s41_s4 = sshll.u32 %s9994_s28, 4  ;;  %s135_s6 = int_to_ptr.vmem [resolvable:$true] %s134_s6  ;;  %s42_s4 = int_to_ptr.vmem [resolvable:$true] %s41_s4 }
  0x48   :  { %s9798_s3 = scalar_lea.hbm %s12484_s17, 12800 }
  0x49   :  { %p9799_p10 = scmp.ne.s32.totalorder %s12484_s17, %s9798_s3  ;;  %p9802_p11 = scmp.lt.u32.totalorder %s9798_s3, %s12484_s17 }
  0x4b   :  { %p9804_p12 = pnand %p9802_p11, %p9799_p10 }
  0x4d   :  { %9807 = shalt.err (!%p9804_p12)
}
  0x4e   :  { %s9808_s15 = scalar_lea.vmem %s135_s6, 12800  ;;  %p9813_p0 = scmp.lt.s32.totalorder %s135_s6, %s135_s6 }
  0x4f   :  { %p9809_p13 = scmp.ne.s32.totalorder %s135_s6, %s9808_s15  ;;  %p9814_p1 = scmp.lt.s32.totalorder %s9808_s15, %s9808_s15 }
  0x51   :  { %p9815_p2 = por %p9814_p1, %p9813_p0 }
  0x53   :  { %p9816_p3 = pnand %p9815_p2, %p9809_p13 }
  0x55   :  { %9819 = shalt.err (!%p9816_p3)
}
  0x56   :  { %140 = dma.hbm_to_vmem [thread:$0]  %s12484_s17, 12800, %s135_s6, [#allocation15], %s9989_s25, %s9989_s25, %s9990_s26  }
  0x57   :  { %s12507_s29 = sld [smem:[#allocation27_spill]] }
  0x5d   :  { %s9820_s24 = scalar_lea.hbm %s12507_s29, 896 }
  0x5e   :  { %p9821_p4 = scmp.ne.s32.totalorder %s12507_s29, %s9820_s24  ;;  %p9824_p5 = scmp.lt.u32.totalorder %s9820_s24, %s12507_s29 }
  0x60   :  { %p9826_p6 = pnand %p9824_p5, %p9821_p4 }
  0x62   :  { %9829 = shalt.err (!%p9826_p6)
}
  0x63   :  { %s9830_s30 = scalar_lea.vmem %s42_s4, 896  ;;  %p9835_p8 = scmp.lt.s32.totalorder %s42_s4, %s42_s4 }
  0x64   :  { %p9831_p7 = scmp.ne.s32.totalorder %s42_s4, %s9830_s30  ;;  %p9836_p9 = scmp.lt.s32.totalorder %s9830_s30, %s9830_s30 }
  0x66   :  { %p9837_p10 = por %p9836_p9, %p9835_p8 }
  0x68   :  { %p9838_p11 = pnand %p9837_p10, %p9831_p7 }
  0x6a   :  { %9841 = shalt.err (!%p9838_p11)
}
  0x6b   :  { %44 = dma.hbm_to_vmem [thread:$0]  %s12507_s29, 896, %s42_s4, [#allocation3]  }
  0x6c   :  { %s9995_s26 = smov [#allocation7]   ;;  %s9996_s21 = smov [#allocation10]  }
  0x6d   :  { %s69_s6 = sshll.u32 %s9995_s26, 4  ;;  %s93_s22 = sshll.u32 %s9996_s21, 4  ;;  %s70_s6 = int_to_ptr.vmem [resolvable:$true] %s69_s6  ;;  %s94_s22 = int_to_ptr.vmem [resolvable:$true] %s93_s22 }
  0x6e   :  { %s12508_s0 = sld [smem:[#allocation32_spill]] }
  0x74   :  { %s9842_s1 = scalar_lea.hbm %s12508_s0, 64 }
  0x75   :  { %p9843_p12 = scmp.ne.s32.totalorder %s12508_s0, %s9842_s1  ;;  %p9846_p13 = scmp.lt.u32.totalorder %s9842_s1, %s12508_s0 }
  0x77   :  { %p9848_p0 = pnand %p9846_p13, %p9843_p12 }
  0x79   :  { %9851 = shalt.err (!%p9848_p0)
}
  0x7a   :  { %s9852_s4 = scalar_lea.vmem %s70_s6, 64  ;;  %p9857_p2 = scmp.lt.s32.totalorder %s70_s6, %s70_s6 }
  0x7b   :  { %p9853_p1 = scmp.ne.s32.totalorder %s70_s6, %s9852_s4  ;;  %p9858_p3 = scmp.lt.s32.totalorder %s9852_s4, %s9852_s4 }
  0x7d   :  { %p9859_p4 = por %p9858_p3, %p9857_p2 }
  0x7f   :  { %p9860_p5 = pnand %p9859_p4, %p9853_p1 }
  0x81   :  { %9863 = shalt.err (!%p9860_p5)
}
  0x82   :  { %72 = dma.hbm_to_vmem [thread:$0]  %s12508_s0, 64, %s70_s6, [#allocation6]  }
  0x83   :  { %s9864_s30 = scalar_lea.hbm %s12476_s9, 64 }
  0x84   :  { %p9865_p6 = scmp.ne.s32.totalorder %s12476_s9, %s9864_s30  ;;  %p9868_p7 = scmp.lt.u32.totalorder %s9864_s30, %s12476_s9 }
  0x86   :  { %p9870_p8 = pnand %p9868_p7, %p9865_p6 }
  0x88   :  { %9873 = shalt.err (!%p9870_p8)
}
  0x89   :  { %s9874_s23 = scalar_lea.vmem %s94_s22, 64  ;;  %p9879_p10 = scmp.lt.s32.totalorder %s94_s22, %s94_s22 }
  0x8a   :  { %p9875_p9 = scmp.ne.s32.totalorder %s94_s22, %s9874_s23  ;;  %p9880_p11 = scmp.lt.s32.totalorder %s9874_s23, %s9874_s23 }
  0x8c   :  { %p9881_p12 = por %p9880_p11, %p9879_p10 }
  0x8e   :  { %p9882_p13 = pnand %p9881_p12, %p9875_p9 }
  0x90   :  { %9885 = shalt.err (!%p9882_p13)
}
  0x91   :  { %96 = dma.hbm_to_vmem [thread:$0]  %s12476_s9, 64, %s94_s22, [#allocation9]  }
  0x92   :  { %s9997_s0 = smov [#allocation13]   ;;  %s9998_s5 = smov [#allocation16]  }
  0x93   :  { %s125_s1 = sshll.u32 %s9997_s0, 4  ;;  %s147_s7 = sshll.u32 %s9998_s5, 4  ;;  %s126_s1 = int_to_ptr.vmem [resolvable:$true] %s125_s1  ;;  %s148_s7 = int_to_ptr.vmem [resolvable:$true] %s147_s7 }
  0x94   :  { %s9886_s4 = scalar_lea.hbm %s12483_s16, 64 }
  0x95   :  { %p9887_p0 = scmp.ne.s32.totalorder %s12483_s16, %s9886_s4  ;;  %p9890_p1 = scmp.lt.u32.totalorder %s9886_s4, %s12483_s16 }
  0x97   :  { %p9892_p2 = pnand %p9890_p1, %p9887_p0 }
  0x99   :  { %9895 = shalt.err (!%p9892_p2)
}
  0x9a   :  { %s9896_s9 = scalar_lea.vmem %s126_s1, 64  ;;  %p9901_p4 = scmp.lt.s32.totalorder %s126_s1, %s126_s1 }
  0x9b   :  { %p9897_p3 = scmp.ne.s32.totalorder %s126_s1, %s9896_s9  ;;  %p9902_p5 = scmp.lt.s32.totalorder %s9896_s9, %s9896_s9 }
  0x9d   :  { %p9903_p6 = por %p9902_p5, %p9901_p4 }
  0x9f   :  { %p9904_p7 = pnand %p9903_p6, %p9897_p3 }
  0xa1   :  { %9907 = shalt.err (!%p9904_p7)
}
  0xa2   :  { %128 = dma.hbm_to_vmem [thread:$0]  %s12483_s16, 64, %s126_s1, [#allocation12]  }
  0xa3   :  { %s9908_s26 = scalar_lea.hbm %s12485_s18, 64 }
  0xa4   :  { %p9909_p8 = scmp.ne.s32.totalorder %s12485_s18, %s9908_s26  ;;  %p9912_p9 = scmp.lt.u32.totalorder %s9908_s26, %s12485_s18 }
  0xa6   :  { %p9914_p10 = pnand %p9912_p9, %p9909_p8 }
  0xa8   :  { %9917 = shalt.err (!%p9914_p10)
}
  0xa9   :  { %s9918_s0 = scalar_lea.vmem %s148_s7, 64  ;;  %p9923_p12 = scmp.lt.s32.totalorder %s148_s7, %s148_s7 }
  0xaa   :  { %p9919_p11 = scmp.ne.s32.totalorder %s148_s7, %s9918_s0  ;;  %p9924_p13 = scmp.lt.s32.totalorder %s9918_s0, %s9918_s0 }
  0xac   :  { %p9925_p0 = por %p9924_p13, %p9923_p12 }
  0xae   :  { %p9926_p1 = pnand %p9925_p0, %p9919_p11 }
  0xb0   :  { %9929 = shalt.err (!%p9926_p1)
}
  0xb1   :  { %150 = dma.hbm_to_vmem [thread:$0]  %s12485_s18, 64, %s148_s7, [#allocation15]  }
  0xb2   :  { %9974 = dma.done.wait [#allocation3], 896  }
  0xb3   :  { %9975 = vsyncadd [#allocation3], 4294966400 }
  0xb4   :  { %9976 = dma.done.wait [#allocation6], 576  }
  0xb5   :  { %9977 = vsyncadd [#allocation6], 4294966720 }
  0xb6   :  { %9978 = dma.done.wait [#allocation9], 128  }
  0xb7   :  { %9979 = vsyncadd [#allocation9], 4294967168 }
  0xb8   :  { %9980 = dma.done.wait [#allocation12], 12864  }
  0xb9   :  { %9981 = vsyncadd [#allocation12], 4294954432 }
  0xba   :  { %9982 = dma.done.wait [#allocation15], 12864  }
  0xbb   :  { %9983 = vsyncadd [#allocation15], 4294954432  ;;  %v9999_v0 = vmov 0   ;;  %vm420_vm0 = vcmask 1044480   ;;  %s12509_s28 = sld [smem:[#allocation30_spill]]  ;;  %s12510_s2 = sld [smem:[#allocation28_spill]] }
  0xbc   :  { %465 = vmatprep.mubr.bf16.mxu0 %v9999_v0  ;;  %v8423_v1 = vld [vmem:[#allocation5 + $0x4] ss:$16 sps:$4 sm:$0x1f]   ;;  %v8427_v3 = vld [vmem:[#allocation5] ss:$16 sps:$4 sm:$0x1f]  }
  0xbd   :  { %7428 = vmatprep.subr.msk.bf16.mxu0 %vm420_vm0, %v8423_v1  ;;  %v8429_v6 = vld [vmem:[#allocation5 + $0xc] ss:$16 sps:$4 sm:$0x1f]   ;;  %v422_v7 = vsel %vm420_vm0, %v8427_v3, 0  ;;  %vm416_vm1 = vcmask 80896   ;;  %v186_v49 = vld [vmem:[#allocation2 + $0x18] sm:$0xff] }
  0xbe   :  { %434 = vmatpush1.bf16.msra.mxu0 %v422_v7  ;;  %v8433_v10 = vld [vmem:[#allocation5 + $0x8] ss:$16 sps:$4 sm:$0x1f]   ;;  %v10375_v52 = vpack.c.bf16 %v186_v49, %v186_v49  ;;  %v184_v58 = vld [vmem:[#allocation2 + $0x8] sm:$0xff]  ;;  %vm1495_vm2 = vcmask 130048   ;;  %s12511_s21 = sld [smem:[#allocation33_spill]] }
  0xbf   :  { %7430 = vmatprep.subr.msk.bf16.mxu0 %vm420_vm0, %v8429_v6  ;;  %v428_v13 = vsel %vm420_vm0, %v8433_v10, 0  ;;  %v191_v60 = vpack.c.bf16 %v184_v58, %v184_v58  ;;  %v185_v7 = vld [vmem:[#allocation2 + $0x10] sm:$0xff] }
  0xc0   :  { %1572 = vmatprep.mubr.bf16.mxu1 %v10375_v52 }
  0xc1   :  { %v8425_v2 = vld [vmem:[%s12509_s28 + $0x204] ss:$16 sps:$4 sm:$0xff]   ;;  %v8428_v4 = vld [vmem:[%s12509_s28 + $0x200] ss:$16 sps:$4 sm:$0xff]  }
  0xc2   :  { %v197_v5 = vld [vmem:[%s12510_s2] sm:$0xff]  ;;  %1540 = vmatprep.subr.bf16.mxu1 %v8425_v2 }
  0xc3   :  { %1541 = vmatpush1.bf16.msra.mxu1 %v8428_v4  ;;  %v10246_v8 = vpack.c.bf16 %v197_v5, %v197_v5  ;;  %v8431_v9 = vld [vmem:[%s12509_s28 + $0x224] ss:$16 sps:$4 sm:$0xff]   ;;  %v8434_v11 = vld [vmem:[%s12509_s28 + $0x220] ss:$16 sps:$4 sm:$0xff]  }
  0xc4   :  { %1542 = vmatprep.subr.bf16.mxu1 %v8431_v9  ;;  %v8435_v12 = vld [vmem:[%s12509_s28 + $0x244] ss:$16 sps:$4 sm:$0xff]   ;;  %v8437_v14 = vld [vmem:[%s12509_s28 + $0x240] ss:$16 sps:$4 sm:$0xff]  }
  0xc5   :  { %7429 = vmatmul.mubr.msk.bf16.vlgmr.msra.gmra.mrb[0].mxu0 %vm416_vm1, %v10246_v8  ;;  %v8440_v15 = vld [vmem:[%s12509_s28 + $0x4] ss:$16 sps:$4 sm:$0xff]   ;;  %v8443_v17 = vld [vmem:[%s12509_s28 + $0x260] ss:$16 sps:$4 sm:$0xff]  }
  0xc6   :  { %475 = vmatpush1.bf16.msra.mxu0 %v428_v13  ;;  %v8441_v16 = vld [vmem:[%s12509_s28 + $0x264] ss:$16 sps:$4 sm:$0xff]   ;;  %506 = vmatprep.mubr.bf16.mxu0 %v9999_v0  ;;  %v8438_v18 = vld [vmem:[%s12509_s28] ss:$16 sps:$4 sm:$0xff]  }
  0xc7   :  { %1543 = vmatpush1.bf16.msra.mxu1 %v8434_v11  ;;  %1499 = vmatprep.subr.bf16.mxu0 %v8440_v15  ;;  %v8447_v19 = vld [vmem:[%s12509_s28 + $0x284] ss:$16 sps:$4 sm:$0xff]   ;;  %v8449_v21 = vld [vmem:[%s12509_s28 + $0x280] ss:$16 sps:$4 sm:$0xff]   ;;  %v8530_v15 = vld [vmem:[%s12509_s28 + $0xc] ss:$16 sps:$4 sm:$0xff]  }
  0xc8   :  { %1544 = vmatprep.subr.bf16.mxu1 %v8435_v12  ;;  %v8446_v20 = vld [vmem:[%s12509_s28 + $0x24] ss:$16 sps:$4 sm:$0xff]   ;;  %v8444_v22 = vld [vmem:[%s12509_s28 + $0x20] ss:$16 sps:$4 sm:$0xff]   ;;  %v10432_v12 = vpack.c.bf16 %v185_v7, %v185_v7 }
  0xc9   :  { %v8453_v23 = vld [vmem:[%s12509_s28 + $0x2a4] ss:$16 sps:$4 sm:$0xff]   ;;  %v8455_v25 = vld [vmem:[%s12509_s28 + $0x2a0] ss:$16 sps:$4 sm:$0xff]  }
  0xca   :  { %v8452_v24 = vld [vmem:[%s12509_s28 + $0x44] ss:$16 sps:$4 sm:$0xff]   ;;  %v8450_v26 = vld [vmem:[%s12509_s28 + $0x40] ss:$16 sps:$4 sm:$0xff]  }
  0xcb   :  { %1545 = vmatpush1.bf16.msra.mxu1 %v8437_v14  ;;  %v8459_v27 = vld [vmem:[%s12509_s28 + $0x2c4] ss:$16 sps:$4 sm:$0xff]   ;;  %v8461_v29 = vld [vmem:[%s12509_s28 + $0x2c0] ss:$16 sps:$4 sm:$0xff]  }
  0xcc   :  { %1546 = vmatprep.subr.bf16.mxu1 %v8441_v16  ;;  %v8458_v28 = vld [vmem:[%s12509_s28 + $0x64] ss:$16 sps:$4 sm:$0xff]   ;;  %v8456_v30 = vld [vmem:[%s12509_s28 + $0x60] ss:$16 sps:$4 sm:$0xff]  }
  0xcd   :  { %7431 = vmatmul.mubr.msk.bf16.vlgmr.msra.gmra.mrb[4].mxu0 %vm416_vm1, %v10246_v8  ;;  %v8465_v31 = vld [vmem:[%s12509_s28 + $0x2e4] ss:$16 sps:$4 sm:$0xff]   ;;  %v8467_v33 = vld [vmem:[%s12509_s28 + $0x2e0] ss:$16 sps:$4 sm:$0xff]  }
  0xce   :  { %1500 = vmatpush1.bf16.msra.mxu0 %v8438_v18  ;;  %v8464_v32 = vld [vmem:[%s12509_s28 + $0x84] ss:$16 sps:$4 sm:$0xff]   ;;  %v8462_v34 = vld [vmem:[%s12509_s28 + $0x80] ss:$16 sps:$4 sm:$0xff]   ;;  %1531 = vmatprep.mubr.bf16.mxu0 %v191_v60 }
  0xcf   :  { %1547 = vmatpush1.bf16.msra.mxu1 %v8443_v17  ;;  %1501 = vmatprep.subr.bf16.mxu0 %v8446_v20  ;;  %v8471_v35 = vld [vmem:[%s12509_s28 + $0x304] ss:$16 sps:$4 sm:$0xff]   ;;  %v8473_v37 = vld [vmem:[%s12509_s28 + $0x300] ss:$16 sps:$4 sm:$0xff]  }
  0xd0   :  { %1548 = vmatprep.subr.bf16.mxu1 %v8447_v19  ;;  %v8470_v36 = vld [vmem:[%s12509_s28 + $0xa4] ss:$16 sps:$4 sm:$0xff]   ;;  %v8468_v38 = vld [vmem:[%s12509_s28 + $0xa0] ss:$16 sps:$4 sm:$0xff]  }
  0xd1   :  { %v8477_v39 = vld [vmem:[%s12509_s28 + $0x324] ss:$16 sps:$4 sm:$0xff]   ;;  %v8479_v41 = vld [vmem:[%s12509_s28 + $0x320] ss:$16 sps:$4 sm:$0xff]  }
  0xd2   :  { %1502 = vmatpush1.bf16.msra.mxu0 %v8444_v22  ;;  %v8476_v40 = vld [vmem:[%s12509_s28 + $0xc4] ss:$16 sps:$4 sm:$0xff]   ;;  %v8474_v42 = vld [vmem:[%s12509_s28 + $0xc0] ss:$16 sps:$4 sm:$0xff]   ;;  %v8528_v22 = vld [vmem:[%s12509_s28 + $0x8] ss:$16 sps:$4 sm:$0xff]  }
  0xd3   :  { %1549 = vmatpush1.bf16.msra.mxu1 %v8449_v21  ;;  %1503 = vmatprep.subr.bf16.mxu0 %v8452_v24  ;;  %v8483_v43 = vld [vmem:[%s12509_s28 + $0x344] ss:$16 sps:$4 sm:$0xff]   ;;  %v8485_v45 = vld [vmem:[%s12509_s28 + $0x340] ss:$16 sps:$4 sm:$0xff]   ;;  %v8536_v24 = vld [vmem:[%s12509_s28 + $0x2c] ss:$16 sps:$4 sm:$0xff]  }
  0xd4   :  { %1550 = vmatprep.subr.bf16.mxu1 %v8453_v23  ;;  %v8482_v44 = vld [vmem:[%s12509_s28 + $0xe4] ss:$16 sps:$4 sm:$0xff]   ;;  %v8480_v46 = vld [vmem:[%s12509_s28 + $0xe0] ss:$16 sps:$4 sm:$0xff]  }
  0xd5   :  { %v8489_v47 = vld [vmem:[%s12509_s28 + $0x364] ss:$16 sps:$4 sm:$0xff]   ;;  %v8486_v50 = vld [vmem:[%s12509_s28 + $0x100] ss:$16 sps:$4 sm:$0xff]  }
  0xd6   :  { %1504 = vmatpush1.bf16.msra.mxu0 %v8450_v26  ;;  %v8488_v48 = vld [vmem:[%s12509_s28 + $0x104] ss:$16 sps:$4 sm:$0xff]   ;;  %v8491_v51 = vld [vmem:[%s12509_s28 + $0x360] ss:$16 sps:$4 sm:$0xff]  }
  0xd7   :  { %1551 = vmatpush1.bf16.msra.mxu1 %v8455_v25  ;;  %1505 = vmatprep.subr.bf16.mxu0 %v8458_v28  ;;  %v8495_v53 = vld [vmem:[%s12509_s28 + $0x384] ss:$16 sps:$4 sm:$0xff]   ;;  %v8497_v55 = vld [vmem:[%s12509_s28 + $0x380] ss:$16 sps:$4 sm:$0xff]  }
  0xd8   :  { %1552 = vmatprep.subr.bf16.mxu1 %v8459_v27  ;;  %v8494_v54 = vld [vmem:[%s12509_s28 + $0x124] ss:$16 sps:$4 sm:$0xff]   ;;  %v8492_v56 = vld [vmem:[%s12509_s28 + $0x120] ss:$16 sps:$4 sm:$0xff]   ;;  %v8534_v27 = vld [vmem:[%s12509_s28 + $0x28] ss:$16 sps:$4 sm:$0xff]  }
  0xd9   :  { %v8501_v57 = vld [vmem:[%s12509_s28 + $0x3a4] ss:$16 sps:$4 sm:$0xff]   ;;  %v8503_v61 = vld [vmem:[%s12509_s28 + $0x3a0] ss:$16 sps:$4 sm:$0xff]  }
  0xda   :  { %1506 = vmatpush1.bf16.msra.mxu0 %v8456_v30  ;;  %v8500_v59 = vld [vmem:[%s12509_s28 + $0x144] ss:$16 sps:$4 sm:$0xff]   ;;  %v8498_v62 = vld [vmem:[%s12509_s28 + $0x140] ss:$16 sps:$4 sm:$0xff]  }
  0xdb   :  { %1553 = vmatpush1.bf16.msra.mxu1 %v8461_v29  ;;  %1507 = vmatprep.subr.bf16.mxu0 %v8464_v32  ;;  %v8507_v63 = vld [vmem:[%s12509_s28 + $0x3c4] ss:$16 sps:$4 sm:$0xff]   ;;  %v8509_v2 = vld [vmem:[%s12509_s28 + $0x3c0] ss:$16 sps:$4 sm:$0xff]   ;;  %v8542_v29 = vld [vmem:[%s12509_s28 + $0x4c] ss:$16 sps:$4 sm:$0xff]  }
  0xdc   :  { %1554 = vmatprep.subr.bf16.mxu1 %v8465_v31  ;;  %v8506_v1 = vld [vmem:[%s12509_s28 + $0x164] ss:$16 sps:$4 sm:$0xff]   ;;  %v8504_v3 = vld [vmem:[%s12509_s28 + $0x160] ss:$16 sps:$4 sm:$0xff]   ;;  %v8540_v31 = vld [vmem:[%s12509_s28 + $0x48] ss:$16 sps:$4 sm:$0xff]  }
  0xdd   :  { %v8513_v4 = vld [vmem:[%s12509_s28 + $0x3e4] ss:$16 sps:$4 sm:$0xff]   ;;  %v8515_v6 = vld [vmem:[%s12509_s28 + $0x3e0] ss:$16 sps:$4 sm:$0xff]  }
  0xde   :  { %1508 = vmatpush1.bf16.msra.mxu0 %v8462_v34  ;;  %v8512_v5 = vld [vmem:[%s12509_s28 + $0x184] ss:$16 sps:$4 sm:$0xff]   ;;  %v8510_v9 = vld [vmem:[%s12509_s28 + $0x180] ss:$16 sps:$4 sm:$0xff]  }
  0xdf   :  { %1555 = vmatpush1.bf16.msra.mxu1 %v8467_v33  ;;  %1509 = vmatprep.subr.bf16.mxu0 %v8470_v36  ;;  %v8524_v10 = vld [vmem:[%s12509_s28 + $0x604] ss:$16 sps:$4 sm:$0xff]   ;;  %v8522_v13 = vld [vmem:[%s12509_s28 + $0x600] ss:$16 sps:$4 sm:$0xff]   ;;  %v8548_v33 = vld [vmem:[%s12509_s28 + $0x6c] ss:$16 sps:$4 sm:$0xff]  }
  0xe0   :  { %1556 = vmatprep.subr.bf16.mxu1 %v8471_v35  ;;  %v8518_v11 = vld [vmem:[%s12509_s28 + $0x1a4] ss:$16 sps:$4 sm:$0xff]   ;;  %v8516_v14 = vld [vmem:[%s12509_s28 + $0x1a0] ss:$16 sps:$4 sm:$0xff]   ;;  %v8546_v35 = vld [vmem:[%s12509_s28 + $0x68] ss:$16 sps:$4 sm:$0xff]  }
  0xe1   :  { %v8521_v16 = vld [vmem:[%s12509_s28 + $0x1c4] ss:$16 sps:$4 sm:$0xff]   ;;  %v8519_v18 = vld [vmem:[%s12509_s28 + $0x1c0] ss:$16 sps:$4 sm:$0xff]  }
  0xe2   :  { %1510 = vmatpush1.bf16.msra.mxu0 %v8468_v38  ;;  %v189_v17 = vld [vmem:[#allocation2 + $0x30] sm:$0xff]  ;;  %v183_v23 = vld [vmem:[#allocation2] sm:$0xff] }
  0xe3   :  { %1557 = vmatpush1.bf16.msra.mxu1 %v8473_v37  ;;  %1511 = vmatprep.subr.bf16.mxu0 %v8476_v40  ;;  %v8527_v19 = vld [vmem:[%s12509_s28 + $0x1e4] ss:$16 sps:$4 sm:$0xff]   ;;  %v10454_v20 = vpack.c.bf16 %v189_v17, %v189_v17  ;;  %v8525_v21 = vld [vmem:[%s12509_s28 + $0x1e0] ss:$16 sps:$4 sm:$0xff]   ;;  %v10470_v26 = vpack.c.bf16 %v183_v23, %v183_v23  ;;  %v8554_v37 = vld [vmem:[%s12509_s28 + $0x8c] ss:$16 sps:$4 sm:$0xff]  }
  0xe4   :  { %1558 = vmatprep.subr.bf16.mxu1 %v8477_v39  ;;  %v8533_v25 = vld [vmem:[%s12509_s28 + $0x404] ss:$16 sps:$4 sm:$0xff]   ;;  %v8531_v28 = vld [vmem:[%s12509_s28 + $0x400] ss:$16 sps:$4 sm:$0xff]   ;;  %v8552_v39 = vld [vmem:[%s12509_s28 + $0x88] ss:$16 sps:$4 sm:$0xff]  }
  0xe5   :  { %v8539_v30 = vld [vmem:[%s12509_s28 + $0x424] ss:$16 sps:$4 sm:$0xff]   ;;  %v8537_v32 = vld [vmem:[%s12509_s28 + $0x420] ss:$16 sps:$4 sm:$0xff]   ;;  %v8612_v23 = vld [vmem:[%s12509_s28 + $0x1c8] ss:$16 sps:$4 sm:$0xff]  }
  0xe6   :  { %1512 = vmatpush1.bf16.msra.mxu0 %v8474_v42  ;;  %v8545_v34 = vld [vmem:[%s12509_s28 + $0x444] ss:$16 sps:$4 sm:$0xff]   ;;  %v8543_v36 = vld [vmem:[%s12509_s28 + $0x440] ss:$16 sps:$4 sm:$0xff]  }
  0xe7   :  { %1559 = vmatpush1.bf16.msra.mxu1 %v8479_v41  ;;  %1513 = vmatprep.subr.bf16.mxu0 %v8482_v44  ;;  %v8551_v38 = vld [vmem:[%s12509_s28 + $0x464] ss:$16 sps:$4 sm:$0xff]   ;;  %v8549_v40 = vld [vmem:[%s12509_s28 + $0x460] ss:$16 sps:$4 sm:$0xff]   ;;  %v8560_v41 = vld [vmem:[%s12509_s28 + $0xac] ss:$16 sps:$4 sm:$0xff]  }
  0xe8   :  { %1560 = vmatprep.subr.bf16.mxu1 %v8483_v43  ;;  %v8557_v42 = vld [vmem:[%s12509_s28 + $0x484] ss:$16 sps:$4 sm:$0xff]   ;;  %v8555_v43 = vld [vmem:[%s12509_s28 + $0x480] ss:$16 sps:$4 sm:$0xff]   ;;  %v188_v44 = vld [vmem:[#allocation2 + $0x28] sm:$0xff] }
  0xe9   :  { %v8561_v49 = vld [vmem:[%s12509_s28 + $0x4a0] ss:$16 sps:$4 sm:$0xff]  }
  0xea   :  { %1514 = vmatpush1.bf16.msra.mxu0 %v8480_v46  ;;  %v10527_v46 = vpack.c.bf16 %v188_v44, %v188_v44  ;;  %v8573_v58 = vld [vmem:[%s12509_s28 + $0x4e0] ss:$16 sps:$4 sm:$0xff]   ;;  %v8645_v44 = vld [vmem:[%s12509_s28 + $0x468] ss:$16 sps:$4 sm:$0xff]  }
  0xeb   :  { %1561 = vmatpush1.bf16.msra.mxu1 %v8485_v45  ;;  %1515 = vmatprep.subr.bf16.mxu0 %v8488_v48  ;;  %v8558_v45 = vld [vmem:[%s12509_s28 + $0xa8] ss:$16 sps:$4 sm:$0xff]   ;;  %v8563_v48 = vld [vmem:[%s12509_s28 + $0x4a4] ss:$16 sps:$4 sm:$0xff]   ;;  %v8591_v7 = vld [vmem:[%s12509_s28 + $0x540] ss:$16 sps:$4 sm:$0xff]  }
  0xec   :  { %1562 = vmatprep.subr.bf16.mxu1 %v8489_v47  ;;  %v8566_v47 = vld [vmem:[%s12509_s28 + $0xcc] ss:$16 sps:$4 sm:$0xff]   ;;  %v8603_v17 = vld [vmem:[%s12509_s28 + $0x580] ss:$16 sps:$4 sm:$0xff]  }
  0xee   :  { %1516 = vmatpush1.bf16.msra.mxu0 %v8486_v50  ;;  %v8564_v50 = vld [vmem:[%s12509_s28 + $0xc8] ss:$16 sps:$4 sm:$0xff]  }
  0xef   :  { %1563 = vmatpush1.bf16.msra.mxu1 %v8491_v51  ;;  %1517 = vmatprep.subr.bf16.mxu0 %v8494_v54  ;;  %v8572_v51 = vld [vmem:[%s12509_s28 + $0xec] ss:$16 sps:$4 sm:$0xff]   ;;  %v8567_v54 = vld [vmem:[%s12509_s28 + $0x4c0] ss:$16 sps:$4 sm:$0xff]  }
  0xf0   :  { %1564 = vmatprep.subr.bf16.mxu1 %v8495_v53  ;;  %v8569_v53 = vld [vmem:[%s12509_s28 + $0x4c4] ss:$16 sps:$4 sm:$0xff]  }
  0xf2   :  { %1518 = vmatpush1.bf16.msra.mxu0 %v8492_v56  ;;  %v8578_v56 = vld [vmem:[%s12509_s28 + $0x10c] ss:$16 sps:$4 sm:$0xff]  }
  0xf3   :  { %1565 = vmatpush1.bf16.msra.mxu1 %v8497_v55  ;;  %1519 = vmatprep.subr.bf16.mxu0 %v8500_v59  ;;  %v8570_v55 = vld [vmem:[%s12509_s28 + $0xe8] ss:$16 sps:$4 sm:$0xff]  }
  0xf4   :  { %1566 = vmatprep.subr.bf16.mxu1 %v8501_v57  ;;  %v8575_v57 = vld [vmem:[%s12509_s28 + $0x4e4] ss:$16 sps:$4 sm:$0xff]   ;;  %v8576_v59 = vld [vmem:[%s12509_s28 + $0x108] ss:$16 sps:$4 sm:$0xff]  }
  0xf6   :  { %1520 = vmatpush1.bf16.msra.mxu0 %v8498_v62  ;;  %v8579_v62 = vld [vmem:[%s12509_s28 + $0x500] ss:$16 sps:$4 sm:$0xff]  }
  0xf7   :  { %1567 = vmatpush1.bf16.msra.mxu1 %v8503_v61  ;;  %1521 = vmatprep.subr.bf16.mxu0 %v8506_v1  ;;  %v8581_v61 = vld [vmem:[%s12509_s28 + $0x504] ss:$16 sps:$4 sm:$0xff]   ;;  %v8590_v1 = vld [vmem:[%s12509_s28 + $0x14c] ss:$16 sps:$4 sm:$0xff]  }
  0xf8   :  { %1568 = vmatprep.subr.bf16.mxu1 %v8507_v63  ;;  %v8582_v63 = vld [vmem:[%s12509_s28 + $0x128] ss:$16 sps:$4 sm:$0xff]  }
  0xfa   :  { %1522 = vmatpush1.bf16.msra.mxu0 %v8504_v3  ;;  %v8585_v3 = vld [vmem:[%s12509_s28 + $0x520] ss:$16 sps:$4 sm:$0xff]  }
  0xfb   :  { %1569 = vmatpush1.bf16.msra.mxu1 %v8509_v2  ;;  %1523 = vmatprep.subr.bf16.mxu0 %v8512_v5  ;;  %v8587_v2 = vld [vmem:[%s12509_s28 + $0x524] ss:$16 sps:$4 sm:$0xff]   ;;  %v8596_v5 = vld [vmem:[%s12509_s28 + $0x16c] ss:$16 sps:$4 sm:$0xff]  }
  0xfc   :  { %1570 = vmatprep.subr.bf16.mxu1 %v8513_v4  ;;  %v8588_v4 = vld [vmem:[%s12509_s28 + $0x148] ss:$16 sps:$4 sm:$0xff]  }
  0xfe   :  { %1524 = vmatpush1.bf16.msra.mxu0 %v8510_v9  ;;  %v8594_v9 = vld [vmem:[%s12509_s28 + $0x168] ss:$16 sps:$4 sm:$0xff]  }
  0xff   :  { %1571 = vmatpush1.bf16.msra.mxu1 %v8515_v6  ;;  %1525 = vmatprep.subr.bf16.mxu0 %v8518_v11  ;;  %v8593_v6 = vld [vmem:[%s12509_s28 + $0x544] ss:$16 sps:$4 sm:$0xff]  }
 0x100   :  { %1622 = vmatprep.subr.bf16.mxu1 %v8524_v10  ;;  %v8602_v10 = vld [vmem:[%s12509_s28 + $0x18c] ss:$16 sps:$4 sm:$0xff]   ;;  %v8599_v11 = vld [vmem:[%s12509_s28 + $0x564] ss:$16 sps:$4 sm:$0xff]  }
 0x102   :  { %1573 = vmatmul.mubr.bf16.vlgmr.msra.gmra.mrb[0].mxu1 %v10432_v12  ;;  %1526 = vmatpush1.bf16.msra.mxu0 %v8516_v14  ;;  %v8600_v14 = vld [vmem:[%s12509_s28 + $0x188] ss:$16 sps:$4 sm:$0xff]  }
 0x103   :  { %1623 = vmatpush1.bf16.msra.mxu1 %v8522_v13  ;;  %1654 = vmatprep.mubr.bf16.mxu1 %v9999_v0  ;;  %v8597_v13 = vld [vmem:[%s12509_s28 + $0x560] ss:$16 sps:$4 sm:$0xff]  }
 0x104   :  { %1663 = vmatprep.subr.bf16.mxu1 %v8530_v15  ;;  %1527 = vmatprep.subr.bf16.mxu0 %v8521_v16  ;;  %v8608_v15 = vld [vmem:[%s12509_s28 + $0x1ac] ss:$16 sps:$4 sm:$0xff]   ;;  %v8605_v16 = vld [vmem:[%s12509_s28 + $0x584] ss:$16 sps:$4 sm:$0xff]  }
 0x106   :  { %1528 = vmatpush1.bf16.msra.mxu0 %v8519_v18  ;;  %v8606_v18 = vld [vmem:[%s12509_s28 + $0x1a8] ss:$16 sps:$4 sm:$0xff]  }
 0x107   :  { %1529 = vmatprep.subr.bf16.mxu0 %v8527_v19  ;;  %v8614_v19 = vld [vmem:[%s12509_s28 + $0x1cc] ss:$16 sps:$4 sm:$0xff]  }
 0x10a   :  { %7628 = vmatmul.mubr.msk.bf16.vlgmr.msra.gmra.mrb[4].mxu1 %vm1495_vm2, %v10454_v20  ;;  %1530 = vmatpush1.bf16.msra.mxu0 %v8525_v21  ;;  %v8611_v21 = vld [vmem:[%s12509_s28 + $0x5a4] ss:$16 sps:$4 sm:$0xff]  }
 0x10b   :  { %1664 = vmatpush1.bf16.msra.mxu1 %v8528_v22  ;;  %1695 = vmatprep.mubr.bf16.mxu1 %v191_v60  ;;  %v8584_v60 = vld [vmem:[%s12509_s28 + $0x12c] ss:$16 sps:$4 sm:$0xff]   ;;  %v8609_v22 = vld [vmem:[%s12509_s28 + $0x5a0] ss:$16 sps:$4 sm:$0xff]  }
 0x10c   :  { %1665 = vmatprep.subr.bf16.mxu1 %v8536_v24  ;;  %1581 = vmatprep.subr.bf16.mxu0 %v8533_v25  ;;  %v8620_v24 = vld [vmem:[%s12509_s28 + $0x1ec] ss:$16 sps:$4 sm:$0xff]   ;;  %v8617_v25 = vld [vmem:[%s12509_s28 + $0x5c4] ss:$16 sps:$4 sm:$0xff]  }
 0x10d   :  { %1532 = vmatmul.mubr.bf16.vlgmr.msra.gmra.mrb[8].mxu0 %v10470_v26 }
 0x10e   :  { %1582 = vmatpush1.bf16.msra.mxu0 %v8531_v28  ;;  %1613 = vmatprep.mubr.bf16.mxu0 %v10527_v46  ;;  %v8618_v28 = vld [vmem:[%s12509_s28 + $0x1e8] ss:$16 sps:$4 sm:$0xff]  }
 0x10f   :  { %1666 = vmatpush1.bf16.msra.mxu1 %v8534_v27  ;;  %1583 = vmatprep.subr.bf16.mxu0 %v8539_v30  ;;  %v8615_v27 = vld [vmem:[%s12509_s28 + $0x5c0] ss:$16 sps:$4 sm:$0xff]   ;;  %v8623_v30 = vld [vmem:[%s12509_s28 + $0x5e4] ss:$16 sps:$4 sm:$0xff]  }
 0x110   :  { %1667 = vmatprep.subr.bf16.mxu1 %v8542_v29  ;;  %v8629_v29 = vld [vmem:[%s12509_s28 + $0x40c] ss:$16 sps:$4 sm:$0xff]  }
 0x112   :  { %1584 = vmatpush1.bf16.msra.mxu0 %v8537_v32  ;;  %v187_v32 = vld [vmem:[#allocation2 + $0x20] sm:$0xff] }
 0x113   :  { %1668 = vmatpush1.bf16.msra.mxu1 %v8540_v31  ;;  %1585 = vmatprep.subr.bf16.mxu0 %v8545_v34  ;;  %v8621_v31 = vld [vmem:[%s12509_s28 + $0x5e0] ss:$16 sps:$4 sm:$0xff]   ;;  %v8635_v34 = vld [vmem:[%s12509_s28 + $0x42c] ss:$16 sps:$4 sm:$0xff]  }
 0x114   :  { %1669 = vmatprep.subr.bf16.mxu1 %v8548_v33  ;;  %v8627_v33 = vld [vmem:[%s12509_s28 + $0x408] ss:$16 sps:$4 sm:$0xff]  }
 0x116   :  { %1586 = vmatpush1.bf16.msra.mxu0 %v8543_v36  ;;  %v8633_v36 = vld [vmem:[%s12509_s28 + $0x428] ss:$16 sps:$4 sm:$0xff]  }
 0x117   :  { %1670 = vmatpush1.bf16.msra.mxu1 %v8546_v35  ;;  %1587 = vmatprep.subr.bf16.mxu0 %v8551_v38  ;;  %v8626_v35 = vld [vmem:[%s12509_s28 + $0x20c] ss:$16 sps:$4 sm:$0xff]  }
 0x118   :  { %1671 = vmatprep.subr.bf16.mxu1 %v8554_v37  ;;  %v8624_v37 = vld [vmem:[%s12509_s28 + $0x208] ss:$16 sps:$4 sm:$0xff]   ;;  %v8641_v38 = vld [vmem:[%s12509_s28 + $0x44c] ss:$16 sps:$4 sm:$0xff]  }
 0x11a   :  { %1588 = vmatpush1.bf16.msra.mxu0 %v8549_v40  ;;  %v8632_v40 = vld [vmem:[%s12509_s28 + $0x22c] ss:$16 sps:$4 sm:$0xff]  }
 0x11b   :  { %1672 = vmatpush1.bf16.msra.mxu1 %v8552_v39  ;;  %1589 = vmatprep.subr.bf16.mxu0 %v8557_v42  ;;  %v10678_v39 = vpack.c.bf16 %v187_v32, %v187_v32  ;;  %v8647_v42 = vld [vmem:[%s12509_s28 + $0x46c] ss:$16 sps:$4 sm:$0xff]  }
 0x11c   :  { %1673 = vmatprep.subr.bf16.mxu1 %v8560_v41  ;;  %v8630_v41 = vld [vmem:[%s12509_s28 + $0x228] ss:$16 sps:$4 sm:$0xff]   ;;  %v8710_v32 = vld [vmem:[%s12509_s28 + $0x3cc] ss:$16 sps:$4 sm:$0xff]  }
 0x11e   :  { %1590 = vmatpush1.bf16.msra.mxu0 %v8555_v43  ;;  %v8638_v43 = vld [vmem:[%s12509_s28 + $0x24c] ss:$16 sps:$4 sm:$0xff]  }
 0x11f   :  { %1674 = vmatpush1.bf16.msra.mxu1 %v8558_v45  ;;  %1591 = vmatprep.subr.bf16.mxu0 %v8563_v48  ;;  %v8636_v45 = vld [vmem:[%s12509_s28 + $0x248] ss:$16 sps:$4 sm:$0xff]  }
 0x120   :  { %1675 = vmatprep.subr.bf16.mxu1 %v8566_v47  ;;  %v8644_v47 = vld [vmem:[%s12509_s28 + $0x26c] ss:$16 sps:$4 sm:$0xff]   ;;  %v8642_v48 = vld [vmem:[%s12509_s28 + $0x268] ss:$16 sps:$4 sm:$0xff]  }
 0x122   :  { %1592 = vmatpush1.bf16.msra.mxu0 %v8561_v49  ;;  %v8659_v49 = vld [vmem:[%s12509_s28 + $0x4ac] ss:$16 sps:$4 sm:$0xff]  }
 0x123   :  { %1676 = vmatpush1.bf16.msra.mxu1 %v8564_v50  ;;  %1593 = vmatprep.subr.bf16.mxu0 %v8569_v53  ;;  %v8650_v50 = vld [vmem:[%s12509_s28 + $0x28c] ss:$16 sps:$4 sm:$0xff]   ;;  %v8648_v53 = vld [vmem:[%s12509_s28 + $0x288] ss:$16 sps:$4 sm:$0xff]  }
 0x124   :  { %1677 = vmatprep.subr.bf16.mxu1 %v8572_v51  ;;  %v8657_v51 = vld [vmem:[%s12509_s28 + $0x4a8] ss:$16 sps:$4 sm:$0xff]  }
 0x126   :  { %1594 = vmatpush1.bf16.msra.mxu0 %v8567_v54  ;;  %v8665_v54 = vld [vmem:[%s12509_s28 + $0x4cc] ss:$16 sps:$4 sm:$0xff]  }
 0x127   :  { %1678 = vmatpush1.bf16.msra.mxu1 %v8570_v55  ;;  %1595 = vmatprep.subr.bf16.mxu0 %v8575_v57  ;;  %v8656_v55 = vld [vmem:[%s12509_s28 + $0x2ac] ss:$16 sps:$4 sm:$0xff]   ;;  %v8654_v57 = vld [vmem:[%s12509_s28 + $0x2a8] ss:$16 sps:$4 sm:$0xff]  }
 0x128   :  { %1679 = vmatprep.subr.bf16.mxu1 %v8578_v56  ;;  %v8663_v56 = vld [vmem:[%s12509_s28 + $0x4c8] ss:$16 sps:$4 sm:$0xff]  }
 0x12a   :  { %1596 = vmatpush1.bf16.msra.mxu0 %v8573_v58  ;;  %v8671_v58 = vld [vmem:[%s12509_s28 + $0x4ec] ss:$16 sps:$4 sm:$0xff]  }
 0x12b   :  { %1680 = vmatpush1.bf16.msra.mxu1 %v8576_v59  ;;  %1597 = vmatprep.subr.bf16.mxu0 %v8581_v61  ;;  %v8662_v59 = vld [vmem:[%s12509_s28 + $0x2cc] ss:$16 sps:$4 sm:$0xff]   ;;  %v8660_v61 = vld [vmem:[%s12509_s28 + $0x2c8] ss:$16 sps:$4 sm:$0xff]  }
 0x12c   :  { %1681 = vmatprep.subr.bf16.mxu1 %v8584_v60  ;;  %v8669_v60 = vld [vmem:[%s12509_s28 + $0x4e8] ss:$16 sps:$4 sm:$0xff]  }
 0x12e   :  { %1598 = vmatpush1.bf16.msra.mxu0 %v8579_v62  ;;  %v8677_v62 = vld [vmem:[%s12509_s28 + $0x50c] ss:$16 sps:$4 sm:$0xff]  }
 0x12f   :  { %1682 = vmatpush1.bf16.msra.mxu1 %v8582_v63  ;;  %1599 = vmatprep.subr.bf16.mxu0 %v8587_v2  ;;  %v8668_v63 = vld [vmem:[%s12509_s28 + $0x2ec] ss:$16 sps:$4 sm:$0xff]   ;;  %v8666_v2 = vld [vmem:[%s12509_s28 + $0x2e8] ss:$16 sps:$4 sm:$0xff]  }
 0x130   :  { %1683 = vmatprep.subr.bf16.mxu1 %v8590_v1  ;;  %v8675_v1 = vld [vmem:[%s12509_s28 + $0x508] ss:$16 sps:$4 sm:$0xff]  }
 0x132   :  { %1600 = vmatpush1.bf16.msra.mxu0 %v8585_v3  ;;  %v8683_v3 = vld [vmem:[%s12509_s28 + $0x52c] ss:$16 sps:$4 sm:$0xff]  }
 0x133   :  { %1684 = vmatpush1.bf16.msra.mxu1 %v8588_v4  ;;  %1601 = vmatprep.subr.bf16.mxu0 %v8593_v6  ;;  %v8674_v4 = vld [vmem:[%s12509_s28 + $0x30c] ss:$16 sps:$4 sm:$0xff]   ;;  %v8672_v6 = vld [vmem:[%s12509_s28 + $0x308] ss:$16 sps:$4 sm:$0xff]  }
 0x134   :  { %1685 = vmatprep.subr.bf16.mxu1 %v8596_v5  ;;  %v8681_v5 = vld [vmem:[%s12509_s28 + $0x528] ss:$16 sps:$4 sm:$0xff]  }
 0x136   :  { %1602 = vmatpush1.bf16.msra.mxu0 %v8591_v7  ;;  %v8689_v7 = vld [vmem:[%s12509_s28 + $0x54c] ss:$16 sps:$4 sm:$0xff]  }
 0x137   :  { %1686 = vmatpush1.bf16.msra.mxu1 %v8594_v9  ;;  %1603 = vmatprep.subr.bf16.mxu0 %v8599_v11  ;;  %v8680_v9 = vld [vmem:[%s12509_s28 + $0x32c] ss:$16 sps:$4 sm:$0xff]   ;;  %v8678_v11 = vld [vmem:[%s12509_s28 + $0x328] ss:$16 sps:$4 sm:$0xff]  }
 0x138   :  { %1687 = vmatprep.subr.bf16.mxu1 %v8602_v10  ;;  %v8687_v10 = vld [vmem:[%s12509_s28 + $0x548] ss:$16 sps:$4 sm:$0xff]  }
 0x13a   :  { %1604 = vmatpush1.bf16.msra.mxu0 %v8597_v13  ;;  %v8695_v13 = vld [vmem:[%s12509_s28 + $0x56c] ss:$16 sps:$4 sm:$0xff]  }
 0x13b   :  { %1688 = vmatpush1.bf16.msra.mxu1 %v8600_v14  ;;  %1605 = vmatprep.subr.bf16.mxu0 %v8605_v16  ;;  %v8686_v14 = vld [vmem:[%s12509_s28 + $0x34c] ss:$16 sps:$4 sm:$0xff]   ;;  %v8684_v16 = vld [vmem:[%s12509_s28 + $0x348] ss:$16 sps:$4 sm:$0xff]  }
 0x13c   :  { %1689 = vmatprep.subr.bf16.mxu1 %v8608_v15  ;;  %v8693_v15 = vld [vmem:[%s12509_s28 + $0x568] ss:$16 sps:$4 sm:$0xff]  }
 0x13e   :  { %1606 = vmatpush1.bf16.msra.mxu0 %v8603_v17  ;;  %v8692_v17 = vld [vmem:[%s12509_s28 + $0x36c] ss:$16 sps:$4 sm:$0xff]  }
 0x13f   :  { %1690 = vmatpush1.bf16.msra.mxu1 %v8606_v18  ;;  %1607 = vmatprep.subr.bf16.mxu0 %v8611_v21  ;;  %v8701_v18 = vld [vmem:[%s12509_s28 + $0x58c] ss:$16 sps:$4 sm:$0xff]   ;;  %v8690_v21 = vld [vmem:[%s12509_s28 + $0x368] ss:$16 sps:$4 sm:$0xff]  }
 0x140   :  { %1691 = vmatprep.subr.bf16.mxu1 %v8614_v19  ;;  %v8699_v19 = vld [vmem:[%s12509_s28 + $0x588] ss:$16 sps:$4 sm:$0xff]  }
 0x142   :  { %1608 = vmatpush1.bf16.msra.mxu0 %v8609_v22  ;;  %v8707_v22 = vld [vmem:[%s12509_s28 + $0x5ac] ss:$16 sps:$4 sm:$0xff]  }
 0x143   :  { %1692 = vmatpush1.bf16.msra.mxu1 %v8612_v23  ;;  %1609 = vmatprep.subr.bf16.mxu0 %v8617_v25  ;;  %v8698_v23 = vld [vmem:[%s12509_s28 + $0x38c] ss:$16 sps:$4 sm:$0xff]   ;;  %v8696_v25 = vld [vmem:[%s12509_s28 + $0x388] ss:$16 sps:$4 sm:$0xff]  }
 0x144   :  { %1693 = vmatprep.subr.bf16.mxu1 %v8620_v24  ;;  %v8705_v24 = vld [vmem:[%s12509_s28 + $0x5a8] ss:$16 sps:$4 sm:$0xff]  }
 0x146   :  { %1610 = vmatpush1.bf16.msra.mxu0 %v8615_v27  ;;  %v8713_v27 = vld [vmem:[%s12509_s28 + $0x5cc] ss:$16 sps:$4 sm:$0xff]  }
 0x147   :  { %1694 = vmatpush1.bf16.msra.mxu1 %v8618_v28  ;;  %1611 = vmatprep.subr.bf16.mxu0 %v8623_v30  ;;  %v8704_v28 = vld [vmem:[%s12509_s28 + $0x3ac] ss:$16 sps:$4 sm:$0xff]   ;;  %v8702_v30 = vld [vmem:[%s12509_s28 + $0x3a8] ss:$16 sps:$4 sm:$0xff]  }
 0x148   :  { %1745 = vmatprep.subr.bf16.mxu1 %v8629_v29  ;;  %v8711_v29 = vld [vmem:[%s12509_s28 + $0x5c8] ss:$16 sps:$4 sm:$0xff]  }
 0x14a   :  { %1696 = vmatmul.mubr.bf16.vlgmr.msra.gmra.mrb[8].mxu1 %v10470_v26  ;;  %1612 = vmatpush1.bf16.msra.mxu0 %v8621_v31  ;;  %v8639_v26 = vld [vmem:[%s12509_s28 + $0x448] ss:$16 sps:$4 sm:$0xff]   ;;  %v8719_v31 = vld [vmem:[%s12509_s28 + $0x5ec] ss:$16 sps:$4 sm:$0xff]  }
 0x14b   :  { %1746 = vmatpush1.bf16.msra.mxu1 %v8627_v33  ;;  %1777 = vmatprep.mubr.bf16.mxu1 %v10527_v46  ;;  %v8653_v46 = vld [vmem:[%s12509_s28 + $0x48c] ss:$16 sps:$4 sm:$0xff]   ;;  %v8717_v33 = vld [vmem:[%s12509_s28 + $0x5e8] ss:$16 sps:$4 sm:$0xff]  }
 0x14c   :  { %1747 = vmatprep.subr.bf16.mxu1 %v8635_v34  ;;  %1704 = vmatprep.subr.bf16.mxu0 %v8626_v35  ;;  %v8708_v34 = vld [vmem:[%s12509_s28 + $0x3c8] ss:$16 sps:$4 sm:$0xff]   ;;  %v8728_v35 = vld [vmem:[%s12511_s21 + $0xc] ss:$16 sps:$4 sm:$0xff]  }
 0x14d   :  { %1614 = vmatmul.mubr.bf16.vlgmr.msra.gmra.mrb[12].mxu0 %v10678_v39 }
 0x14e   :  { %1705 = vmatpush1.bf16.msra.mxu0 %v8624_v37  ;;  %1736 = vmatprep.mubr.bf16.mxu0 %v10375_v52  ;;  %v8651_v52 = vld [vmem:[%s12509_s28 + $0x488] ss:$16 sps:$4 sm:$0xff]  }
 0x14f   :  { %1748 = vmatpush1.bf16.msra.mxu1 %v8633_v36  ;;  %1706 = vmatprep.subr.bf16.mxu0 %v8632_v40  ;;  %v8716_v36 = vld [vmem:[%s12509_s28 + $0x3ec] ss:$16 sps:$4 sm:$0xff]   ;;  %v8726_v37 = vld [vmem:[%s12511_s21 + $0x8] ss:$16 sps:$4 sm:$0xff]  }
 0x150   :  { %1749 = vmatprep.subr.bf16.mxu1 %v8641_v38  ;;  %v8714_v38 = vld [vmem:[%s12509_s28 + $0x3e8] ss:$16 sps:$4 sm:$0xff]   ;;  %v8734_v40 = vld [vmem:[%s12511_s21 + $0x2c] ss:$16 sps:$4 sm:$0xff]  }
 0x152   :  { %1707 = vmatpush1.bf16.msra.mxu0 %v8630_v41  ;;  %v8732_v41 = vld [vmem:[%s12511_s21 + $0x28] ss:$16 sps:$4 sm:$0xff]  }
 0x153   :  { %1750 = vmatpush1.bf16.msra.mxu1 %v8639_v26  ;;  %1708 = vmatprep.subr.bf16.mxu0 %v8638_v43  ;;  %v8722_v26 = vld [vmem:[%s12509_s28 + $0x60c] ss:$16 sps:$4 sm:$0xff]   ;;  %v8725_v43 = vld [vmem:[%s12511_s21 + $0x4] ss:$16 sps:$4 sm:$0xff]  }
 0x154   :  { %1751 = vmatprep.subr.bf16.mxu1 %v8647_v42  ;;  %v8720_v42 = vld [vmem:[%s12509_s28 + $0x608] ss:$16 sps:$4 sm:$0xff]   ;;  %s12512_s28 = sld [smem:[#allocation29_spill]] }
 0x156   :  { %1709 = vmatpush1.bf16.msra.mxu0 %v8636_v45  ;;  %v8738_v45 = vld [vmem:[%s12511_s21 + $0x48] ss:$16 sps:$4 sm:$0xff]  }
 0x157   :  { %1752 = vmatpush1.bf16.msra.mxu1 %v8645_v44  ;;  %1710 = vmatprep.subr.bf16.mxu0 %v8644_v47  ;;  %v8740_v44 = vld [vmem:[%s12511_s21 + $0x4c] ss:$16 sps:$4 sm:$0xff]   ;;  %v8723_v47 = vld [vmem:[%s12511_s21] ss:$16 sps:$4 sm:$0xff]  }
 0x158   :  { %1753 = vmatprep.subr.bf16.mxu1 %v8653_v46  ;;  %v8744_v46 = vld [vmem:[%s12511_s21 + $0x68] ss:$16 sps:$4 sm:$0xff]  }
 0x15a   :  { %1711 = vmatpush1.bf16.msra.mxu0 %v8642_v48  ;;  %v8750_v48 = vld [vmem:[%s12511_s21 + $0x88] ss:$16 sps:$4 sm:$0xff]  }
 0x15b   :  { %1754 = vmatpush1.bf16.msra.mxu1 %v8651_v52  ;;  %1712 = vmatprep.subr.bf16.mxu0 %v8650_v50  ;;  %v8752_v52 = vld [vmem:[%s12511_s21 + $0x8c] ss:$16 sps:$4 sm:$0xff]  }
 0x15c   :  { %1755 = vmatprep.subr.bf16.mxu1 %v8659_v49  ;;  %v8729_v49 = vld [vmem:[%s12511_s21 + $0x20] ss:$16 sps:$4 sm:$0xff]   ;;  %v8758_v50 = vld [vmem:[%s12511_s21 + $0xac] ss:$16 sps:$4 sm:$0xff]  }
 0x15e   :  { %1713 = vmatpush1.bf16.msra.mxu0 %v8648_v53  ;;  %v8756_v53 = vld [vmem:[%s12511_s21 + $0xa8] ss:$16 sps:$4 sm:$0xff]  }
 0x15f   :  { %1756 = vmatpush1.bf16.msra.mxu1 %v8657_v51  ;;  %1714 = vmatprep.subr.bf16.mxu0 %v8656_v55  ;;  %v8737_v51 = vld [vmem:[%s12511_s21 + $0x44] ss:$16 sps:$4 sm:$0xff]   ;;  %v8735_v55 = vld [vmem:[%s12511_s21 + $0x40] ss:$16 sps:$4 sm:$0xff]  }
 0x160   :  { %1757 = vmatprep.subr.bf16.mxu1 %v8665_v54 }
 0x162   :  { %1715 = vmatpush1.bf16.msra.mxu0 %v8654_v57 }
 0x163   :  { %1758 = vmatpush1.bf16.msra.mxu1 %v8663_v56  ;;  %1716 = vmatprep.subr.bf16.mxu0 %v8662_v59  ;;  %v8743_v59 = vld [vmem:[%s12511_s21 + $0x64] ss:$16 sps:$4 sm:$0xff]  }
 0x164   :  { %1759 = vmatprep.subr.bf16.mxu1 %v8671_v58 }
 0x166   :  { %1717 = vmatpush1.bf16.msra.mxu0 %v8660_v61  ;;  %v8762_v61 = vld [vmem:[%s12511_s21 + $0xc8] ss:$16 sps:$4 sm:$0xff]  }
 0x167   :  { %1760 = vmatpush1.bf16.msra.mxu1 %v8669_v60  ;;  %1718 = vmatprep.subr.bf16.mxu0 %v8668_v63  ;;  %v8741_v60 = vld [vmem:[%s12511_s21 + $0x60] ss:$16 sps:$4 sm:$0xff]   ;;  %v8749_v63 = vld [vmem:[%s12511_s21 + $0x84] ss:$16 sps:$4 sm:$0xff]  }
 0x168   :  { %1761 = vmatprep.subr.bf16.mxu1 %v8677_v62  ;;  %v8770_v62 = vld [vmem:[%s12511_s21 + $0xec] ss:$16 sps:$4 sm:$0xff]  }
 0x16a   :  { %1719 = vmatpush1.bf16.msra.mxu0 %v8666_v2  ;;  %v8747_v2 = vld [vmem:[%s12511_s21 + $0x80] ss:$16 sps:$4 sm:$0xff]  }
 0x16b   :  { %1762 = vmatpush1.bf16.msra.mxu1 %v8675_v1  ;;  %1720 = vmatprep.subr.bf16.mxu0 %v8674_v4 }
 0x16c   :  { %1763 = vmatprep.subr.bf16.mxu1 %v8683_v3  ;;  %v8768_v3 = vld [vmem:[%s12511_s21 + $0xe8] ss:$16 sps:$4 sm:$0xff]  }
 0x16e   :  { %1721 = vmatpush1.bf16.msra.mxu0 %v8672_v6  ;;  %v8776_v6 = vld [vmem:[%s12511_s21 + $0x10c] ss:$16 sps:$4 sm:$0xff]  }
 0x16f   :  { %1764 = vmatpush1.bf16.msra.mxu1 %v8681_v5  ;;  %1722 = vmatprep.subr.bf16.mxu0 %v8680_v9  ;;  %v8755_v9 = vld [vmem:[%s12511_s21 + $0xa4] ss:$16 sps:$4 sm:$0xff]  }
 0x170   :  { %1765 = vmatprep.subr.bf16.mxu1 %v8689_v7 }
 0x172   :  { %1723 = vmatpush1.bf16.msra.mxu0 %v8678_v11  ;;  %v8774_v11 = vld [vmem:[%s12511_s21 + $0x108] ss:$16 sps:$4 sm:$0xff]  }
 0x173   :  { %1766 = vmatpush1.bf16.msra.mxu1 %v8687_v10  ;;  %1724 = vmatprep.subr.bf16.mxu0 %v8686_v14  ;;  %v8753_v10 = vld [vmem:[%s12511_s21 + $0xa0] ss:$16 sps:$4 sm:$0xff]   ;;  %v8761_v14 = vld [vmem:[%s12511_s21 + $0xc4] ss:$16 sps:$4 sm:$0xff]  }
 0x174   :  { %1767 = vmatprep.subr.bf16.mxu1 %v8695_v13  ;;  %v8782_v13 = vld [vmem:[%s12511_s21 + $0x12c] ss:$16 sps:$4 sm:$0xff]  }
 0x176   :  { %1725 = vmatpush1.bf16.msra.mxu0 %v8684_v16  ;;  %v8780_v16 = vld [vmem:[%s12511_s21 + $0x128] ss:$16 sps:$4 sm:$0xff]  }
 0x177   :  { %1768 = vmatpush1.bf16.msra.mxu1 %v8693_v15  ;;  %1726 = vmatprep.subr.bf16.mxu0 %v8692_v17  ;;  %v8759_v15 = vld [vmem:[%s12511_s21 + $0xc0] ss:$16 sps:$4 sm:$0xff]   ;;  %v8788_v17 = vld [vmem:[%s12511_s21 + $0x14c] ss:$16 sps:$4 sm:$0xff]  }
 0x178   :  { %1769 = vmatprep.subr.bf16.mxu1 %v8701_v18  ;;  %v8767_v18 = vld [vmem:[%s12511_s21 + $0xe4] ss:$16 sps:$4 sm:$0xff]  }
 0x17a   :  { %1727 = vmatpush1.bf16.msra.mxu0 %v8690_v21  ;;  %v8765_v21 = vld [vmem:[%s12511_s21 + $0xe0] ss:$16 sps:$4 sm:$0xff]  }
 0x17b   :  { %1770 = vmatpush1.bf16.msra.mxu1 %v8699_v19  ;;  %1728 = vmatprep.subr.bf16.mxu0 %v8698_v23  ;;  %v8786_v19 = vld [vmem:[%s12511_s21 + $0x148] ss:$16 sps:$4 sm:$0xff]   ;;  %v8773_v23 = vld [vmem:[%s12511_s21 + $0x104] ss:$16 sps:$4 sm:$0xff]  }
 0x17c   :  { %1771 = vmatprep.subr.bf16.mxu1 %v8707_v22  ;;  %v8794_v22 = vld [vmem:[%s12511_s21 + $0x16c] ss:$16 sps:$4 sm:$0xff]  }
 0x17e   :  { %1729 = vmatpush1.bf16.msra.mxu0 %v8696_v25  ;;  %v8771_v25 = vld [vmem:[%s12511_s21 + $0x100] ss:$16 sps:$4 sm:$0xff]  }
 0x17f   :  { %1772 = vmatpush1.bf16.msra.mxu1 %v8705_v24  ;;  %1730 = vmatprep.subr.bf16.mxu0 %v8704_v28  ;;  %v8792_v24 = vld [vmem:[%s12511_s21 + $0x168] ss:$16 sps:$4 sm:$0xff]   ;;  %v8779_v28 = vld [vmem:[%s12511_s21 + $0x124] ss:$16 sps:$4 sm:$0xff]  }
 0x180   :  { %1773 = vmatprep.subr.bf16.mxu1 %v8713_v27  ;;  %v8800_v27 = vld [vmem:[%s12511_s21 + $0x18c] ss:$16 sps:$4 sm:$0xff]  }
 0x182   :  { %1731 = vmatpush1.bf16.msra.mxu0 %v8702_v30  ;;  %v8777_v30 = vld [vmem:[%s12511_s21 + $0x120] ss:$16 sps:$4 sm:$0xff]  }
 0x183   :  { %1774 = vmatpush1.bf16.msra.mxu1 %v8711_v29  ;;  %1732 = vmatprep.subr.bf16.mxu0 %v8710_v32  ;;  %v8798_v29 = vld [vmem:[%s12511_s21 + $0x188] ss:$16 sps:$4 sm:$0xff]   ;;  %v8785_v32 = vld [vmem:[%s12511_s21 + $0x144] ss:$16 sps:$4 sm:$0xff]  }
 0x184   :  { %1775 = vmatprep.subr.bf16.mxu1 %v8719_v31  ;;  %v8806_v31 = vld [vmem:[%s12511_s21 + $0x1ac] ss:$16 sps:$4 sm:$0xff]  }
 0x186   :  { %1733 = vmatpush1.bf16.msra.mxu0 %v8708_v34  ;;  %v8783_v34 = vld [vmem:[%s12511_s21 + $0x140] ss:$16 sps:$4 sm:$0xff]  }
 0x187   :  { %1776 = vmatpush1.bf16.msra.mxu1 %v8717_v33  ;;  %1734 = vmatprep.subr.bf16.mxu0 %v8716_v36  ;;  %v8804_v33 = vld [vmem:[%s12511_s21 + $0x1a8] ss:$16 sps:$4 sm:$0xff]   ;;  %v8791_v36 = vld [vmem:[%s12511_s21 + $0x164] ss:$16 sps:$4 sm:$0xff]  }
 0x188   :  { %2568 = vmatprep.subr.bf16.mxu1 %v8728_v35  ;;  %v8812_v35 = vld [vmem:[%s12511_s21 + $0x1cc] ss:$16 sps:$4 sm:$0xff]  }
 0x18a   :  { %1778 = vmatmul.mubr.bf16.vlgmr.msra.gmra.mrb[12].mxu1 %v10678_v39  ;;  %1735 = vmatpush1.bf16.msra.mxu0 %v8714_v38  ;;  %v8746_v39 = vld [vmem:[%s12511_s21 + $0x6c] ss:$16 sps:$4 sm:$0xff]   ;;  %v8789_v38 = vld [vmem:[%s12511_s21 + $0x160] ss:$16 sps:$4 sm:$0xff]  }
 0x18b   :  { %2569 = vmatpush1.bf16.msra.mxu1 %v8726_v37  ;;  %1786 = vmatprep.subr.bf16.mxu0 %v8722_v26  ;;  %v8810_v37 = vld [vmem:[%s12511_s21 + $0x1c8] ss:$16 sps:$4 sm:$0xff]   ;;  %v8797_v26 = vld [vmem:[%s12511_s21 + $0x184] ss:$16 sps:$4 sm:$0xff]  }
 0x18c   :  { %2570 = vmatprep.subr.bf16.mxu1 %v8734_v40  ;;  %v8818_v40 = vld [vmem:[%s12511_s21 + $0x1ec] ss:$16 sps:$4 sm:$0xff]  }
 0x18d   :  { %1737 = vmatmul.mubr.bf16.vlgmr.msra.gmra.mrb[16].mxu0 %v10432_v12  ;;  %v8731_v12 = vld [vmem:[%s12511_s21 + $0x24] ss:$16 sps:$4 sm:$0xff]  }
 0x18e   :  { %1787 = vmatpush1.bf16.msra.mxu0 %v8720_v42  ;;  %1818 = vmatprep.mubr.bf16.mxu0 %v9999_v0  ;;  %v8795_v42 = vld [vmem:[%s12511_s21 + $0x180] ss:$16 sps:$4 sm:$0xff]  }
 0x18f   :  { %2571 = vmatpush1.bf16.msra.mxu1 %v8732_v41  ;;  %2486 = vmatprep.subr.bf16.mxu0 %v8725_v43  ;;  %v8816_v41 = vld [vmem:[%s12511_s21 + $0x1e8] ss:$16 sps:$4 sm:$0xff]   ;;  %v8824_v43 = vld [vmem:[%s12511_s21 + $0x20c] ss:$16 sps:$4 sm:$0xff]  }
 0x190   :  { %2572 = vmatprep.subr.bf16.mxu1 %v8740_v44  ;;  %v8803_v44 = vld [vmem:[%s12511_s21 + $0x1a4] ss:$16 sps:$4 sm:$0xff]  }
 0x193   :  { %2573 = vmatpush1.bf16.msra.mxu1 %v8738_v45  ;;  %v8801_v45 = vld [vmem:[%s12511_s21 + $0x1a0] ss:$16 sps:$4 sm:$0xff]  }
 0x194   :  { %2574 = vmatprep.subr.bf16.mxu1 %v8746_v39  ;;  %v8809_v39 = vld [vmem:[%s12511_s21 + $0x1c4] ss:$16 sps:$4 sm:$0xff]  }
 0x195   :  { %7629 = vmatmul.mubr.msk.bf16.vlgmr.msra.gmra.mrb[20].mxu0 %vm1495_vm2, %v10454_v20  ;;  %v8764_v20 = vld [vmem:[%s12511_s21 + $0xcc] ss:$16 sps:$4 sm:$0xff]  }
 0x196   :  { %2487 = vmatpush1.bf16.msra.mxu0 %v8723_v47  ;;  %v8815_v47 = vld [vmem:[%s12511_s21 + $0x1e4] ss:$16 sps:$4 sm:$0xff]  }
 0x197   :  { %2575 = vmatpush1.bf16.msra.mxu1 %v8744_v46  ;;  %2488 = vmatprep.subr.bf16.mxu0 %v8731_v12  ;;  %v8807_v46 = vld [vmem:[%s12511_s21 + $0x1c0] ss:$16 sps:$4 sm:$0xff]   ;;  %v8821_v12 = vld [vmem:[%s12511_s21 + $0x204] ss:$16 sps:$4 sm:$0xff]  }
 0x198   :  { %2576 = vmatprep.subr.bf16.mxu1 %v8752_v52  ;;  %v10916_v54 = vpop.f32.mrb[0].mxu0  ;;  %v8813_v52 = vld [vmem:[%s12511_s21 + $0x1e0] ss:$16 sps:$4 sm:$0xff]  }
 0x199   :  { %v10924_v56 = vpop.f32.mrb[1].mxu0 }
 0x19a   :  { %v471_v57 = vpop.f32.mrb[2].mxu0  ;;  %2489 = vmatpush1.bf16.msra.mxu0 %v8729_v49 }
 0x19b   :  { %2577 = vmatpush1.bf16.msra.mxu1 %v8750_v48  ;;  %v472_v58 = vpop.f32.mrb[3].mxu0  ;;  %2490 = vmatprep.subr.bf16.mxu0 %v8737_v51 }
 0x19c   :  { %2578 = vmatprep.subr.bf16.mxu1 %v8758_v50 }
 0x19e   :  { %2491 = vmatpush1.bf16.msra.mxu0 %v8735_v55 }
 0x19f   :  { %2579 = vmatpush1.bf16.msra.mxu1 %v8756_v53  ;;  %2492 = vmatprep.subr.bf16.mxu0 %v8743_v59 }
 0x1a0   :  { %2580 = vmatprep.subr.bf16.mxu1 %v8764_v20  ;;  %v10941_v1 = vpop.f32.mrb[4].mxu0 }
 0x1a1   :  { %v10949_v4 = vpop.f32.mrb[5].mxu0 }
 0x1a2   :  { %v512_v5 = vpop.f32.mrb[6].mxu0  ;;  %2493 = vmatpush1.bf16.msra.mxu0 %v8741_v60 }
 0x1a3   :  { %2581 = vmatpush1.bf16.msra.mxu1 %v8762_v61  ;;  %v513_v7 = vpop.f32.mrb[7].mxu0  ;;  %2494 = vmatprep.subr.bf16.mxu0 %v8749_v63  ;;  %v1829_v5 = vlaneseq }
 0x1a4   :  { %2582 = vmatprep.subr.bf16.mxu1 %v8770_v62 }
 0x1a6   :  { %2495 = vmatpush1.bf16.msra.mxu0 %v8747_v2 }
 0x1a7   :  { %2583 = vmatpush1.bf16.msra.mxu1 %v8768_v3  ;;  %2496 = vmatprep.subr.bf16.mxu0 %v8755_v9 }
 0x1a8   :  { %2584 = vmatprep.subr.bf16.mxu1 %v8776_v6  ;;  %v11073_v6 = vshrl.u32 %v1829_v5, 7  ;;  %v8878_v5 = vld [vmem:[%s12475_s8 + $0xc] ss:$16 sps:$4 sm:$0xff]  }
 0x1aa   :  { %2497 = vmatpush1.bf16.msra.mxu0 %v8753_v10 }
 0x1ab   :  { %2585 = vmatpush1.bf16.msra.mxu1 %v8774_v11  ;;  %2498 = vmatprep.subr.bf16.mxu0 %v8761_v14  ;;  %v11087_v14 = vsub.s32 1, %v11073_v6 }
 0x1ac   :  { %2586 = vmatprep.subr.bf16.mxu1 %v8782_v13  ;;  %v11081_v13 = vld [vmem:[#allocation7] sm:$0xf] }
 0x1ae   :  { %2499 = vmatpush1.bf16.msra.mxu0 %v8759_v15 }
 0x1af   :  { %2587 = vmatpush1.bf16.msra.mxu1 %v8780_v16  ;;  %2500 = vmatprep.subr.bf16.mxu0 %v8767_v18 }
 0x1b0   :  { %2588 = vmatprep.subr.bf16.mxu1 %v8788_v17 }
 0x1b2   :  { %2501 = vmatpush1.bf16.msra.mxu0 %v8765_v21 }
 0x1b3   :  { %2589 = vmatpush1.bf16.msra.mxu1 %v8786_v19  ;;  %2502 = vmatprep.subr.bf16.mxu0 %v8773_v23 }
 0x1b4   :  { %2590 = vmatprep.subr.bf16.mxu1 %v8794_v22 }
 0x1b6   :  { %2503 = vmatpush1.bf16.msra.mxu0 %v8771_v25 }
 0x1b7   :  { %2591 = vmatpush1.bf16.msra.mxu1 %v8792_v24  ;;  %2504 = vmatprep.subr.bf16.mxu0 %v8779_v28 }
 0x1b8   :  { %2592 = vmatprep.subr.bf16.mxu1 %v8800_v27 }
 0x1ba   :  { %2505 = vmatpush1.bf16.msra.mxu0 %v8777_v30  ;;  %v8819_v30 = vld [vmem:[%s12511_s21 + $0x200] ss:$16 sps:$4 sm:$0xff]  }
 0x1bb   :  { %2593 = vmatpush1.bf16.msra.mxu1 %v8798_v29  ;;  %2506 = vmatprep.subr.bf16.mxu0 %v8785_v32  ;;  %v8827_v32 = vld [vmem:[%s12511_s21 + $0x224] ss:$16 sps:$4 sm:$0xff]  }
 0x1bc   :  { %2594 = vmatprep.subr.bf16.mxu1 %v8806_v31  ;;  %v8822_v31 = vld [vmem:[%s12511_s21 + $0x208] ss:$16 sps:$4 sm:$0xff]  }
 0x1be   :  { %2507 = vmatpush1.bf16.msra.mxu0 %v8783_v34 }
 0x1bf   :  { %2595 = vmatpush1.bf16.msra.mxu1 %v8804_v33  ;;  %2508 = vmatprep.subr.bf16.mxu0 %v8791_v36  ;;  %v8830_v33 = vld [vmem:[%s12511_s21 + $0x22c] ss:$16 sps:$4 sm:$0xff]   ;;  %v8825_v36 = vld [vmem:[%s12511_s21 + $0x220] ss:$16 sps:$4 sm:$0xff]  }
 0x1c0   :  { %2596 = vmatprep.subr.bf16.mxu1 %v8812_v35 }
 0x1c2   :  { %2509 = vmatpush1.bf16.msra.mxu0 %v8789_v38  ;;  %v8833_v38 = vld [vmem:[%s12511_s21 + $0x244] ss:$16 sps:$4 sm:$0xff]  }
 0x1c3   :  { %2597 = vmatpush1.bf16.msra.mxu1 %v8810_v37  ;;  %2510 = vmatprep.subr.bf16.mxu0 %v8797_v26  ;;  %v8828_v37 = vld [vmem:[%s12511_s21 + $0x228] ss:$16 sps:$4 sm:$0xff]   ;;  %v8831_v26 = vld [vmem:[%s12511_s21 + $0x240] ss:$16 sps:$4 sm:$0xff]  }
 0x1c4   :  { %2598 = vmatprep.subr.bf16.mxu1 %v8818_v40  ;;  %v8836_v40 = vld [vmem:[%s12511_s21 + $0x24c] ss:$16 sps:$4 sm:$0xff]  }
 0x1c6   :  { %2511 = vmatpush1.bf16.msra.mxu0 %v8795_v42  ;;  %v8839_v42 = vld [vmem:[%s12511_s21 + $0x264] ss:$16 sps:$4 sm:$0xff]  }
 0x1c7   :  { %2599 = vmatpush1.bf16.msra.mxu1 %v8816_v41  ;;  %2512 = vmatprep.subr.bf16.mxu0 %v8803_v44  ;;  %v8834_v41 = vld [vmem:[%s12511_s21 + $0x248] ss:$16 sps:$4 sm:$0xff]   ;;  %v8837_v44 = vld [vmem:[%s12511_s21 + $0x260] ss:$16 sps:$4 sm:$0xff]  }
 0x1c8   :  { %2609 = vmatprep.subr.bf16.mxu1 %v8824_v43  ;;  %v8842_v43 = vld [vmem:[%s12511_s21 + $0x26c] ss:$16 sps:$4 sm:$0xff]  }
 0x1ca   :  { %2513 = vmatpush1.bf16.msra.mxu0 %v8801_v45  ;;  %v8840_v45 = vld [vmem:[%s12511_s21 + $0x268] ss:$16 sps:$4 sm:$0xff]  }
 0x1cb   :  { %2514 = vmatprep.subr.bf16.mxu0 %v8809_v39  ;;  %v8845_v39 = vld [vmem:[%s12511_s21 + $0x284] ss:$16 sps:$4 sm:$0xff]  }
 0x1ce   :  { %2515 = vmatpush1.bf16.msra.mxu0 %v8807_v46  ;;  %v8848_v46 = vld [vmem:[%s12511_s21 + $0x28c] ss:$16 sps:$4 sm:$0xff]  }
 0x1cf   :  { %2516 = vmatprep.subr.bf16.mxu0 %v8815_v47  ;;  %v8843_v47 = vld [vmem:[%s12511_s21 + $0x280] ss:$16 sps:$4 sm:$0xff]  }
 0x1d2   :  { %2517 = vmatpush1.bf16.msra.mxu0 %v8813_v52  ;;  %v8846_v52 = vld [vmem:[%s12511_s21 + $0x288] ss:$16 sps:$4 sm:$0xff]  }
 0x1d3   :  { %2527 = vmatprep.subr.bf16.mxu0 %v8821_v12  ;;  %v8851_v12 = vld [vmem:[%s12511_s21 + $0x2a4] ss:$16 sps:$4 sm:$0xff]  }
 0x1d5   :  { %v1574_v48 = vpop.f32.mrb[0].mxu1 }
 0x1d6   :  { %v1576_v49 = vpop.f32.mrb[1].mxu1 }
 0x1d7   :  { %v1578_v50 = vpop.f32.mrb[2].mxu1 }
 0x1d8   :  { %v1579_v51 = vpop.f32.mrb[3].mxu1  ;;  %v8852_v50 = vld [vmem:[%s12511_s21 + $0x2a8] ss:$16 sps:$4 sm:$0xff]  }
 0x1d9   :  { %v8857_v51 = vld [vmem:[%s12511_s21 + $0x2c4] ss:$16 sps:$4 sm:$0xff]  }
 0x1dd   :  { %v1656_v53 = vpop.f32.mrb[4].mxu1 }
 0x1de   :  { %v1658_v55 = vpop.f32.mrb[5].mxu1 }
 0x1df   :  { %v1660_v20 = vpop.f32.mrb[6].mxu1 }
 0x1e0   :  { %v1661_v57 = vpop.f32.mrb[7].mxu1  ;;  %v1533_v58 = vpop.f32.mrb[8].mxu0  ;;  %v8858_v20 = vld [vmem:[%s12511_s21 + $0x2c8] ss:$16 sps:$4 sm:$0xff]  }
 0x1e1   :  { %v1534_v59 = vadd.f32 %v1533_v58, %v10916_v54  ;;  %v1535_v60 = vpop.f32.mrb[9].mxu0  ;;  %v11084_v54 = vsub.s32 0, %v11073_v6  ;;  %v8863_v57 = vld [vmem:[%s12511_s21 + $0x2e4] ss:$16 sps:$4 sm:$0xff]   ;;  %v8866_v58 = vld [vmem:[%s12511_s21 + $0x2ec] ss:$16 sps:$4 sm:$0xff]  }
 0x1e2   :  { %v1536_v61 = vadd.f32 %v1535_v60, %v10924_v56  ;;  %v1537_v62 = vpop.f32.mrb[10].mxu0  ;;  %v8864_v60 = vld [vmem:[%s12511_s21 + $0x2e8] ss:$16 sps:$4 sm:$0xff]  }
 0x1e3   :  { %v1538_v63 = vpop.f32.mrb[11].mxu0  ;;  %v1575_v2 = vadd.f32 %v1574_v48, %v1534_v59  ;;  %v8854_v48 = vld [vmem:[%s12511_s21 + $0x2ac] ss:$16 sps:$4 sm:$0xff]   ;;  %v8861_v59 = vld [vmem:[%s12511_s21 + $0x2e0] ss:$16 sps:$4 sm:$0xff]  }
 0x1e4   :  { %v1577_v3 = vadd.f32 %v1576_v49, %v1536_v61  ;;  %v8849_v49 = vld [vmem:[%s12511_s21 + $0x2a0] ss:$16 sps:$4 sm:$0xff]   ;;  %v8869_v61 = vld [vmem:[%s12511_s21 + $0x304] ss:$16 sps:$4 sm:$0xff]   ;;  %v8872_v62 = vld [vmem:[%s12511_s21 + $0x30c] ss:$16 sps:$4 sm:$0xff]  }
 0x1e5   :  { %v8867_v63 = vld [vmem:[%s12511_s21 + $0x300] ss:$16 sps:$4 sm:$0xff]  }
 0x21d   :  { %v1697_v7 = vpop.f32.mrb[8].mxu1 }
 0x21e   :  { %v11076_v9 = vadd.f32 %v1697_v7, %v10941_v1  ;;  %v1699_v10 = vpop.f32.mrb[9].mxu1  ;;  %v1832_v1 = vrot.slane %v11081_v13, %v11084_v54 }
 0x21f   :  { %v11079_v11 = vadd.f32 %v1699_v10, %v10949_v4  ;;  %v1701_v56 = vpop.f32.mrb[10].mxu1  ;;  %v1836_v4 = vrot.slane %v11081_v13, %v11087_v14 }
 0x220   :  { %v1702_v15 = vpop.f32.mrb[11].mxu1  ;;  %v1615_v16 = vpop.f32.mrb[12].mxu0 }
 0x221   :  { %v1616_v17 = vadd.f32 %v1615_v16, %v1575_v2  ;;  %v1617_v18 = vpop.f32.mrb[13].mxu0  ;;  %v8870_v2 = vld [vmem:[%s12511_s21 + $0x308] ss:$16 sps:$4 sm:$0xff]  }
 0x222   :  { %v1618_v19 = vadd.f32 %v1617_v18, %v1577_v3  ;;  %v1619_v21 = vpop.f32.mrb[14].mxu0  ;;  %v8875_v3 = vld [vmem:[%s12475_s8 + $0x4] ss:$16 sps:$4 sm:$0xff]  }
 0x223   :  { %v1657_v22 = vadd.f32 %v1656_v53, %v1616_v17  ;;  %v1620_v23 = vpop.f32.mrb[15].mxu0  ;;  %v8860_v53 = vld [vmem:[%s12511_s21 + $0x2cc] ss:$16 sps:$4 sm:$0xff]  }
 0x224   :  { %v1659_v24 = vadd.f32 %v1658_v55, %v1618_v19  ;;  %v8855_v55 = vld [vmem:[%s12511_s21 + $0x2c0] ss:$16 sps:$4 sm:$0xff]  }
 0x225   :  { %v1849_v25 = vadd.f32 %v1832_v1, %v1657_v22  ;;  %v11204_v22 = vsub.s32 2, %v11073_v6 }
 0x226   :  { %v1850_v27 = vadd.f32 %v1836_v4, %v1659_v24  ;;  %v11207_v24 = vsub.s32 3, %v11073_v6 }
 0x227   :  { %v1853_v28 = vmax.f32 %v1849_v25, 0.0  ;;  %v1840_v25 = vrot.slane %v11081_v13, %v11204_v22 }
 0x228   :  { %v1854_v29 = vmax.f32 %v1850_v27, 0.0 }
 0x229   :  { %v1857_v35 = vpack.c.bf16 %v1853_v28, %v1853_v28 }
 0x22a   :  { %v1858_v34 = vpack.c.bf16 %v1854_v29, %v1854_v29 }
 0x22c   :  { %2518 = vmatprep.mubr.bf16.mxu0 %v1858_v34  ;;  %2600 = vmatprep.mubr.bf16.mxu1 %v1858_v34 }
 0x22d   :  { %2519 = vmatmul.mubr.bf16.vlgmr.msra.gmra.mrb[24].mxu0 %v1857_v35  ;;  %2601 = vmatmul.mubr.bf16.vlgmr.msra.gmra.mrb[16].mxu1 %v1857_v35 }
 0x22e   :  { %2528 = vmatpush1.bf16.msra.mxu0 %v8819_v30  ;;  %2610 = vmatpush1.bf16.msra.mxu1 %v8822_v31 }
 0x22f   :  { %2529 = vmatprep.subr.bf16.mxu0 %v8827_v32  ;;  %2611 = vmatprep.subr.bf16.mxu1 %v8830_v33 }
 0x232   :  { %2530 = vmatpush1.bf16.msra.mxu0 %v8825_v36  ;;  %2612 = vmatpush1.bf16.msra.mxu1 %v8828_v37  ;;  %v8873_v37 = vld [vmem:[%s12475_s8] ss:$16 sps:$4 sm:$0xff]  }
 0x233   :  { %2531 = vmatprep.subr.bf16.mxu0 %v8833_v38  ;;  %2613 = vmatprep.subr.bf16.mxu1 %v8836_v40  ;;  %v8876_v38 = vld [vmem:[%s12475_s8 + $0x8] ss:$16 sps:$4 sm:$0xff]  }
 0x236   :  { %2532 = vmatpush1.bf16.msra.mxu0 %v8831_v26  ;;  %2614 = vmatpush1.bf16.msra.mxu1 %v8834_v41  ;;  %v8884_v26 = vld [vmem:[%s12475_s8 + $0x2c] ss:$16 sps:$4 sm:$0xff]   ;;  %v8879_v41 = vld [vmem:[%s12475_s8 + $0x20] ss:$16 sps:$4 sm:$0xff]  }
 0x237   :  { %2533 = vmatprep.subr.bf16.mxu0 %v8839_v42  ;;  %2615 = vmatprep.subr.bf16.mxu1 %v8842_v43  ;;  %v8882_v42 = vld [vmem:[%s12475_s8 + $0x28] ss:$16 sps:$4 sm:$0xff]   ;;  %v8887_v43 = vld [vmem:[%s12475_s8 + $0x44] ss:$16 sps:$4 sm:$0xff]  }
 0x23a   :  { %2534 = vmatpush1.bf16.msra.mxu0 %v8837_v44  ;;  %2616 = vmatpush1.bf16.msra.mxu1 %v8840_v45  ;;  %v8890_v44 = vld [vmem:[%s12475_s8 + $0x4c] ss:$16 sps:$4 sm:$0xff]   ;;  %v8885_v45 = vld [vmem:[%s12475_s8 + $0x40] ss:$16 sps:$4 sm:$0xff]  }
 0x23b   :  { %2535 = vmatprep.subr.bf16.mxu0 %v8845_v39  ;;  %2617 = vmatprep.subr.bf16.mxu1 %v8848_v46  ;;  %v8888_v39 = vld [vmem:[%s12475_s8 + $0x48] ss:$16 sps:$4 sm:$0xff]   ;;  %v8893_v46 = vld [vmem:[%s12475_s8 + $0x64] ss:$16 sps:$4 sm:$0xff]  }
 0x23e   :  { %2536 = vmatpush1.bf16.msra.mxu0 %v8843_v47  ;;  %2618 = vmatpush1.bf16.msra.mxu1 %v8846_v52  ;;  %v8896_v47 = vld [vmem:[%s12475_s8 + $0x6c] ss:$16 sps:$4 sm:$0xff]   ;;  %v8891_v52 = vld [vmem:[%s12475_s8 + $0x60] ss:$16 sps:$4 sm:$0xff]  }
 0x23f   :  { %2537 = vmatprep.subr.bf16.mxu0 %v8851_v12  ;;  %2619 = vmatprep.subr.bf16.mxu1 %v8854_v48  ;;  %v8894_v12 = vld [vmem:[%s12475_s8 + $0x68] ss:$16 sps:$4 sm:$0xff]   ;;  %v8899_v48 = vld [vmem:[%s12475_s8 + $0x84] ss:$16 sps:$4 sm:$0xff]  }
 0x242   :  { %2538 = vmatpush1.bf16.msra.mxu0 %v8849_v49  ;;  %2620 = vmatpush1.bf16.msra.mxu1 %v8852_v50  ;;  %v8902_v49 = vld [vmem:[%s12475_s8 + $0x8c] ss:$16 sps:$4 sm:$0xff]   ;;  %v8897_v50 = vld [vmem:[%s12475_s8 + $0x80] ss:$16 sps:$4 sm:$0xff]  }
 0x243   :  { %2539 = vmatprep.subr.bf16.mxu0 %v8857_v51  ;;  %2621 = vmatprep.subr.bf16.mxu1 %v8860_v53  ;;  %v8900_v51 = vld [vmem:[%s12475_s8 + $0x88] ss:$16 sps:$4 sm:$0xff]   ;;  %v8905_v53 = vld [vmem:[%s12475_s8 + $0xa4] ss:$16 sps:$4 sm:$0xff]  }
 0x246   :  { %2540 = vmatpush1.bf16.msra.mxu0 %v8855_v55  ;;  %2622 = vmatpush1.bf16.msra.mxu1 %v8858_v20  ;;  %v8908_v55 = vld [vmem:[%s12475_s8 + $0xac] ss:$16 sps:$4 sm:$0xff]   ;;  %v8903_v20 = vld [vmem:[%s12475_s8 + $0xa0] ss:$16 sps:$4 sm:$0xff]  }
 0x247   :  { %2541 = vmatprep.subr.bf16.mxu0 %v8863_v57  ;;  %2623 = vmatprep.subr.bf16.mxu1 %v8866_v58  ;;  %v8906_v57 = vld [vmem:[%s12475_s8 + $0xa8] ss:$16 sps:$4 sm:$0xff]   ;;  %v8911_v58 = vld [vmem:[%s12475_s8 + $0xc4] ss:$16 sps:$4 sm:$0xff]  }
 0x24a   :  { %2542 = vmatpush1.bf16.msra.mxu0 %v8861_v59  ;;  %2624 = vmatpush1.bf16.msra.mxu1 %v8864_v60  ;;  %v8914_v59 = vld [vmem:[%s12475_s8 + $0xcc] ss:$16 sps:$4 sm:$0xff]   ;;  %v8909_v60 = vld [vmem:[%s12475_s8 + $0xc0] ss:$16 sps:$4 sm:$0xff]  }
 0x24b   :  { %2543 = vmatprep.subr.bf16.mxu0 %v8869_v61  ;;  %2625 = vmatprep.subr.bf16.mxu1 %v8872_v62  ;;  %v8912_v61 = vld [vmem:[%s12475_s8 + $0xc8] ss:$16 sps:$4 sm:$0xff]   ;;  %v8917_v62 = vld [vmem:[%s12475_s8 + $0xe4] ss:$16 sps:$4 sm:$0xff]  }
 0x24e   :  { %2544 = vmatpush1.bf16.msra.mxu0 %v8867_v63  ;;  %2626 = vmatpush1.bf16.msra.mxu1 %v8870_v2  ;;  %v8920_v63 = vld [vmem:[%s12475_s8 + $0xec] ss:$16 sps:$4 sm:$0xff]   ;;  %v8915_v2 = vld [vmem:[%s12475_s8 + $0xe0] ss:$16 sps:$4 sm:$0xff]  }
 0x24f   :  { %3283 = vmatprep.subr.bf16.mxu0 %v8875_v3  ;;  %3365 = vmatprep.subr.bf16.mxu1 %v8878_v5  ;;  %v8918_v3 = vld [vmem:[%s12475_s8 + $0xe8] ss:$16 sps:$4 sm:$0xff]   ;;  %v8923_v5 = vld [vmem:[%s12475_s8 + $0x104] ss:$16 sps:$4 sm:$0xff]  }
 0x25d   :  { %v1779_v7 = vpop.f32.mrb[12].mxu1 }
 0x25e   :  { %v1781_v10 = vpop.f32.mrb[13].mxu1 }
 0x25f   :  { %v1783_v56 = vpop.f32.mrb[14].mxu1 }
 0x260   :  { %v1784_v15 = vpop.f32.mrb[15].mxu1  ;;  %v1738_v16 = vpop.f32.mrb[16].mxu0  ;;  %v8924_v56 = vld [vmem:[%s12475_s8 + $0x108] ss:$16 sps:$4 sm:$0xff]  }
 0x261   :  { %v1739_v17 = vadd.f32 %v1738_v16, %v11076_v9  ;;  %v1740_v1 = vpop.f32.mrb[17].mxu0  ;;  %v1844_v9 = vrot.slane %v11081_v13, %v11207_v24  ;;  %v8881_v13 = vld [vmem:[%s12475_s8 + $0x24] ss:$16 sps:$4 sm:$0xff]   ;;  %v8932_v16 = vld [vmem:[%s12475_s8 + $0x12c] ss:$16 sps:$4 sm:$0xff]  }
 0x262   :  { %v1741_v18 = vadd.f32 %v1740_v1, %v11079_v11  ;;  %v1742_v19 = vpop.f32.mrb[18].mxu0  ;;  %v8929_v15 = vld [vmem:[%s12475_s8 + $0x124] ss:$16 sps:$4 sm:$0xff]   ;;  %v8930_v1 = vld [vmem:[%s12475_s8 + $0x128] ss:$16 sps:$4 sm:$0xff]  }
 0x263   :  { %v1780_v4 = vadd.f32 %v1779_v7, %v1739_v17  ;;  %v1743_v21 = vpop.f32.mrb[19].mxu0  ;;  %v8926_v7 = vld [vmem:[%s12475_s8 + $0x10c] ss:$16 sps:$4 sm:$0xff]   ;;  %v8927_v17 = vld [vmem:[%s12475_s8 + $0x120] ss:$16 sps:$4 sm:$0xff]  }
 0x264   :  { %v1782_v23 = vadd.f32 %v1781_v10, %v1741_v18  ;;  %v8921_v10 = vld [vmem:[%s12475_s8 + $0x100] ss:$16 sps:$4 sm:$0xff]   ;;  %v8935_v18 = vld [vmem:[%s12475_s8 + $0x144] ss:$16 sps:$4 sm:$0xff]   ;;  %v8938_v19 = vld [vmem:[%s12475_s8 + $0x14c] ss:$16 sps:$4 sm:$0xff]  }
 0x265   :  { %v8936_v21 = vld [vmem:[%s12475_s8 + $0x148] ss:$16 sps:$4 sm:$0xff]  }
 0x268   :  { %v1820_v27 = vpop.f32.mrb[20].mxu0 }
 0x269   :  { %v1821_v28 = vadd.f32 %v1820_v27, %v1780_v4  ;;  %v1822_v29 = vpop.f32.mrb[21].mxu0  ;;  %v8933_v4 = vld [vmem:[%s12475_s8 + $0x140] ss:$16 sps:$4 sm:$0xff]  }
 0x26a   :  { %v1823_v11 = vadd.f32 %v1822_v29, %v1782_v23  ;;  %v1824_v30 = vpop.f32.mrb[22].mxu0  ;;  %v8941_v23 = vld [vmem:[%s12475_s8 + $0x164] ss:$16 sps:$4 sm:$0xff]   ;;  %v8939_v27 = vld [vmem:[%s12475_s8 + $0x160] ss:$16 sps:$4 sm:$0xff]  }
 0x26b   :  { %v1851_v31 = vadd.f32 %v1840_v25, %v1821_v28  ;;  %v1825_v32 = vpop.f32.mrb[23].mxu0  ;;  %v8944_v25 = vld [vmem:[%s12475_s8 + $0x16c] ss:$16 sps:$4 sm:$0xff]   ;;  %v8947_v28 = vld [vmem:[%s12475_s8 + $0x184] ss:$16 sps:$4 sm:$0xff]  }
 0x26c   :  { %v1852_v33 = vadd.f32 %v1844_v9, %v1823_v11  ;;  %v8942_v9 = vld [vmem:[%s12475_s8 + $0x168] ss:$16 sps:$4 sm:$0xff]   ;;  %v8950_v29 = vld [vmem:[%s12475_s8 + $0x18c] ss:$16 sps:$4 sm:$0xff]   ;;  %v8945_v11 = vld [vmem:[%s12475_s8 + $0x180] ss:$16 sps:$4 sm:$0xff]  }
 0x26d   :  { %v1855_v34 = vmax.f32 %v1851_v31, 0.0  ;;  %v8948_v30 = vld [vmem:[%s12475_s8 + $0x188] ss:$16 sps:$4 sm:$0xff]   ;;  %v8953_v31 = vld [vmem:[%s12475_s8 + $0x1a4] ss:$16 sps:$4 sm:$0xff]  }
 0x26e   :  { %v1856_v35 = vmax.f32 %v1852_v33, 0.0  ;;  %v8956_v32 = vld [vmem:[%s12475_s8 + $0x1ac] ss:$16 sps:$4 sm:$0xff]   ;;  %v8951_v33 = vld [vmem:[%s12475_s8 + $0x1a0] ss:$16 sps:$4 sm:$0xff]  }
 0x26f   :  { %v1859_v40 = vpack.c.bf16 %v1855_v34, %v1855_v34  ;;  %v8954_v34 = vld [vmem:[%s12475_s8 + $0x1a8] ss:$16 sps:$4 sm:$0xff]  }
 0x270   :  { %v1860_v36 = vpack.c.bf16 %v1856_v35, %v1856_v35  ;;  %v8959_v35 = vld [vmem:[%s12475_s8 + $0x1c4] ss:$16 sps:$4 sm:$0xff]  }
 0x272   :  { %7730 = vmatprep.mubr.msk.bf16.mxu0 %vm1495_vm2, %v1860_v36  ;;  %7731 = vmatprep.mubr.msk.bf16.mxu1 %vm1495_vm2, %v1860_v36  ;;  %v8962_v36 = vld [vmem:[%s12475_s8 + $0x1cc] ss:$16 sps:$4 sm:$0xff]  }
 0x273   :  { %2560 = vmatmul.mubr.bf16.vlgmr.msra.gmra.mrb[24].mxu0 %v1859_v40  ;;  %2642 = vmatmul.mubr.bf16.vlgmr.msra.gmra.mrb[16].mxu1 %v1859_v40  ;;  %v8965_v40 = vld [vmem:[%s12475_s8 + $0x1e4] ss:$16 sps:$4 sm:$0xff]  }
 0x274   :  { %3284 = vmatpush1.bf16.msra.mxu0 %v8873_v37  ;;  %3366 = vmatpush1.bf16.msra.mxu1 %v8876_v38  ;;  %v8957_v37 = vld [vmem:[%s12475_s8 + $0x1c0] ss:$16 sps:$4 sm:$0xff]   ;;  %v8960_v38 = vld [vmem:[%s12475_s8 + $0x1c8] ss:$16 sps:$4 sm:$0xff]  }
 0x275   :  { %3285 = vmatprep.subr.bf16.mxu0 %v8881_v13  ;;  %3367 = vmatprep.subr.bf16.mxu1 %v8884_v26  ;;  %v8968_v13 = vld [vmem:[%s12475_s8 + $0x1ec] ss:$16 sps:$4 sm:$0xff]   ;;  %v8963_v26 = vld [vmem:[%s12475_s8 + $0x1e0] ss:$16 sps:$4 sm:$0xff]  }
 0x278   :  { %3286 = vmatpush1.bf16.msra.mxu0 %v8879_v41  ;;  %3368 = vmatpush1.bf16.msra.mxu1 %v8882_v42  ;;  %v8966_v41 = vld [vmem:[%s12475_s8 + $0x1e8] ss:$16 sps:$4 sm:$0xff]   ;;  %v8971_v42 = vld [vmem:[%s12475_s8 + $0x204] ss:$16 sps:$4 sm:$0xff]  }
 0x279   :  { %3287 = vmatprep.subr.bf16.mxu0 %v8887_v43  ;;  %3369 = vmatprep.subr.bf16.mxu1 %v8890_v44  ;;  %v8974_v43 = vld [vmem:[%s12475_s8 + $0x20c] ss:$16 sps:$4 sm:$0xff]  }
 0x27a   :  { %v11407_v44 = vld [vmem:[#allocation8] sm:$0xf] }
 0x27c   :  { %3288 = vmatpush1.bf16.msra.mxu0 %v8885_v45  ;;  %3370 = vmatpush1.bf16.msra.mxu1 %v8888_v39  ;;  %v1966_v45 = vrot.slane %v11407_v44, %v11084_v54  ;;  %v1970_v39 = vrot.slane %v11407_v44, %v11087_v14 }
 0x27d   :  { %3289 = vmatprep.subr.bf16.mxu0 %v8893_v46  ;;  %3371 = vmatprep.subr.bf16.mxu1 %v8896_v47  ;;  %v1978_v46 = vrot.slane %v11407_v44, %v11207_v24 }
 0x280   :  { %3290 = vmatpush1.bf16.msra.mxu0 %v8891_v52  ;;  %3372 = vmatpush1.bf16.msra.mxu1 %v8894_v12 }
 0x281   :  { %3291 = vmatprep.subr.bf16.mxu0 %v8899_v48  ;;  %3373 = vmatprep.subr.bf16.mxu1 %v8902_v49 }
 0x284   :  { %3292 = vmatpush1.bf16.msra.mxu0 %v8897_v50  ;;  %3374 = vmatpush1.bf16.msra.mxu1 %v8900_v51 }
 0x285   :  { %3293 = vmatprep.subr.bf16.mxu0 %v8905_v53  ;;  %3375 = vmatprep.subr.bf16.mxu1 %v8908_v55 }
 0x288   :  { %3294 = vmatpush1.bf16.msra.mxu0 %v8903_v20  ;;  %3376 = vmatpush1.bf16.msra.mxu1 %v8906_v57 }
 0x289   :  { %3295 = vmatprep.subr.bf16.mxu0 %v8911_v58  ;;  %3377 = vmatprep.subr.bf16.mxu1 %v8914_v59 }
 0x28c   :  { %3296 = vmatpush1.bf16.msra.mxu0 %v8909_v60  ;;  %3378 = vmatpush1.bf16.msra.mxu1 %v8912_v61 }
 0x28d   :  { %3297 = vmatprep.subr.bf16.mxu0 %v8917_v62  ;;  %3379 = vmatprep.subr.bf16.mxu1 %v8920_v63  ;;  %v8969_v62 = vld [vmem:[%s12475_s8 + $0x200] ss:$16 sps:$4 sm:$0xff]   ;;  %v8972_v63 = vld [vmem:[%s12475_s8 + $0x208] ss:$16 sps:$4 sm:$0xff]  }
 0x290   :  { %3298 = vmatpush1.bf16.msra.mxu0 %v8915_v2  ;;  %3380 = vmatpush1.bf16.msra.mxu1 %v8918_v3  ;;  %v8977_v3 = vld [vmem:[%s12475_s8 + $0x224] ss:$16 sps:$4 sm:$0xff]  }
 0x291   :  { %3299 = vmatprep.subr.bf16.mxu0 %v8923_v5  ;;  %3381 = vmatprep.subr.bf16.mxu1 %v8926_v7  ;;  %v8980_v5 = vld [vmem:[%s12475_s8 + $0x22c] ss:$16 sps:$4 sm:$0xff]  }
 0x294   :  { %3300 = vmatpush1.bf16.msra.mxu0 %v8921_v10  ;;  %3382 = vmatpush1.bf16.msra.mxu1 %v8924_v56  ;;  %v8975_v10 = vld [vmem:[%s12475_s8 + $0x220] ss:$16 sps:$4 sm:$0xff]   ;;  %v8978_v56 = vld [vmem:[%s12475_s8 + $0x228] ss:$16 sps:$4 sm:$0xff]  }
 0x295   :  { %3301 = vmatprep.subr.bf16.mxu0 %v8929_v15  ;;  %3383 = vmatprep.subr.bf16.mxu1 %v8932_v16  ;;  %v8983_v15 = vld [vmem:[%s12475_s8 + $0x244] ss:$16 sps:$4 sm:$0xff]   ;;  %v8986_v16 = vld [vmem:[%s12475_s8 + $0x24c] ss:$16 sps:$4 sm:$0xff]  }
 0x298   :  { %3302 = vmatpush1.bf16.msra.mxu0 %v8927_v17  ;;  %3384 = vmatpush1.bf16.msra.mxu1 %v8930_v1  ;;  %v8981_v17 = vld [vmem:[%s12475_s8 + $0x240] ss:$16 sps:$4 sm:$0xff]   ;;  %v8984_v1 = vld [vmem:[%s12475_s8 + $0x248] ss:$16 sps:$4 sm:$0xff]  }
 0x299   :  { %3303 = vmatprep.subr.bf16.mxu0 %v8935_v18  ;;  %3385 = vmatprep.subr.bf16.mxu1 %v8938_v19  ;;  %v8989_v18 = vld [vmem:[%s12475_s8 + $0x264] ss:$16 sps:$4 sm:$0xff]   ;;  %v8992_v19 = vld [vmem:[%s12475_s8 + $0x26c] ss:$16 sps:$4 sm:$0xff]  }
 0x29c   :  { %3304 = vmatpush1.bf16.msra.mxu0 %v8933_v4  ;;  %3386 = vmatpush1.bf16.msra.mxu1 %v8936_v21  ;;  %v8987_v4 = vld [vmem:[%s12475_s8 + $0x260] ss:$16 sps:$4 sm:$0xff]   ;;  %v8990_v21 = vld [vmem:[%s12475_s8 + $0x268] ss:$16 sps:$4 sm:$0xff]  }
 0x29d   :  { %3305 = vmatprep.subr.bf16.mxu0 %v8941_v23  ;;  %3387 = vmatprep.subr.bf16.mxu1 %v8944_v25  ;;  %v8995_v23 = vld [vmem:[%s12475_s8 + $0x284] ss:$16 sps:$4 sm:$0xff]   ;;  %v8998_v25 = vld [vmem:[%s12475_s8 + $0x28c] ss:$16 sps:$4 sm:$0xff]  }
 0x2a0   :  { %3306 = vmatpush1.bf16.msra.mxu0 %v8939_v27  ;;  %3388 = vmatpush1.bf16.msra.mxu1 %v8942_v9  ;;  %v8993_v27 = vld [vmem:[%s12475_s8 + $0x280] ss:$16 sps:$4 sm:$0xff]   ;;  %v8996_v9 = vld [vmem:[%s12475_s8 + $0x288] ss:$16 sps:$4 sm:$0xff]  }
 0x2a1   :  { %3307 = vmatprep.subr.bf16.mxu0 %v8947_v28  ;;  %3389 = vmatprep.subr.bf16.mxu1 %v8950_v29  ;;  %v9001_v28 = vld [vmem:[%s12475_s8 + $0x2a4] ss:$16 sps:$4 sm:$0xff]   ;;  %v9004_v29 = vld [vmem:[%s12475_s8 + $0x2ac] ss:$16 sps:$4 sm:$0xff]  }
 0x2a4   :  { %3308 = vmatpush1.bf16.msra.mxu0 %v8945_v11  ;;  %3390 = vmatpush1.bf16.msra.mxu1 %v8948_v30  ;;  %v8999_v11 = vld [vmem:[%s12475_s8 + $0x2a0] ss:$16 sps:$4 sm:$0xff]   ;;  %v9002_v30 = vld [vmem:[%s12475_s8 + $0x2a8] ss:$16 sps:$4 sm:$0xff]  }
 0x2a5   :  { %3309 = vmatprep.subr.bf16.mxu0 %v8953_v31  ;;  %3391 = vmatprep.subr.bf16.mxu1 %v8956_v32  ;;  %v9007_v31 = vld [vmem:[%s12475_s8 + $0x2c4] ss:$16 sps:$4 sm:$0xff]   ;;  %v9010_v32 = vld [vmem:[%s12475_s8 + $0x2cc] ss:$16 sps:$4 sm:$0xff]  }
 0x2a8   :  { %3310 = vmatpush1.bf16.msra.mxu0 %v8951_v33  ;;  %3392 = vmatpush1.bf16.msra.mxu1 %v8954_v34  ;;  %v9005_v33 = vld [vmem:[%s12475_s8 + $0x2c0] ss:$16 sps:$4 sm:$0xff]   ;;  %v9008_v34 = vld [vmem:[%s12475_s8 + $0x2c8] ss:$16 sps:$4 sm:$0xff]  }
 0x2a9   :  { %3311 = vmatprep.subr.bf16.mxu0 %v8959_v35  ;;  %3393 = vmatprep.subr.bf16.mxu1 %v8962_v36  ;;  %v1974_v35 = vrot.slane %v11407_v44, %v11204_v22  ;;  %v9013_v36 = vld [vmem:[%s12475_s8 + $0x2e4] ss:$16 sps:$4 sm:$0xff]  }
 0x2ac   :  { %3312 = vmatpush1.bf16.msra.mxu0 %v8957_v37  ;;  %3394 = vmatpush1.bf16.msra.mxu1 %v8960_v38  ;;  %v9016_v37 = vld [vmem:[%s12475_s8 + $0x2ec] ss:$16 sps:$4 sm:$0xff]   ;;  %v9011_v38 = vld [vmem:[%s12475_s8 + $0x2e0] ss:$16 sps:$4 sm:$0xff]  }
 0x2ad   :  { %3313 = vmatprep.subr.bf16.mxu0 %v8965_v40  ;;  %3395 = vmatprep.subr.bf16.mxu1 %v8968_v13  ;;  %v9014_v40 = vld [vmem:[%s12475_s8 + $0x2e8] ss:$16 sps:$4 sm:$0xff]  }
 0x2b0   :  { %3314 = vmatpush1.bf16.msra.mxu0 %v8963_v26  ;;  %3396 = vmatpush1.bf16.msra.mxu1 %v8966_v41  ;;  %v9019_v26 = vld [vmem:[%s12475_s8 + $0x304] ss:$16 sps:$4 sm:$0xff]   ;;  %v9022_v41 = vld [vmem:[%s12475_s8 + $0x30c] ss:$16 sps:$4 sm:$0xff]  }
 0x2b1   :  { %3324 = vmatprep.subr.bf16.mxu0 %v8971_v42  ;;  %3406 = vmatprep.subr.bf16.mxu1 %v8974_v43  ;;  %v9017_v42 = vld [vmem:[%s12475_s8 + $0x300] ss:$16 sps:$4 sm:$0xff]   ;;  %v9020_v43 = vld [vmem:[%s12475_s8 + $0x308] ss:$16 sps:$4 sm:$0xff]  }
 0x346   :  { %v2561_v47 = vpop.f32.mrb[24].mxu0  ;;  %v11415_v52 = vpop.f32.mrb[16].mxu1 }
 0x347   :  { %v8337_v12 = vadd.f32 %v2561_v47, %v1966_v45  ;;  %v2563_v48 = vpop.f32.mrb[25].mxu0  ;;  %v2645_v49 = vpop.f32.mrb[17].mxu1  ;;  %v8339_v13 = vadd.f32 %v11415_v52, %v1974_v35  ;;  %v9025_v45 = vld [vmem:[%s12477_s10 + $0x4] ss:$8 sps:$4 sm:$0xff]   ;;  %v9028_v47 = vld [vmem:[%s12477_s10 + $0x14] ss:$8 sps:$4 sm:$0xff]  }
 0x348   :  { %v8338_v50 = vadd.f32 %v2563_v48, %v1970_v39  ;;  %v8340_v51 = vadd.f32 %v2645_v49, %v1978_v46  ;;  %v2565_v53 = vpop.f32.mrb[26].mxu0  ;;  %v2647_v55 = vpop.f32.mrb[18].mxu1  ;;  %v9023_v39 = vld [vmem:[%s12477_s10] ss:$8 sps:$4 sm:$0xff]   ;;  %v9026_v52 = vld [vmem:[%s12477_s10 + $0x10] ss:$8 sps:$4 sm:$0xff]  }
 0x349   :  { %v2650_v20 = vmax.f32 %v8337_v12, 0.0  ;;  %v2566_v57 = vpop.f32.mrb[27].mxu0  ;;  %v2648_v58 = vpop.f32.mrb[19].mxu1  ;;  %v2652_v44 = vmax.f32 %v8339_v13, 0.0  ;;  %v9031_v12 = vld [vmem:[%s12477_s10 + $0x24] ss:$8 sps:$4 sm:$0xff]  }
 0x34a   :  { %v2651_v59 = vmax.f32 %v8338_v50, 0.0  ;;  %v2653_v60 = vmax.f32 %v8340_v51, 0.0  ;;  %v9029_v48 = vld [vmem:[%s12477_s10 + $0x20] ss:$8 sps:$4 sm:$0xff]   ;;  %v9034_v49 = vld [vmem:[%s12477_s10 + $0x34] ss:$8 sps:$4 sm:$0xff]  }
 0x34b   :  { %v2654_v2 = vpack.c.bf16 %v2650_v20, %v2650_v20  ;;  %v2656_v46 = vpack.c.bf16 %v2652_v44, %v2652_v44  ;;  %v9032_v50 = vld [vmem:[%s12477_s10 + $0x30] ss:$8 sps:$4 sm:$0xff]   ;;  %v9037_v51 = vld [vmem:[%s12477_s10 + $0x44] ss:$8 sps:$4 sm:$0xff]   ;;  %v9035_v53 = vld [vmem:[%s12477_s10 + $0x40] ss:$8 sps:$4 sm:$0xff]  }
 0x34c   :  { %v2655_v61 = vpack.c.bf16 %v2651_v59, %v2651_v59  ;;  %v2657_v7 = vpack.c.bf16 %v2653_v60, %v2653_v60  ;;  %v9040_v55 = vld [vmem:[%s12477_s10 + $0x54] ss:$8 sps:$4 sm:$0xff]   ;;  %v9038_v20 = vld [vmem:[%s12477_s10 + $0x50] ss:$8 sps:$4 sm:$0xff]   ;;  %v9043_v57 = vld [vmem:[%s12477_s10 + $0x64] ss:$8 sps:$4 sm:$0xff]  }
 0x34d   :  { %v9041_v58 = vld [vmem:[%s12477_s10 + $0x60] ss:$8 sps:$4 sm:$0xff]   ;;  %v9046_v59 = vld [vmem:[%s12477_s10 + $0x74] ss:$8 sps:$4 sm:$0xff]   ;;  %v9044_v60 = vld [vmem:[%s12477_s10 + $0x70] ss:$8 sps:$4 sm:$0xff]  }
 0x34e   :  { %3315 = vmatprep.mubr.bf16.mxu0 %v2655_v61  ;;  %3397 = vmatprep.mubr.bf16.mxu1 %v2655_v61  ;;  %v9049_v61 = vld [vmem:[%s12477_s10 + $0x84] ss:$8 sps:$4 sm:$0xff]  }
 0x34f   :  { %3316 = vmatmul.mubr.bf16.vlgmr.msra.gmra.mrb[28].mxu0 %v2654_v2  ;;  %3398 = vmatmul.mubr.bf16.vlgmr.msra.gmra.mrb[20].mxu1 %v2654_v2  ;;  %v9050_v2 = vld [vmem:[%s12477_s10 + $0x90] ss:$8 sps:$4 sm:$0xff]  }
 0x350   :  { %3325 = vmatpush1.bf16.msra.mxu0 %v8969_v62  ;;  %3407 = vmatpush1.bf16.msra.mxu1 %v8972_v63  ;;  %v9047_v62 = vld [vmem:[%s12477_s10 + $0x80] ss:$8 sps:$4 sm:$0xff]   ;;  %v9052_v63 = vld [vmem:[%s12477_s10 + $0x94] ss:$8 sps:$4 sm:$0xff]  }
 0x351   :  { %7832 = vmatprep.mubr.msk.bf16.mxu0 %vm1495_vm2, %v2657_v7  ;;  %7833 = vmatprep.mubr.msk.bf16.mxu1 %vm1495_vm2, %v2657_v7  ;;  %v9058_v7 = vld [vmem:[%s12477_s10 + $0xb4] ss:$8 sps:$4 sm:$0xff]  }
 0x352   :  { %3326 = vmatprep.subr.bf16.mxu0 %v8977_v3  ;;  %3408 = vmatprep.subr.bf16.mxu1 %v8980_v5  ;;  %v9055_v3 = vld [vmem:[%s12477_s10 + $0xa4] ss:$8 sps:$4 sm:$0xff]   ;;  %v9053_v5 = vld [vmem:[%s12477_s10 + $0xa0] ss:$8 sps:$4 sm:$0xff]  }
 0x354   :  { %3327 = vmatpush1.bf16.msra.mxu0 %v8975_v10  ;;  %3409 = vmatpush1.bf16.msra.mxu1 %v8978_v56  ;;  %v9056_v10 = vld [vmem:[%s12477_s10 + $0xb0] ss:$8 sps:$4 sm:$0xff]   ;;  %v9061_v56 = vld [vmem:[%s12477_s10 + $0xc4] ss:$8 sps:$4 sm:$0xff]  }
 0x355   :  { %3328 = vmatprep.subr.bf16.mxu0 %v8983_v15  ;;  %3410 = vmatprep.subr.bf16.mxu1 %v8986_v16  ;;  %v9059_v15 = vld [vmem:[%s12477_s10 + $0xc0] ss:$8 sps:$4 sm:$0xff]   ;;  %v9064_v16 = vld [vmem:[%s12477_s10 + $0xd4] ss:$8 sps:$4 sm:$0xff]  }
 0x358   :  { %3329 = vmatpush1.bf16.msra.mxu0 %v8981_v17  ;;  %3411 = vmatpush1.bf16.msra.mxu1 %v8984_v1  ;;  %v9062_v17 = vld [vmem:[%s12477_s10 + $0xd0] ss:$8 sps:$4 sm:$0xff]   ;;  %v9067_v1 = vld [vmem:[%s12477_s10 + $0xe4] ss:$8 sps:$4 sm:$0xff]  }
 0x359   :  { %3330 = vmatprep.subr.bf16.mxu0 %v8989_v18  ;;  %3412 = vmatprep.subr.bf16.mxu1 %v8992_v19  ;;  %v9065_v18 = vld [vmem:[%s12477_s10 + $0xe0] ss:$8 sps:$4 sm:$0xff]   ;;  %v9070_v19 = vld [vmem:[%s12477_s10 + $0xf4] ss:$8 sps:$4 sm:$0xff]  }
 0x35c   :  { %3331 = vmatpush1.bf16.msra.mxu0 %v8987_v4  ;;  %3413 = vmatpush1.bf16.msra.mxu1 %v8990_v21  ;;  %v9068_v4 = vld [vmem:[%s12477_s10 + $0xf0] ss:$8 sps:$4 sm:$0xff]   ;;  %v9073_v21 = vld [vmem:[%s12477_s10 + $0x104] ss:$8 sps:$4 sm:$0xff]  }
 0x35d   :  { %3332 = vmatprep.subr.bf16.mxu0 %v8995_v23  ;;  %3414 = vmatprep.subr.bf16.mxu1 %v8998_v25  ;;  %v9098_v23 = vld [vmem:[%s12480_s13 + $0x4] ss:$16 sps:$4 sm:$0x1f]   ;;  %v9100_v25 = vld [vmem:[%s12480_s13] ss:$16 sps:$4 sm:$0x1f]  }
 0x360   :  { %3333 = vmatpush1.bf16.msra.mxu0 %v8993_v27  ;;  %3415 = vmatpush1.bf16.msra.mxu1 %v8996_v9  ;;  %v9101_v27 = vld [vmem:[%s12480_s13 + $0xc] ss:$16 sps:$4 sm:$0x1f]   ;;  %v9103_v9 = vld [vmem:[%s12480_s13 + $0x8] ss:$16 sps:$4 sm:$0x1f]  }
 0x361   :  { %3334 = vmatprep.subr.bf16.mxu0 %v9001_v28  ;;  %3416 = vmatprep.subr.bf16.mxu1 %v9004_v29  ;;  %v3913_v28 = vsel %vm420_vm0, %v9100_v25, 0  ;;  %v3919_v29 = vsel %vm420_vm0, %v9103_v9, 0  ;;  %v9119_v25 = vld [vmem:[%s12479_s12 + $0xa0] ss:$16 sps:$4 sm:$0xff]  }
 0x362   :  { %v9122_v9 = vld [vmem:[%s12479_s12 + $0xc0] ss:$16 sps:$4 sm:$0xff]  }
 0x364   :  { %3335 = vmatpush1.bf16.msra.mxu0 %v8999_v11  ;;  %3417 = vmatpush1.bf16.msra.mxu1 %v9002_v30  ;;  %v9106_v11 = vld [vmem:[%s12479_s12 + $0x4] ss:$16 sps:$4 sm:$0xff]   ;;  %v9104_v30 = vld [vmem:[%s12479_s12] ss:$16 sps:$4 sm:$0xff]  }
 0x365   :  { %3336 = vmatprep.subr.bf16.mxu0 %v9007_v31  ;;  %3418 = vmatprep.subr.bf16.mxu1 %v9010_v32  ;;  %v9109_v31 = vld [vmem:[%s12479_s12 + $0x24] ss:$16 sps:$4 sm:$0xff]   ;;  %v9107_v32 = vld [vmem:[%s12479_s12 + $0x20] ss:$16 sps:$4 sm:$0xff]  }
 0x368   :  { %3337 = vmatpush1.bf16.msra.mxu0 %v9005_v33  ;;  %3419 = vmatpush1.bf16.msra.mxu1 %v9008_v34  ;;  %v2758_v33 = vld [vmem:[#allocation10] sm:$0xf] }
 0x369   :  { %3338 = vmatprep.subr.bf16.mxu0 %v9013_v36  ;;  %3420 = vmatprep.subr.bf16.mxu1 %v9016_v37  ;;  %v2763_v34 = vrot.slane %v2758_v33, %v11084_v54  ;;  %v2767_v35 = vrot.slane %v2758_v33, %v11087_v14  ;;  %v2775_v36 = vrot.slane %v2758_v33, %v11207_v24 }
 0x36c   :  { %3339 = vmatpush1.bf16.msra.mxu0 %v9011_v38  ;;  %3421 = vmatpush1.bf16.msra.mxu1 %v9014_v40 }
 0x36d   :  { %3340 = vmatprep.subr.bf16.mxu0 %v9019_v26  ;;  %3422 = vmatprep.subr.bf16.mxu1 %v9022_v41 }
 0x370   :  { %3341 = vmatpush1.bf16.msra.mxu0 %v9017_v42  ;;  %3423 = vmatpush1.bf16.msra.mxu1 %v9020_v43 }
 0x371   :  { %3770 = vmatprep.subr.bf16.mxu0 %v9025_v45  ;;  %7889 = vmatprep.subr.msk.bf16.mxu1 %vm420_vm0, %v9098_v23  ;;  %v9121_v23 = vld [vmem:[%s12479_s12 + $0xa4] ss:$16 sps:$4 sm:$0xff]  }
 0x373   :  { %3357 = vmatmul.mubr.bf16.vlgmr.msra.gmra.mrb[28].mxu0 %v2656_v46  ;;  %3439 = vmatmul.mubr.bf16.vlgmr.msra.gmra.mrb[20].mxu1 %v2656_v46 }
 0x374   :  { %3771 = vmatpush1.bf16.msra.mxu0 %v9023_v39  ;;  %3956 = vmatprep.mubr.bf16.mxu1 %v9999_v0 }
 0x375   :  { %3772 = vmatprep.subr.bf16.mxu0 %v9028_v47  ;;  %3925 = vmatpush1.bf16.msra.mxu1 %v3913_v28  ;;  %v9127_v28 = vld [vmem:[%s12479_s12 + $0xe4] ss:$16 sps:$4 sm:$0xff]  }
 0x376   :  { %7891 = vmatprep.subr.msk.bf16.mxu1 %vm420_vm0, %v9101_v27  ;;  %v9124_v27 = vld [vmem:[%s12479_s12 + $0xc4] ss:$16 sps:$4 sm:$0xff]  }
 0x378   :  { %3773 = vmatpush1.bf16.msra.mxu0 %v9026_v52 }
 0x379   :  { %3774 = vmatprep.subr.bf16.mxu0 %v9031_v12  ;;  %v9071_v12 = vld [vmem:[%s12477_s10 + $0x100] ss:$8 sps:$4 sm:$0xff]  }
 0x37b   :  { %7890 = vmatmul.mubr.msk.bf16.vlgmr.msra.gmra.mrb[24].mxu1 %vm416_vm1, %v10246_v8 }
 0x37c   :  { %3775 = vmatpush1.bf16.msra.mxu0 %v9029_v48  ;;  %3966 = vmatpush1.bf16.msra.mxu1 %v3919_v29  ;;  %v9125_v29 = vld [vmem:[%s12479_s12 + $0xe0] ss:$16 sps:$4 sm:$0xff]  }
 0x37d   :  { %3776 = vmatprep.subr.bf16.mxu0 %v9034_v49  ;;  %3997 = vmatprep.mubr.bf16.mxu1 %v9999_v0  ;;  %v9076_v49 = vld [vmem:[%s12477_s10 + $0x114] ss:$8 sps:$4 sm:$0xff]  }
 0x37e   :  { %4166 = vmatprep.subr.bf16.mxu1 %v9106_v11  ;;  %v9130_v11 = vld [vmem:[%s12479_s12 + $0xc] ss:$16 sps:$4 sm:$0xff]  }
 0x380   :  { %3777 = vmatpush1.bf16.msra.mxu0 %v9032_v50 }
 0x381   :  { %3778 = vmatprep.subr.bf16.mxu0 %v9037_v51  ;;  %v9074_v51 = vld [vmem:[%s12477_s10 + $0x110] ss:$8 sps:$4 sm:$0xff]  }
 0x383   :  { %7892 = vmatmul.mubr.msk.bf16.vlgmr.msra.gmra.mrb[28].mxu1 %vm416_vm1, %v10246_v8 }
 0x384   :  { %3779 = vmatpush1.bf16.msra.mxu0 %v9035_v53  ;;  %4167 = vmatpush1.bf16.msra.mxu1 %v9104_v30  ;;  %v9079_v53 = vld [vmem:[%s12477_s10 + $0x124] ss:$8 sps:$4 sm:$0xff]  }
 0x385   :  { %3780 = vmatprep.subr.bf16.mxu0 %v9040_v55  ;;  %4198 = vmatprep.mubr.bf16.mxu1 %v9999_v0  ;;  %v9077_v55 = vld [vmem:[%s12477_s10 + $0x120] ss:$8 sps:$4 sm:$0xff]   ;;  %v9155_v30 = vld [vmem:[#allocation11 + $0x8] ss:$16 sps:$4 sm:$0xff]  }
 0x386   :  { %4168 = vmatprep.subr.bf16.mxu1 %v9109_v31  ;;  %v9157_v31 = vld [vmem:[#allocation11 + $0xc] ss:$16 sps:$4 sm:$0xff]  }
 0x388   :  { %3781 = vmatpush1.bf16.msra.mxu0 %v9038_v20  ;;  %4169 = vmatpush1.bf16.msra.mxu1 %v9107_v32  ;;  %v9082_v20 = vld [vmem:[%s12477_s10 + $0x134] ss:$8 sps:$4 sm:$0xff]   ;;  %v9163_v32 = vld [vmem:[#allocation11 + $0x2c] ss:$16 sps:$4 sm:$0xff]  }
 0x389   :  { %3782 = vmatprep.subr.bf16.mxu0 %v9043_v57  ;;  %v9080_v57 = vld [vmem:[%s12477_s10 + $0x130] ss:$8 sps:$4 sm:$0xff]  }
 0x38c   :  { %3783 = vmatpush1.bf16.msra.mxu0 %v9041_v58  ;;  %v9085_v58 = vld [vmem:[%s12477_s10 + $0x144] ss:$8 sps:$4 sm:$0xff]  }
 0x38d   :  { %3784 = vmatprep.subr.bf16.mxu0 %v9046_v59  ;;  %v9083_v59 = vld [vmem:[%s12477_s10 + $0x140] ss:$8 sps:$4 sm:$0xff]  }
 0x390   :  { %3785 = vmatpush1.bf16.msra.mxu0 %v9044_v60  ;;  %v9088_v60 = vld [vmem:[%s12477_s10 + $0x154] ss:$8 sps:$4 sm:$0xff]  }
 0x391   :  { %3786 = vmatprep.subr.bf16.mxu0 %v9049_v61  ;;  %v9086_v61 = vld [vmem:[%s12477_s10 + $0x150] ss:$8 sps:$4 sm:$0xff]  }
 0x394   :  { %3787 = vmatpush1.bf16.msra.mxu0 %v9047_v62  ;;  %v9091_v62 = vld [vmem:[%s12477_s10 + $0x164] ss:$8 sps:$4 sm:$0xff]  }
 0x395   :  { %3788 = vmatprep.subr.bf16.mxu0 %v9052_v63  ;;  %v9089_v63 = vld [vmem:[%s12477_s10 + $0x160] ss:$8 sps:$4 sm:$0xff]  }
 0x398   :  { %3789 = vmatpush1.bf16.msra.mxu0 %v9050_v2  ;;  %v2771_v2 = vrot.slane %v2758_v33, %v11204_v22  ;;  %v9161_v33 = vld [vmem:[#allocation11 + $0x28] ss:$16 sps:$4 sm:$0xff]  }
 0x399   :  { %3790 = vmatprep.subr.bf16.mxu0 %v9055_v3  ;;  %v9094_v3 = vld [vmem:[%s12477_s10 + $0x174] ss:$8 sps:$4 sm:$0xff]  }
 0x39c   :  { %3791 = vmatpush1.bf16.msra.mxu0 %v9053_v5  ;;  %v9092_v5 = vld [vmem:[%s12477_s10 + $0x170] ss:$8 sps:$4 sm:$0xff]  }
 0x39d   :  { %3792 = vmatprep.subr.bf16.mxu0 %v9058_v7 }
 0x3a0   :  { %3793 = vmatpush1.bf16.msra.mxu0 %v9056_v10  ;;  %v9097_v10 = vld [vmem:[%s12477_s10 + $0x184] ss:$8 sps:$4 sm:$0xff]  }
 0x3a1   :  { %3794 = vmatprep.subr.bf16.mxu0 %v9061_v56  ;;  %v9095_v56 = vld [vmem:[%s12477_s10 + $0x180] ss:$8 sps:$4 sm:$0xff]  }
 0x3a4   :  { %3795 = vmatpush1.bf16.msra.mxu0 %v9059_v15 }
 0x3a5   :  { %3796 = vmatprep.subr.bf16.mxu0 %v9064_v16 }
 0x3a8   :  { %3797 = vmatpush1.bf16.msra.mxu0 %v9062_v17  ;;  %v9112_v17 = vld [vmem:[%s12479_s12 + $0x44] ss:$16 sps:$4 sm:$0xff]  }
 0x3a9   :  { %3798 = vmatprep.subr.bf16.mxu0 %v9067_v1  ;;  %v9110_v1 = vld [vmem:[%s12479_s12 + $0x40] ss:$16 sps:$4 sm:$0xff]   ;;  %4170 = vmatprep.subr.bf16.mxu1 %v9112_v17 }
 0x3aa   :  { %4171 = vmatpush1.bf16.msra.mxu1 %v9110_v1 }
 0x3ac   :  { %3799 = vmatpush1.bf16.msra.mxu0 %v9065_v18  ;;  %v9115_v18 = vld [vmem:[%s12479_s12 + $0x64] ss:$16 sps:$4 sm:$0xff]  }
 0x3ad   :  { %3800 = vmatprep.subr.bf16.mxu0 %v9070_v19  ;;  %v9113_v19 = vld [vmem:[%s12479_s12 + $0x60] ss:$16 sps:$4 sm:$0xff]   ;;  %4172 = vmatprep.subr.bf16.mxu1 %v9115_v18 }
 0x3ae   :  { %4173 = vmatpush1.bf16.msra.mxu1 %v9113_v19  ;;  %v199_v18 = vld [vmem:[%s12512_s28] sm:$0xff] }
 0x3b0   :  { %3801 = vmatpush1.bf16.msra.mxu0 %v9068_v4  ;;  %v9118_v4 = vld [vmem:[%s12479_s12 + $0x84] ss:$16 sps:$4 sm:$0xff]  }
 0x3b1   :  { %3811 = vmatprep.subr.bf16.mxu0 %v9073_v21  ;;  %v9116_v21 = vld [vmem:[%s12479_s12 + $0x80] ss:$16 sps:$4 sm:$0xff]   ;;  %4174 = vmatprep.subr.bf16.mxu1 %v9118_v4 }
 0x3b2   :  { %4175 = vmatpush1.bf16.msra.mxu1 %v9116_v21 }
 0x3b3   :  { %4176 = vmatprep.subr.bf16.mxu1 %v9121_v23  ;;  %v9128_v23 = vld [vmem:[%s12479_s12 + $0x8] ss:$16 sps:$4 sm:$0xff]  }
 0x3b6   :  { %4177 = vmatpush1.bf16.msra.mxu1 %v9119_v25 }
 0x3b7   :  { %4178 = vmatprep.subr.bf16.mxu1 %v9124_v27  ;;  %v9133_v27 = vld [vmem:[%s12479_s12 + $0x2c] ss:$16 sps:$4 sm:$0xff]  }
 0x3ba   :  { %4179 = vmatpush1.bf16.msra.mxu1 %v9122_v9  ;;  %v9131_v9 = vld [vmem:[%s12479_s12 + $0x28] ss:$16 sps:$4 sm:$0xff]  }
 0x3bb   :  { %4180 = vmatprep.subr.bf16.mxu1 %v9127_v28  ;;  %v9136_v28 = vld [vmem:[%s12479_s12 + $0x4c] ss:$16 sps:$4 sm:$0xff]  }
 0x3be   :  { %4181 = vmatpush1.bf16.msra.mxu1 %v9125_v29  ;;  %v9134_v29 = vld [vmem:[%s12479_s12 + $0x48] ss:$16 sps:$4 sm:$0xff]  }
 0x3bf   :  { %4207 = vmatprep.subr.bf16.mxu1 %v9130_v11  ;;  %v9139_v11 = vld [vmem:[%s12479_s12 + $0x6c] ss:$16 sps:$4 sm:$0xff]  }
 0x446   :  { %v3358_v37 = vpop.f32.mrb[28].mxu0  ;;  %v3440_v38 = vpop.f32.mrb[20].mxu1 }
 0x447   :  { %v8341_v40 = vadd.f32 %v3358_v37, %v2763_v34  ;;  %v3360_v8 = vpop.f32.mrb[29].mxu0  ;;  %v3442_v13 = vpop.f32.mrb[21].mxu1  ;;  %v8343_v7 = vadd.f32 %v3440_v38, %v2771_v2  ;;  %v9169_v34 = vld [vmem:[#allocation11 + $0x4c] ss:$16 sps:$4 sm:$0xff]   ;;  %v9173_v38 = vld [vmem:[#allocation11 + $0x68] ss:$16 sps:$4 sm:$0xff]  }
 0x448   :  { %v8342_v26 = vadd.f32 %v3360_v8, %v2767_v35  ;;  %v8344_v41 = vadd.f32 %v3442_v13, %v2775_v36  ;;  %v3362_v42 = vpop.f32.mrb[30].mxu0  ;;  %v3444_v43 = vpop.f32.mrb[22].mxu1  ;;  %v9167_v35 = vld [vmem:[#allocation11 + $0x48] ss:$16 sps:$4 sm:$0xff]   ;;  %v9175_v36 = vld [vmem:[#allocation11 + $0x6c] ss:$16 sps:$4 sm:$0xff]  }
 0x449   :  { %v3447_v44 = vmax.f32 %v8341_v40, 0.0  ;;  %v3363_v45 = vpop.f32.mrb[31].mxu0  ;;  %v3445_v39 = vpop.f32.mrb[23].mxu1  ;;  %v3449_v15 = vmax.f32 %v8343_v7, 0.0  ;;  %v9181_v13 = vld [vmem:[#allocation11 + $0x8c] ss:$16 sps:$4 sm:$0xff]  }
 0x44a   :  { %v3448_v46 = vmax.f32 %v8342_v26, 0.0  ;;  %v3450_v47 = vmax.f32 %v8344_v41, 0.0  ;;  %v9179_v41 = vld [vmem:[#allocation11 + $0x88] ss:$16 sps:$4 sm:$0xff]   ;;  %v9187_v42 = vld [vmem:[#allocation11 + $0xac] ss:$16 sps:$4 sm:$0xff]  }
 0x44b   :  { %v3451_v48 = vpack.c.bf16 %v3447_v44, %v3447_v44  ;;  %v3453_v16 = vpack.c.bf16 %v3449_v15, %v3449_v15  ;;  %v9185_v44 = vld [vmem:[#allocation11 + $0xa8] ss:$16 sps:$4 sm:$0xff]  }
 0x44c   :  { %v3452_v52 = vpack.c.bf16 %v3448_v46, %v3448_v46  ;;  %v3454_v50 = vpack.c.bf16 %v3450_v47, %v3450_v47  ;;  %v9193_v46 = vld [vmem:[#allocation11 + $0xcc] ss:$16 sps:$4 sm:$0xff]  }
 0x44e   :  { %3802 = vmatprep.mubr.bf16.mxu0 %v3452_v52  ;;  %v11753_v37 = vpop.f32.mrb[24].mxu1  ;;  %v9191_v52 = vld [vmem:[#allocation11 + $0xc8] ss:$16 sps:$4 sm:$0xff]  }
 0x44f   :  { %3803 = vmatmul.mubr.bf16.vlgmr.msra.gmra.mrb[32].mxu0 %v3451_v48  ;;  %v11755_v40 = vpop.f32.mrb[25].mxu1  ;;  %v9197_v48 = vld [vmem:[#allocation11 + $0xe8] ss:$16 sps:$4 sm:$0xff]  }
 0x450   :  { %3812 = vmatpush1.bf16.msra.mxu0 %v9071_v12  ;;  %7884 = vmatprep.mubr.msk.bf16.mxu0 %vm1495_vm2, %v3454_v50  ;;  %v3962_v8 = vpop.f32.mrb[26].mxu1  ;;  %v9199_v12 = vld [vmem:[#allocation11 + $0xec] ss:$16 sps:$4 sm:$0xff]   ;;  %v9203_v50 = vld [vmem:[#allocation11 + $0x108] ss:$16 sps:$4 sm:$0xff]  }
 0x451   :  { %3813 = vmatprep.subr.bf16.mxu0 %v9076_v49  ;;  %v3963_v26 = vpop.f32.mrb[27].mxu1  ;;  %v9205_v49 = vld [vmem:[#allocation11 + $0x10c] ss:$16 sps:$4 sm:$0xff]   ;;  %v9149_v8 = vld [vmem:[%s12479_s12 + $0xe8] ss:$16 sps:$4 sm:$0xff]  }
 0x452   :  { %v9152_v26 = vld [vmem:[#allocation11] ss:$16 sps:$4 sm:$0xff]  }
 0x454   :  { %3814 = vmatpush1.bf16.msra.mxu0 %v9074_v51  ;;  %v9211_v51 = vld [vmem:[#allocation11 + $0x12c] ss:$16 sps:$4 sm:$0xff]  }
 0x455   :  { %3815 = vmatprep.subr.bf16.mxu0 %v9079_v53  ;;  %v9209_v53 = vld [vmem:[#allocation11 + $0x128] ss:$16 sps:$4 sm:$0xff]  }
 0x456   :  { %v11757_v43 = vpop.f32.mrb[28].mxu1 }
 0x457   :  { %v11759_v45 = vpop.f32.mrb[29].mxu1 }
 0x458   :  { %3816 = vmatpush1.bf16.msra.mxu0 %v9077_v55  ;;  %v4003_v39 = vpop.f32.mrb[30].mxu1  ;;  %v9217_v55 = vld [vmem:[#allocation11 + $0x14c] ss:$16 sps:$4 sm:$0xff]  }
 0x459   :  { %3817 = vmatprep.subr.bf16.mxu0 %v9082_v20  ;;  %v4004_v47 = vpop.f32.mrb[31].mxu1  ;;  %v9215_v20 = vld [vmem:[#allocation11 + $0x148] ss:$16 sps:$4 sm:$0xff]   ;;  %v9164_v39 = vld [vmem:[#allocation11 + $0x40] ss:$16 sps:$4 sm:$0xff]  }
 0x45a   :  { %v9170_v47 = vld [vmem:[#allocation11 + $0x60] ss:$16 sps:$4 sm:$0xff]  }
 0x45c   :  { %3818 = vmatpush1.bf16.msra.mxu0 %v9080_v57  ;;  %v9223_v57 = vld [vmem:[#allocation11 + $0x16c] ss:$16 sps:$4 sm:$0xff]  }
 0x45d   :  { %3819 = vmatprep.subr.bf16.mxu0 %v9085_v58  ;;  %v9221_v58 = vld [vmem:[#allocation11 + $0x168] ss:$16 sps:$4 sm:$0xff]  }
 0x460   :  { %3820 = vmatpush1.bf16.msra.mxu0 %v9083_v59  ;;  %v9229_v59 = vld [vmem:[#allocation11 + $0x18c] ss:$16 sps:$4 sm:$0xff]  }
 0x461   :  { %3821 = vmatprep.subr.bf16.mxu0 %v9088_v60  ;;  %v9227_v60 = vld [vmem:[#allocation11 + $0x188] ss:$16 sps:$4 sm:$0xff]  }
 0x464   :  { %3822 = vmatpush1.bf16.msra.mxu0 %v9086_v61  ;;  %v9235_v61 = vld [vmem:[#allocation11 + $0x1ac] ss:$16 sps:$4 sm:$0xff]  }
 0x465   :  { %3823 = vmatprep.subr.bf16.mxu0 %v9091_v62  ;;  %v9233_v62 = vld [vmem:[#allocation11 + $0x1a8] ss:$16 sps:$4 sm:$0xff]  }
 0x468   :  { %3824 = vmatpush1.bf16.msra.mxu0 %v9089_v63  ;;  %v3505_v63 = vld [vmem:[%s12478_s11] sm:$0x3] }
 0x469   :  { %3825 = vmatprep.subr.bf16.mxu0 %v9094_v3  ;;  %v3510_v2 = vrot.slane %v3505_v63, %v11084_v54  ;;  %v3514_v3 = vrot.slane %v3505_v63, %v11087_v14  ;;  %v9218_v63 = vld [vmem:[#allocation11 + $0x160] ss:$16 sps:$4 sm:$0xff]  }
 0x46c   :  { %3826 = vmatpush1.bf16.msra.mxu0 %v9092_v5 }
 0x46d   :  { %3827 = vmatprep.subr.bf16.mxu0 %v9097_v10 }
 0x470   :  { %3828 = vmatpush1.bf16.msra.mxu0 %v9095_v56 }
 0x471   :  { %4989 = vmatprep.subr.bf16.mxu0 %v9157_v31  ;;  %v9142_v31 = vld [vmem:[%s12479_s12 + $0x8c] ss:$16 sps:$4 sm:$0xff]  }
 0x473   :  { %3844 = vmatmul.mubr.bf16.vlgmr.msra.gmra.mrb[32].mxu0 %v3453_v16 }
 0x474   :  { %4990 = vmatpush1.bf16.msra.mxu0 %v9155_v30  ;;  %v9137_v30 = vld [vmem:[%s12479_s12 + $0x68] ss:$16 sps:$4 sm:$0xff]  }
 0x475   :  { %4991 = vmatprep.subr.bf16.mxu0 %v9163_v32  ;;  %v9140_v32 = vld [vmem:[%s12479_s12 + $0x88] ss:$16 sps:$4 sm:$0xff]  }
 0x478   :  { %4992 = vmatpush1.bf16.msra.mxu0 %v9161_v33  ;;  %v9145_v33 = vld [vmem:[%s12479_s12 + $0xac] ss:$16 sps:$4 sm:$0xff]  }
 0x479   :  { %4993 = vmatprep.subr.bf16.mxu0 %v9169_v34  ;;  %v9143_v34 = vld [vmem:[%s12479_s12 + $0xa8] ss:$16 sps:$4 sm:$0xff]  }
 0x47c   :  { %4994 = vmatpush1.bf16.msra.mxu0 %v9167_v35  ;;  %v9148_v35 = vld [vmem:[%s12479_s12 + $0xcc] ss:$16 sps:$4 sm:$0xff]  }
 0x47d   :  { %4995 = vmatprep.subr.bf16.mxu0 %v9175_v36  ;;  %v9146_v36 = vld [vmem:[%s12479_s12 + $0xc8] ss:$16 sps:$4 sm:$0xff]  }
 0x480   :  { %4996 = vmatpush1.bf16.msra.mxu0 %v9173_v38  ;;  %v9151_v38 = vld [vmem:[%s12479_s12 + $0xec] ss:$16 sps:$4 sm:$0xff]  }
 0x481   :  { %4997 = vmatprep.subr.bf16.mxu0 %v9181_v13  ;;  %v9154_v13 = vld [vmem:[#allocation11 + $0x4] ss:$16 sps:$4 sm:$0xff]  }
 0x484   :  { %4998 = vmatpush1.bf16.msra.mxu0 %v9179_v41  ;;  %v9160_v41 = vld [vmem:[#allocation11 + $0x24] ss:$16 sps:$4 sm:$0xff]  }
 0x485   :  { %4999 = vmatprep.subr.bf16.mxu0 %v9187_v42  ;;  %v9158_v42 = vld [vmem:[#allocation11 + $0x20] ss:$16 sps:$4 sm:$0xff]  }
 0x488   :  { %5000 = vmatpush1.bf16.msra.mxu0 %v9185_v44  ;;  %v9166_v44 = vld [vmem:[#allocation11 + $0x44] ss:$16 sps:$4 sm:$0xff]  }
 0x489   :  { %5001 = vmatprep.subr.bf16.mxu0 %v9193_v46  ;;  %v9172_v46 = vld [vmem:[#allocation11 + $0x64] ss:$16 sps:$4 sm:$0xff]  }
 0x48c   :  { %5002 = vmatpush1.bf16.msra.mxu0 %v9191_v52  ;;  %v9178_v52 = vld [vmem:[#allocation11 + $0x84] ss:$16 sps:$4 sm:$0xff]  }
 0x48d   :  { %5003 = vmatprep.subr.bf16.mxu0 %v9199_v12  ;;  %v9176_v12 = vld [vmem:[#allocation11 + $0x80] ss:$16 sps:$4 sm:$0xff]  }
 0x490   :  { %5004 = vmatpush1.bf16.msra.mxu0 %v9197_v48  ;;  %v9184_v48 = vld [vmem:[#allocation11 + $0xa4] ss:$16 sps:$4 sm:$0xff]  }
 0x491   :  { %5005 = vmatprep.subr.bf16.mxu0 %v9205_v49  ;;  %v9182_v49 = vld [vmem:[#allocation11 + $0xa0] ss:$16 sps:$4 sm:$0xff]  }
 0x494   :  { %5006 = vmatpush1.bf16.msra.mxu0 %v9203_v50  ;;  %v9190_v50 = vld [vmem:[#allocation11 + $0xc4] ss:$16 sps:$4 sm:$0xff]  }
 0x495   :  { %5007 = vmatprep.subr.bf16.mxu0 %v9211_v51  ;;  %v9188_v51 = vld [vmem:[#allocation11 + $0xc0] ss:$16 sps:$4 sm:$0xff]  }
 0x498   :  { %5008 = vmatpush1.bf16.msra.mxu0 %v9209_v53  ;;  %v9196_v53 = vld [vmem:[#allocation11 + $0xe4] ss:$16 sps:$4 sm:$0xff]  }
 0x499   :  { %5009 = vmatprep.subr.bf16.mxu0 %v9217_v55  ;;  %v9194_v55 = vld [vmem:[#allocation11 + $0xe0] ss:$16 sps:$4 sm:$0xff]  }
 0x49c   :  { %5010 = vmatpush1.bf16.msra.mxu0 %v9215_v20  ;;  %v9202_v20 = vld [vmem:[#allocation11 + $0x104] ss:$16 sps:$4 sm:$0xff]  }
 0x49d   :  { %5011 = vmatprep.subr.bf16.mxu0 %v9223_v57  ;;  %v9200_v57 = vld [vmem:[#allocation11 + $0x100] ss:$16 sps:$4 sm:$0xff]  }
 0x4a0   :  { %5012 = vmatpush1.bf16.msra.mxu0 %v9221_v58  ;;  %v9208_v58 = vld [vmem:[#allocation11 + $0x124] ss:$16 sps:$4 sm:$0xff]  }
 0x4a1   :  { %5013 = vmatprep.subr.bf16.mxu0 %v9229_v59  ;;  %v9206_v59 = vld [vmem:[#allocation11 + $0x120] ss:$16 sps:$4 sm:$0xff]  }
 0x4a4   :  { %5014 = vmatpush1.bf16.msra.mxu0 %v9227_v60  ;;  %v9214_v60 = vld [vmem:[#allocation11 + $0x144] ss:$16 sps:$4 sm:$0xff]  }
 0x4a5   :  { %5015 = vmatprep.subr.bf16.mxu0 %v9235_v61  ;;  %v9212_v61 = vld [vmem:[#allocation11 + $0x140] ss:$16 sps:$4 sm:$0xff]  }
 0x4a8   :  { %5016 = vmatpush1.bf16.msra.mxu0 %v9233_v62  ;;  %v9220_v62 = vld [vmem:[#allocation11 + $0x164] ss:$16 sps:$4 sm:$0xff]  }
 0x546   :  { %v3845_v5 = vpop.f32.mrb[32].mxu0 }
 0x547   :  { %v8345_v7 = vadd.f32 %v3845_v5, %v3510_v2  ;;  %v3847_v10 = vpop.f32.mrb[33].mxu0  ;;  %v9226_v2 = vld [vmem:[#allocation11 + $0x184] ss:$16 sps:$4 sm:$0xff]  }
 0x548   :  { %v8346_v56 = vadd.f32 %v3847_v10, %v3514_v3  ;;  %v3849_v15 = vpop.f32.mrb[34].mxu0  ;;  %v9224_v3 = vld [vmem:[#allocation11 + $0x180] ss:$16 sps:$4 sm:$0xff]   ;;  %v9232_v5 = vld [vmem:[#allocation11 + $0x1a4] ss:$16 sps:$4 sm:$0xff]  }
 0x549   :  { %3852 = vst [vmem:[#allocation18] sm:$0xff] %v8345_v7  ;;  %v3850_v16 = vpop.f32.mrb[35].mxu0  ;;  %v9238_v10 = vld [vmem:[#allocation11 + $0x1c4] ss:$16 sps:$4 sm:$0xff]   ;;  %v9236_v15 = vld [vmem:[#allocation11 + $0x1c0] ss:$16 sps:$4 sm:$0xff]  }
 0x54a   :  { %3853 = vst [vmem:[#allocation18 + $0x8] sm:$0xff] %v8346_v56  ;;  %v3854_v17 = vmul.f32 0.5, %v8346_v56  ;;  %v9241_v56 = vld [vmem:[#allocation11 + $0x1cc] ss:$16 sps:$4 sm:$0xff]   ;;  %v9239_v16 = vld [vmem:[#allocation11 + $0x1c8] ss:$16 sps:$4 sm:$0xff]  }
 0x54b   :  { %5017 = vmatprep.subr.bf16.mxu0 %v9241_v56  ;;  %v9295_v56 = vld [vmem:[#allocation11 + $0x2ec] ss:$16 sps:$4 sm:$0xff]  }
 0x54c   :  { %v3855_v1 = vmul.f32 1.442695, %v3854_v17  ;;  %5018 = vmatpush1.bf16.msra.mxu0 %v9239_v16  ;;  %v9244_v17 = vld [vmem:[#allocation11 + $0x1e4] ss:$16 sps:$4 sm:$0xff]  }
 0x54e   :  { %9702 = vpow2.f32 %v3855_v1  ;;  %v9247_v1 = vld [vmem:[#allocation11 + $0x1ec] ss:$16 sps:$4 sm:$0xff]  }
 0x54f   :  { %5019 = vmatprep.subr.bf16.mxu0 %v9247_v1 }
 0x558   :  { %v9703_v19 = vpop.eup %9702 }
 0x559   :  { %v3857_v4 = vmul.f32 %v9703_v19, %v199_v18  ;;  %v9242_v18 = vld [vmem:[#allocation11 + $0x1e0] ss:$16 sps:$4 sm:$0xff]   ;;  %v9245_v19 = vld [vmem:[#allocation11 + $0x1e8] ss:$16 sps:$4 sm:$0xff]  }
 0x55a   :  { %5020 = vmatpush1.bf16.msra.mxu0 %v9245_v19  ;;  %v9293_v19 = vld [vmem:[#allocation11 + $0x2e8] ss:$16 sps:$4 sm:$0xff]  }
 0x55b   :  { %v3858_v21 = vadd.f32 %v8345_v7, %v3857_v4  ;;  %v9230_v7 = vld [vmem:[#allocation11 + $0x1a0] ss:$16 sps:$4 sm:$0xff]   ;;  %v9250_v4 = vld [vmem:[#allocation11 + $0x204] ss:$16 sps:$4 sm:$0xff]  }
 0x55d   :  { %v3859_v25 = vpack.c.bf16 %v3858_v21, %v3858_v21  ;;  %v9253_v21 = vld [vmem:[#allocation11 + $0x20c] ss:$16 sps:$4 sm:$0xff]  }
 0x55e   :  { %5030 = vmatprep.subr.bf16.mxu0 %v9253_v21  ;;  %v9301_v21 = vld [vmem:[#allocation11 + $0x30c] ss:$16 sps:$4 sm:$0xff]  }
 0x55f   :  { %4199 = vmatmul.mubr.bf16.vlgmr.msra.gmra.mrb[32].mxu1 %v3859_v25 }
 0x560   :  { %4208 = vmatpush1.bf16.msra.mxu1 %v9128_v23  ;;  %4239 = vmatprep.mubr.bf16.mxu1 %v9999_v0  ;;  %v11818_v23 = vld [vmem:[%s12481_s14] sm:$0xf] }
 0x561   :  { %4209 = vmatprep.subr.bf16.mxu1 %v9133_v27 }
 0x564   :  { %4210 = vmatpush1.bf16.msra.mxu1 %v9131_v9  ;;  %v4257_v9 = vrot.slane %v11818_v23, %v11087_v14 }
 0x565   :  { %4211 = vmatprep.subr.bf16.mxu1 %v9136_v28 }
 0x568   :  { %4212 = vmatpush1.bf16.msra.mxu1 %v9134_v29 }
 0x569   :  { %4213 = vmatprep.subr.bf16.mxu1 %v9139_v11 }
 0x56c   :  { %4214 = vmatpush1.bf16.msra.mxu1 %v9137_v30 }
 0x56d   :  { %4215 = vmatprep.subr.bf16.mxu1 %v9142_v31 }
 0x570   :  { %4216 = vmatpush1.bf16.msra.mxu1 %v9140_v32 }
 0x571   :  { %4217 = vmatprep.subr.bf16.mxu1 %v9145_v33 }
 0x574   :  { %4218 = vmatpush1.bf16.msra.mxu1 %v9143_v34 }
 0x575   :  { %4219 = vmatprep.subr.bf16.mxu1 %v9148_v35 }
 0x578   :  { %4220 = vmatpush1.bf16.msra.mxu1 %v9146_v36 }
 0x579   :  { %4221 = vmatprep.subr.bf16.mxu1 %v9151_v38  ;;  %v9248_v38 = vld [vmem:[#allocation11 + $0x200] ss:$16 sps:$4 sm:$0xff]  }
 0x57c   :  { %4222 = vmatpush1.bf16.msra.mxu1 %v9149_v8  ;;  %v9251_v8 = vld [vmem:[#allocation11 + $0x208] ss:$16 sps:$4 sm:$0xff]  }
 0x57d   :  { %4907 = vmatprep.subr.bf16.mxu1 %v9154_v13 }
 0x57f   :  { %4240 = vmatmul.mubr.bf16.vlgmr.msra.gmra.mrb[36].mxu1 %v3859_v25  ;;  %v4253_v25 = vrot.slane %v11818_v23, %v11084_v54 }
 0x580   :  { %4908 = vmatpush1.bf16.msra.mxu1 %v9152_v26  ;;  %v9256_v26 = vld [vmem:[#allocation11 + $0x224] ss:$16 sps:$4 sm:$0xff]  }
 0x581   :  { %4909 = vmatprep.subr.bf16.mxu1 %v9160_v41  ;;  %v9259_v41 = vld [vmem:[#allocation11 + $0x22c] ss:$16 sps:$4 sm:$0xff]  }
 0x584   :  { %4910 = vmatpush1.bf16.msra.mxu1 %v9158_v42  ;;  %v9262_v42 = vld [vmem:[#allocation11 + $0x244] ss:$16 sps:$4 sm:$0xff]  }
 0x585   :  { %4911 = vmatprep.subr.bf16.mxu1 %v9166_v44  ;;  %v9265_v44 = vld [vmem:[#allocation11 + $0x24c] ss:$16 sps:$4 sm:$0xff]  }
 0x588   :  { %4912 = vmatpush1.bf16.msra.mxu1 %v9164_v39  ;;  %v9260_v39 = vld [vmem:[#allocation11 + $0x240] ss:$16 sps:$4 sm:$0xff]  }
 0x589   :  { %4913 = vmatprep.subr.bf16.mxu1 %v9172_v46  ;;  %v9263_v46 = vld [vmem:[#allocation11 + $0x248] ss:$16 sps:$4 sm:$0xff]  }
 0x58c   :  { %4914 = vmatpush1.bf16.msra.mxu1 %v9170_v47  ;;  %v9268_v47 = vld [vmem:[#allocation11 + $0x264] ss:$16 sps:$4 sm:$0xff]  }
 0x58d   :  { %4915 = vmatprep.subr.bf16.mxu1 %v9178_v52  ;;  %v9271_v52 = vld [vmem:[#allocation11 + $0x26c] ss:$16 sps:$4 sm:$0xff]  }
 0x590   :  { %4916 = vmatpush1.bf16.msra.mxu1 %v9176_v12  ;;  %v9266_v12 = vld [vmem:[#allocation11 + $0x260] ss:$16 sps:$4 sm:$0xff]  }
 0x591   :  { %4917 = vmatprep.subr.bf16.mxu1 %v9184_v48  ;;  %v9269_v48 = vld [vmem:[#allocation11 + $0x268] ss:$16 sps:$4 sm:$0xff]  }
 0x594   :  { %4918 = vmatpush1.bf16.msra.mxu1 %v9182_v49  ;;  %v9274_v49 = vld [vmem:[#allocation11 + $0x284] ss:$16 sps:$4 sm:$0xff]  }
 0x595   :  { %4919 = vmatprep.subr.bf16.mxu1 %v9190_v50  ;;  %v9277_v50 = vld [vmem:[#allocation11 + $0x28c] ss:$16 sps:$4 sm:$0xff]  }
 0x598   :  { %4920 = vmatpush1.bf16.msra.mxu1 %v9188_v51  ;;  %v9272_v51 = vld [vmem:[#allocation11 + $0x280] ss:$16 sps:$4 sm:$0xff]  }
 0x599   :  { %4921 = vmatprep.subr.bf16.mxu1 %v9196_v53  ;;  %v9275_v53 = vld [vmem:[#allocation11 + $0x288] ss:$16 sps:$4 sm:$0xff]  }
 0x59c   :  { %4922 = vmatpush1.bf16.msra.mxu1 %v9194_v55  ;;  %v9280_v55 = vld [vmem:[#allocation11 + $0x2a4] ss:$16 sps:$4 sm:$0xff]  }
 0x59d   :  { %4923 = vmatprep.subr.bf16.mxu1 %v9202_v20  ;;  %v9283_v20 = vld [vmem:[#allocation11 + $0x2ac] ss:$16 sps:$4 sm:$0xff]  }
 0x5a0   :  { %4924 = vmatpush1.bf16.msra.mxu1 %v9200_v57  ;;  %v9278_v57 = vld [vmem:[#allocation11 + $0x2a0] ss:$16 sps:$4 sm:$0xff]  }
 0x5a1   :  { %4925 = vmatprep.subr.bf16.mxu1 %v9208_v58  ;;  %v9281_v58 = vld [vmem:[#allocation11 + $0x2a8] ss:$16 sps:$4 sm:$0xff]  }
 0x5a4   :  { %4926 = vmatpush1.bf16.msra.mxu1 %v9206_v59  ;;  %v9286_v59 = vld [vmem:[#allocation11 + $0x2c4] ss:$16 sps:$4 sm:$0xff]  }
 0x5a5   :  { %4927 = vmatprep.subr.bf16.mxu1 %v9214_v60  ;;  %v9289_v60 = vld [vmem:[#allocation11 + $0x2cc] ss:$16 sps:$4 sm:$0xff]  }
 0x5a8   :  { %4928 = vmatpush1.bf16.msra.mxu1 %v9212_v61 }
 0x5a9   :  { %4929 = vmatprep.subr.bf16.mxu1 %v9220_v62  ;;  %v4265_v62 = vrot.slane %v11818_v23, %v11207_v24 }
 0x5ac   :  { %4930 = vmatpush1.bf16.msra.mxu1 %v9218_v63  ;;  %v9284_v63 = vld [vmem:[#allocation11 + $0x2c0] ss:$16 sps:$4 sm:$0xff]  }
 0x5ad   :  { %4931 = vmatprep.subr.bf16.mxu1 %v9226_v2  ;;  %v9287_v2 = vld [vmem:[#allocation11 + $0x2c8] ss:$16 sps:$4 sm:$0xff]  }
 0x5b0   :  { %4932 = vmatpush1.bf16.msra.mxu1 %v9224_v3 }
 0x5b1   :  { %4933 = vmatprep.subr.bf16.mxu1 %v9232_v5  ;;  %v4261_v5 = vrot.slane %v11818_v23, %v11204_v22 }
 0x5b4   :  { %4934 = vmatpush1.bf16.msra.mxu1 %v9230_v7 }
 0x5b5   :  { %4935 = vmatprep.subr.bf16.mxu1 %v9238_v10  ;;  %v9292_v10 = vld [vmem:[#allocation11 + $0x2e4] ss:$16 sps:$4 sm:$0xff]  }
 0x5b8   :  { %4936 = vmatpush1.bf16.msra.mxu1 %v9236_v15 }
 0x5b9   :  { %4937 = vmatprep.subr.bf16.mxu1 %v9244_v17 }
 0x5bc   :  { %4938 = vmatpush1.bf16.msra.mxu1 %v9242_v18  ;;  %v9290_v18 = vld [vmem:[#allocation11 + $0x2e0] ss:$16 sps:$4 sm:$0xff]  }
 0x5bd   :  { %4948 = vmatprep.subr.bf16.mxu1 %v9250_v4 }
 0x632   :  { %v4200_v27 = vpop.f32.mrb[32].mxu1 }
 0x633   :  { %v4201_v28 = vadd.f32 %v4200_v27, %v11753_v37  ;;  %v4202_v29 = vpop.f32.mrb[33].mxu1  ;;  %v9254_v37 = vld [vmem:[#allocation11 + $0x220] ss:$16 sps:$4 sm:$0xff]  }
 0x634   :  { %v4203_v11 = vadd.f32 %v4202_v29, %v11755_v40  ;;  %v4204_v30 = vpop.f32.mrb[34].mxu1  ;;  %v9257_v40 = vld [vmem:[#allocation11 + $0x228] ss:$16 sps:$4 sm:$0xff]   ;;  %v9296_v27 = vld [vmem:[#allocation11 + $0x300] ss:$16 sps:$4 sm:$0xff]  }
 0x635   :  { %v4270_v31 = vadd.f32 %v4253_v25, %v4201_v28  ;;  %v4205_v32 = vpop.f32.mrb[35].mxu1  ;;  %v9307_v29 = vld [vmem:[#allocation14 + $0xc] ss:$16 sps:$4 sm:$0xff]   ;;  %v9305_v30 = vld [vmem:[#allocation14 + $0x8] ss:$16 sps:$4 sm:$0xff]  }
 0x636   :  { %v4271_v33 = vadd.f32 %v4257_v9, %v4203_v11  ;;  %v9299_v9 = vld [vmem:[#allocation11 + $0x308] ss:$16 sps:$4 sm:$0xff]   ;;  %v9302_v11 = vld [vmem:[#allocation14] ss:$16 sps:$4 sm:$0xff]  }
 0x637   :  { %v4274_v34 = vmax.f32 %v4270_v31, 0.0  ;;  %v9310_v32 = vld [vmem:[#allocation14 + $0x24] ss:$16 sps:$4 sm:$0xff]  }
 0x638   :  { %v4275_v35 = vmax.f32 %v4271_v33, 0.0  ;;  %v9313_v33 = vld [vmem:[#allocation14 + $0x2c] ss:$16 sps:$4 sm:$0xff]  }
 0x639   :  { %v4278_v13 = vpack.c.bf16 %v4274_v34, %v4274_v34  ;;  %v9308_v34 = vld [vmem:[#allocation14 + $0x20] ss:$16 sps:$4 sm:$0xff]  }
 0x63a   :  { %v4279_v36 = vpack.c.bf16 %v4275_v35, %v4275_v35  ;;  %v9311_v35 = vld [vmem:[#allocation14 + $0x28] ss:$16 sps:$4 sm:$0xff]  }
 0x63c   :  { %4939 = vmatprep.mubr.bf16.mxu1 %v4279_v36  ;;  %5021 = vmatprep.mubr.bf16.mxu0 %v4279_v36  ;;  %v9316_v36 = vld [vmem:[#allocation14 + $0x44] ss:$16 sps:$4 sm:$0xff]  }
 0x63d   :  { %4940 = vmatmul.mubr.bf16.vlgmr.msra.gmra.mrb[40].mxu1 %v4278_v13  ;;  %5022 = vmatmul.mubr.bf16.vlgmr.msra.gmra.mrb[36].mxu0 %v4278_v13  ;;  %v9317_v13 = vld [vmem:[#allocation14 + $0x48] ss:$16 sps:$4 sm:$0xff]  }
 0x63e   :  { %4949 = vmatpush1.bf16.msra.mxu1 %v9248_v38  ;;  %5031 = vmatpush1.bf16.msra.mxu0 %v9251_v8  ;;  %v9319_v38 = vld [vmem:[#allocation14 + $0x4c] ss:$16 sps:$4 sm:$0xff]   ;;  %v9314_v8 = vld [vmem:[#allocation14 + $0x40] ss:$16 sps:$4 sm:$0xff]  }
 0x63f   :  { %4950 = vmatprep.subr.bf16.mxu1 %v9256_v26  ;;  %5032 = vmatprep.subr.bf16.mxu0 %v9259_v41  ;;  %v9322_v26 = vld [vmem:[#allocation14 + $0x64] ss:$16 sps:$4 sm:$0xff]   ;;  %v9325_v41 = vld [vmem:[#allocation14 + $0x6c] ss:$16 sps:$4 sm:$0xff]  }
 0x642   :  { %4951 = vmatpush1.bf16.msra.mxu1 %v9254_v37  ;;  %5033 = vmatpush1.bf16.msra.mxu0 %v9257_v40  ;;  %v9320_v37 = vld [vmem:[#allocation14 + $0x60] ss:$16 sps:$4 sm:$0xff]   ;;  %v9323_v40 = vld [vmem:[#allocation14 + $0x68] ss:$16 sps:$4 sm:$0xff]  }
 0x643   :  { %4952 = vmatprep.subr.bf16.mxu1 %v9262_v42  ;;  %5034 = vmatprep.subr.bf16.mxu0 %v9265_v44  ;;  %v9328_v42 = vld [vmem:[#allocation14 + $0x84] ss:$16 sps:$4 sm:$0xff]   ;;  %v9331_v44 = vld [vmem:[#allocation14 + $0x8c] ss:$16 sps:$4 sm:$0xff]  }
 0x646   :  { %4953 = vmatpush1.bf16.msra.mxu1 %v9260_v39  ;;  %5035 = vmatpush1.bf16.msra.mxu0 %v9263_v46  ;;  %v9326_v39 = vld [vmem:[#allocation14 + $0x80] ss:$16 sps:$4 sm:$0xff]   ;;  %v9329_v46 = vld [vmem:[#allocation14 + $0x88] ss:$16 sps:$4 sm:$0xff]  }
 0x647   :  { %4954 = vmatprep.subr.bf16.mxu1 %v9268_v47  ;;  %5036 = vmatprep.subr.bf16.mxu0 %v9271_v52  ;;  %v9334_v47 = vld [vmem:[#allocation14 + $0xa4] ss:$16 sps:$4 sm:$0xff]   ;;  %v9337_v52 = vld [vmem:[#allocation14 + $0xac] ss:$16 sps:$4 sm:$0xff]  }
 0x64a   :  { %4955 = vmatpush1.bf16.msra.mxu1 %v9266_v12  ;;  %5037 = vmatpush1.bf16.msra.mxu0 %v9269_v48  ;;  %v9332_v12 = vld [vmem:[#allocation14 + $0xa0] ss:$16 sps:$4 sm:$0xff]   ;;  %v9335_v48 = vld [vmem:[#allocation14 + $0xa8] ss:$16 sps:$4 sm:$0xff]  }
 0x64b   :  { %4956 = vmatprep.subr.bf16.mxu1 %v9274_v49  ;;  %5038 = vmatprep.subr.bf16.mxu0 %v9277_v50  ;;  %v9340_v49 = vld [vmem:[#allocation14 + $0xc4] ss:$16 sps:$4 sm:$0xff]   ;;  %v9343_v50 = vld [vmem:[#allocation14 + $0xcc] ss:$16 sps:$4 sm:$0xff]  }
 0x64e   :  { %4957 = vmatpush1.bf16.msra.mxu1 %v9272_v51  ;;  %5039 = vmatpush1.bf16.msra.mxu0 %v9275_v53  ;;  %v9338_v51 = vld [vmem:[#allocation14 + $0xc0] ss:$16 sps:$4 sm:$0xff]   ;;  %v9341_v53 = vld [vmem:[#allocation14 + $0xc8] ss:$16 sps:$4 sm:$0xff]  }
 0x64f   :  { %4958 = vmatprep.subr.bf16.mxu1 %v9280_v55  ;;  %5040 = vmatprep.subr.bf16.mxu0 %v9283_v20  ;;  %v9346_v55 = vld [vmem:[#allocation14 + $0xe4] ss:$16 sps:$4 sm:$0xff]   ;;  %v9349_v20 = vld [vmem:[#allocation14 + $0xec] ss:$16 sps:$4 sm:$0xff]  }
 0x652   :  { %v4241_v61 = vpop.f32.mrb[36].mxu1  ;;  %4959 = vmatpush1.bf16.msra.mxu1 %v9278_v57  ;;  %5041 = vmatpush1.bf16.msra.mxu0 %v9281_v58  ;;  %v9344_v57 = vld [vmem:[#allocation14 + $0xe0] ss:$16 sps:$4 sm:$0xff]   ;;  %v9347_v58 = vld [vmem:[#allocation14 + $0xe8] ss:$16 sps:$4 sm:$0xff]  }
 0x653   :  { %v4242_v3 = vadd.f32 %v4241_v61, %v11757_v43  ;;  %v4243_v7 = vpop.f32.mrb[37].mxu1  ;;  %4960 = vmatprep.subr.bf16.mxu1 %v9286_v59  ;;  %5042 = vmatprep.subr.bf16.mxu0 %v9289_v60  ;;  %v9298_v43 = vld [vmem:[#allocation11 + $0x304] ss:$16 sps:$4 sm:$0xff]   ;;  %v9352_v59 = vld [vmem:[#allocation14 + $0x104] ss:$16 sps:$4 sm:$0xff]  }
 0x654   :  { %v4244_v15 = vadd.f32 %v4243_v7, %v11759_v45  ;;  %v4245_v16 = vpop.f32.mrb[38].mxu1  ;;  %v9304_v45 = vld [vmem:[#allocation14 + $0x4] ss:$16 sps:$4 sm:$0xff]   ;;  %v9355_v60 = vld [vmem:[#allocation14 + $0x10c] ss:$16 sps:$4 sm:$0xff]  }
 0x655   :  { %v4246_v17 = vpop.f32.mrb[39].mxu1  ;;  %v4272_v4 = vadd.f32 %v4261_v5, %v4242_v3  ;;  %v9350_v61 = vld [vmem:[#allocation14 + $0x100] ss:$16 sps:$4 sm:$0xff]   ;;  %v9359_v5 = vld [vmem:[#allocation14 + $0x128] ss:$16 sps:$4 sm:$0xff]  }
 0x656   :  { %v4273_v1 = vadd.f32 %v4265_v62, %v4244_v15  ;;  %4961 = vmatpush1.bf16.msra.mxu1 %v9284_v63  ;;  %5043 = vmatpush1.bf16.msra.mxu0 %v9287_v2  ;;  %v9353_v62 = vld [vmem:[#allocation14 + $0x108] ss:$16 sps:$4 sm:$0xff]   ;;  %v9358_v63 = vld [vmem:[#allocation14 + $0x124] ss:$16 sps:$4 sm:$0xff]   ;;  %v9361_v2 = vld [vmem:[#allocation14 + $0x12c] ss:$16 sps:$4 sm:$0xff]  }
 0x657   :  { %4962 = vmatprep.subr.bf16.mxu1 %v9292_v10  ;;  %5044 = vmatprep.subr.bf16.mxu0 %v9295_v56  ;;  %v4276_v28 = vmax.f32 %v4272_v4, 0.0  ;;  %v9356_v3 = vld [vmem:[#allocation14 + $0x120] ss:$16 sps:$4 sm:$0xff]   ;;  %v9364_v7 = vld [vmem:[#allocation14 + $0x144] ss:$16 sps:$4 sm:$0xff]  }
 0x658   :  { %v4277_v23 = vmax.f32 %v4273_v1, 0.0  ;;  %v9367_v10 = vld [vmem:[#allocation14 + $0x14c] ss:$16 sps:$4 sm:$0xff]   ;;  %v9362_v56 = vld [vmem:[#allocation14 + $0x140] ss:$16 sps:$4 sm:$0xff]  }
 0x659   :  { %v4280_v31 = vpack.c.bf16 %v4276_v28, %v4276_v28  ;;  %v9365_v15 = vld [vmem:[#allocation14 + $0x148] ss:$16 sps:$4 sm:$0xff]   ;;  %v9370_v16 = vld [vmem:[#allocation14 + $0x164] ss:$16 sps:$4 sm:$0xff]   ;;  %v9373_v17 = vld [vmem:[#allocation14 + $0x16c] ss:$16 sps:$4 sm:$0xff]  }
 0x65a   :  { %v4281_v25 = vpack.c.bf16 %v4277_v23, %v4277_v23  ;;  %4963 = vmatpush1.bf16.msra.mxu1 %v9290_v18  ;;  %5045 = vmatpush1.bf16.msra.mxu0 %v9293_v19  ;;  %v9368_v1 = vld [vmem:[#allocation14 + $0x160] ss:$16 sps:$4 sm:$0xff]   ;;  %v9371_v18 = vld [vmem:[#allocation14 + $0x168] ss:$16 sps:$4 sm:$0xff]   ;;  %v9376_v19 = vld [vmem:[#allocation14 + $0x184] ss:$16 sps:$4 sm:$0xff]  }
 0x65b   :  { %4964 = vmatprep.subr.bf16.mxu1 %v9298_v43  ;;  %5046 = vmatprep.subr.bf16.mxu0 %v9301_v21  ;;  %v9379_v4 = vld [vmem:[#allocation14 + $0x18c] ss:$16 sps:$4 sm:$0xff]   ;;  %v9374_v43 = vld [vmem:[#allocation14 + $0x180] ss:$16 sps:$4 sm:$0xff]   ;;  %v9377_v21 = vld [vmem:[#allocation14 + $0x188] ss:$16 sps:$4 sm:$0xff]  }
 0x65c   :  { %8025 = vmatprep.mubr.msk.bf16.mxu1 %vm1495_vm2, %v4281_v25  ;;  %8026 = vmatprep.mubr.msk.bf16.mxu0 %vm1495_vm2, %v4281_v25  ;;  %v9382_v23 = vld [vmem:[#allocation14 + $0x1a4] ss:$16 sps:$4 sm:$0xff]   ;;  %v9385_v25 = vld [vmem:[#allocation14 + $0x1ac] ss:$16 sps:$4 sm:$0xff]  }
 0x65d   :  { %v9388_v28 = vld [vmem:[#allocation14 + $0x1c4] ss:$16 sps:$4 sm:$0xff]  }
 0x65e   :  { %4965 = vmatpush1.bf16.msra.mxu1 %v9296_v27  ;;  %5047 = vmatpush1.bf16.msra.mxu0 %v9299_v9  ;;  %v9380_v27 = vld [vmem:[#allocation14 + $0x1a0] ss:$16 sps:$4 sm:$0xff]   ;;  %v9383_v9 = vld [vmem:[#allocation14 + $0x1a8] ss:$16 sps:$4 sm:$0xff]  }
 0x65f   :  { %5704 = vmatprep.subr.bf16.mxu1 %v9304_v45  ;;  %5786 = vmatprep.subr.bf16.mxu0 %v9307_v29  ;;  %v9391_v45 = vld [vmem:[#allocation14 + $0x1cc] ss:$16 sps:$4 sm:$0xff]   ;;  %v9386_v29 = vld [vmem:[#allocation14 + $0x1c0] ss:$16 sps:$4 sm:$0xff]  }
 0x661   :  { %4981 = vmatmul.mubr.bf16.vlgmr.msra.gmra.mrb[40].mxu1 %v4280_v31  ;;  %5063 = vmatmul.mubr.bf16.vlgmr.msra.gmra.mrb[36].mxu0 %v4280_v31  ;;  %v9397_v31 = vld [vmem:[#allocation14 + $0x1ec] ss:$16 sps:$4 sm:$0xff]  }
 0x662   :  { %5705 = vmatpush1.bf16.msra.mxu1 %v9302_v11  ;;  %5787 = vmatpush1.bf16.msra.mxu0 %v9305_v30  ;;  %v9389_v11 = vld [vmem:[#allocation14 + $0x1c8] ss:$16 sps:$4 sm:$0xff]   ;;  %v9394_v30 = vld [vmem:[#allocation14 + $0x1e4] ss:$16 sps:$4 sm:$0xff]  }
 0x663   :  { %5706 = vmatprep.subr.bf16.mxu1 %v9310_v32  ;;  %5788 = vmatprep.subr.bf16.mxu0 %v9313_v33  ;;  %v9392_v32 = vld [vmem:[#allocation14 + $0x1e0] ss:$16 sps:$4 sm:$0xff]   ;;  %v9395_v33 = vld [vmem:[#allocation14 + $0x1e8] ss:$16 sps:$4 sm:$0xff]  }
 0x666   :  { %5707 = vmatpush1.bf16.msra.mxu1 %v9308_v34  ;;  %5789 = vmatpush1.bf16.msra.mxu0 %v9311_v35  ;;  %v9400_v34 = vld [vmem:[#allocation14 + $0x204] ss:$16 sps:$4 sm:$0xff]   ;;  %v9403_v35 = vld [vmem:[#allocation14 + $0x20c] ss:$16 sps:$4 sm:$0xff]  }
 0x667   :  { %5708 = vmatprep.subr.bf16.mxu1 %v9316_v36  ;;  %5790 = vmatprep.subr.bf16.mxu0 %v9319_v38  ;;  %v11834_v36 = vld [vmem:[#allocation13] sm:$0xf] }
 0x668   :  { %v4387_v38 = vrot.slane %v11834_v36, %v11084_v54 }
 0x66a   :  { %5709 = vmatpush1.bf16.msra.mxu1 %v9314_v8  ;;  %5791 = vmatpush1.bf16.msra.mxu0 %v9317_v13  ;;  %v4391_v8 = vrot.slane %v11834_v36, %v11087_v14  ;;  %v4399_v13 = vrot.slane %v11834_v36, %v11207_v24 }
 0x66b   :  { %5710 = vmatprep.subr.bf16.mxu1 %v9322_v26  ;;  %5792 = vmatprep.subr.bf16.mxu0 %v9325_v41 }
 0x66e   :  { %5711 = vmatpush1.bf16.msra.mxu1 %v9320_v37  ;;  %5793 = vmatpush1.bf16.msra.mxu0 %v9323_v40 }
 0x66f   :  { %5712 = vmatprep.subr.bf16.mxu1 %v9328_v42  ;;  %5794 = vmatprep.subr.bf16.mxu0 %v9331_v44 }
 0x672   :  { %5713 = vmatpush1.bf16.msra.mxu1 %v9326_v39  ;;  %5795 = vmatpush1.bf16.msra.mxu0 %v9329_v46 }
 0x673   :  { %5714 = vmatprep.subr.bf16.mxu1 %v9334_v47  ;;  %5796 = vmatprep.subr.bf16.mxu0 %v9337_v52 }
 0x676   :  { %5715 = vmatpush1.bf16.msra.mxu1 %v9332_v12  ;;  %5797 = vmatpush1.bf16.msra.mxu0 %v9335_v48 }
 0x677   :  { %5716 = vmatprep.subr.bf16.mxu1 %v9340_v49  ;;  %5798 = vmatprep.subr.bf16.mxu0 %v9343_v50 }
 0x67a   :  { %5717 = vmatpush1.bf16.msra.mxu1 %v9338_v51  ;;  %5799 = vmatpush1.bf16.msra.mxu0 %v9341_v53  ;;  %v9398_v53 = vld [vmem:[#allocation14 + $0x200] ss:$16 sps:$4 sm:$0xff]  }
 0x67b   :  { %5718 = vmatprep.subr.bf16.mxu1 %v9346_v55  ;;  %5800 = vmatprep.subr.bf16.mxu0 %v9349_v20  ;;  %v9401_v55 = vld [vmem:[#allocation14 + $0x208] ss:$16 sps:$4 sm:$0xff]  }
 0x67e   :  { %5719 = vmatpush1.bf16.msra.mxu1 %v9344_v57  ;;  %5801 = vmatpush1.bf16.msra.mxu0 %v9347_v58  ;;  %v9406_v57 = vld [vmem:[#allocation14 + $0x224] ss:$16 sps:$4 sm:$0xff]   ;;  %v9409_v58 = vld [vmem:[#allocation14 + $0x22c] ss:$16 sps:$4 sm:$0xff]  }
 0x67f   :  { %5720 = vmatprep.subr.bf16.mxu1 %v9352_v59  ;;  %5802 = vmatprep.subr.bf16.mxu0 %v9355_v60  ;;  %v9404_v60 = vld [vmem:[#allocation14 + $0x220] ss:$16 sps:$4 sm:$0xff]  }
 0x682   :  { %5721 = vmatpush1.bf16.msra.mxu1 %v9350_v61  ;;  %5803 = vmatpush1.bf16.msra.mxu0 %v9353_v62  ;;  %v9407_v61 = vld [vmem:[#allocation14 + $0x228] ss:$16 sps:$4 sm:$0xff]   ;;  %v9412_v62 = vld [vmem:[#allocation14 + $0x244] ss:$16 sps:$4 sm:$0xff]  }
 0x683   :  { %5722 = vmatprep.subr.bf16.mxu1 %v9358_v63  ;;  %5804 = vmatprep.subr.bf16.mxu0 %v9361_v2  ;;  %v9415_v63 = vld [vmem:[#allocation14 + $0x24c] ss:$16 sps:$4 sm:$0xff]   ;;  %v9410_v2 = vld [vmem:[#allocation14 + $0x240] ss:$16 sps:$4 sm:$0xff]  }
 0x686   :  { %5723 = vmatpush1.bf16.msra.mxu1 %v9356_v3  ;;  %5805 = vmatpush1.bf16.msra.mxu0 %v9359_v5  ;;  %v9413_v3 = vld [vmem:[#allocation14 + $0x248] ss:$16 sps:$4 sm:$0xff]   ;;  %v9418_v5 = vld [vmem:[#allocation14 + $0x264] ss:$16 sps:$4 sm:$0xff]  }
 0x687   :  { %5724 = vmatprep.subr.bf16.mxu1 %v9364_v7  ;;  %5806 = vmatprep.subr.bf16.mxu0 %v9367_v10  ;;  %v9421_v7 = vld [vmem:[#allocation14 + $0x26c] ss:$16 sps:$4 sm:$0xff]   ;;  %v9416_v10 = vld [vmem:[#allocation14 + $0x260] ss:$16 sps:$4 sm:$0xff]  }
 0x68a   :  { %5725 = vmatpush1.bf16.msra.mxu1 %v9362_v56  ;;  %5807 = vmatpush1.bf16.msra.mxu0 %v9365_v15  ;;  %v9419_v56 = vld [vmem:[#allocation14 + $0x268] ss:$16 sps:$4 sm:$0xff]   ;;  %v9424_v15 = vld [vmem:[#allocation14 + $0x284] ss:$16 sps:$4 sm:$0xff]  }
 0x68b   :  { %5726 = vmatprep.subr.bf16.mxu1 %v9370_v16  ;;  %5808 = vmatprep.subr.bf16.mxu0 %v9373_v17  ;;  %v9427_v16 = vld [vmem:[#allocation14 + $0x28c] ss:$16 sps:$4 sm:$0xff]   ;;  %v9422_v17 = vld [vmem:[#allocation14 + $0x280] ss:$16 sps:$4 sm:$0xff]  }
 0x68e   :  { %5727 = vmatpush1.bf16.msra.mxu1 %v9368_v1  ;;  %5809 = vmatpush1.bf16.msra.mxu0 %v9371_v18  ;;  %v9425_v1 = vld [vmem:[#allocation14 + $0x288] ss:$16 sps:$4 sm:$0xff]   ;;  %v9430_v18 = vld [vmem:[#allocation14 + $0x2a4] ss:$16 sps:$4 sm:$0xff]  }
 0x68f   :  { %5728 = vmatprep.subr.bf16.mxu1 %v9376_v19  ;;  %5810 = vmatprep.subr.bf16.mxu0 %v9379_v4  ;;  %v9433_v19 = vld [vmem:[#allocation14 + $0x2ac] ss:$16 sps:$4 sm:$0xff]   ;;  %v9428_v4 = vld [vmem:[#allocation14 + $0x2a0] ss:$16 sps:$4 sm:$0xff]  }
 0x692   :  { %5729 = vmatpush1.bf16.msra.mxu1 %v9374_v43  ;;  %5811 = vmatpush1.bf16.msra.mxu0 %v9377_v21  ;;  %v9431_v43 = vld [vmem:[#allocation14 + $0x2a8] ss:$16 sps:$4 sm:$0xff]   ;;  %v9436_v21 = vld [vmem:[#allocation14 + $0x2c4] ss:$16 sps:$4 sm:$0xff]  }
 0x693   :  { %5730 = vmatprep.subr.bf16.mxu1 %v9382_v23  ;;  %5812 = vmatprep.subr.bf16.mxu0 %v9385_v25  ;;  %v9439_v23 = vld [vmem:[#allocation14 + $0x2cc] ss:$16 sps:$4 sm:$0xff]   ;;  %v9434_v25 = vld [vmem:[#allocation14 + $0x2c0] ss:$16 sps:$4 sm:$0xff]  }
 0x696   :  { %5731 = vmatpush1.bf16.msra.mxu1 %v9380_v27  ;;  %5813 = vmatpush1.bf16.msra.mxu0 %v9383_v9  ;;  %v9437_v27 = vld [vmem:[#allocation14 + $0x2c8] ss:$16 sps:$4 sm:$0xff]   ;;  %v4395_v9 = vrot.slane %v11834_v36, %v11204_v22 }
 0x697   :  { %5732 = vmatprep.subr.bf16.mxu1 %v9388_v28  ;;  %5814 = vmatprep.subr.bf16.mxu0 %v9391_v45  ;;  %v9442_v28 = vld [vmem:[#allocation14 + $0x2e4] ss:$16 sps:$4 sm:$0xff]   ;;  %v9445_v45 = vld [vmem:[#allocation14 + $0x2ec] ss:$16 sps:$4 sm:$0xff]  }
 0x698   :  { %v9454_v36 = vld [vmem:[%s12486_s19 + $0x4] ss:$28 sps:$4 sm:$0xff]  }
 0x69a   :  { %5733 = vmatpush1.bf16.msra.mxu1 %v9386_v29  ;;  %5815 = vmatpush1.bf16.msra.mxu0 %v9389_v11  ;;  %v9440_v29 = vld [vmem:[#allocation14 + $0x2e0] ss:$16 sps:$4 sm:$0xff]   ;;  %v9443_v11 = vld [vmem:[#allocation14 + $0x2e8] ss:$16 sps:$4 sm:$0xff]  }
 0x69b   :  { %5734 = vmatprep.subr.bf16.mxu1 %v9394_v30  ;;  %5816 = vmatprep.subr.bf16.mxu0 %v9397_v31  ;;  %v9448_v31 = vld [vmem:[#allocation14 + $0x304] ss:$16 sps:$4 sm:$0xff]  }
 0x69e   :  { %5735 = vmatpush1.bf16.msra.mxu1 %v9392_v32  ;;  %5817 = vmatpush1.bf16.msra.mxu0 %v9395_v33  ;;  %v9451_v32 = vld [vmem:[#allocation14 + $0x30c] ss:$16 sps:$4 sm:$0xff]   ;;  %v9446_v33 = vld [vmem:[#allocation14 + $0x300] ss:$16 sps:$4 sm:$0xff]  }
 0x69f   :  { %5745 = vmatprep.subr.bf16.mxu1 %v9400_v34  ;;  %5827 = vmatprep.subr.bf16.mxu0 %v9403_v35  ;;  %v9449_v34 = vld [vmem:[#allocation14 + $0x308] ss:$16 sps:$4 sm:$0xff]  }
 0x734   :  { %v4982_v26 = vpop.f32.mrb[40].mxu1  ;;  %v11842_v41 = vpop.f32.mrb[36].mxu0 }
 0x735   :  { %v8347_v37 = vadd.f32 %v4982_v26, %v4387_v38  ;;  %v4984_v40 = vpop.f32.mrb[41].mxu1  ;;  %v5066_v42 = vpop.f32.mrb[37].mxu0  ;;  %v8349_v30 = vadd.f32 %v11842_v41, %v4395_v9  ;;  %v9457_v38 = vld [vmem:[%s12486_s19 + $0xc] ss:$28 sps:$4 sm:$0xff]   ;;  %v9460_v41 = vld [vmem:[%s12486_s19 + $0x3c] ss:$28 sps:$4 sm:$0xff]  }
 0x736   :  { %v8348_v44 = vadd.f32 %v4984_v40, %v4391_v8  ;;  %v8350_v39 = vadd.f32 %v5066_v42, %v4399_v13  ;;  %v4986_v46 = vpop.f32.mrb[42].mxu1  ;;  %v5068_v47 = vpop.f32.mrb[38].mxu0  ;;  %v9452_v8 = vld [vmem:[%s12486_s19] ss:$28 sps:$4 sm:$0xff]   ;;  %v9455_v13 = vld [vmem:[%s12486_s19 + $0x8] ss:$28 sps:$4 sm:$0xff]  }
 0x737   :  { %v5071_v52 = vmax.f32 %v8347_v37, 0.0  ;;  %v4987_v12 = vpop.f32.mrb[43].mxu1  ;;  %v5069_v48 = vpop.f32.mrb[39].mxu0  ;;  %v5073_v35 = vmax.f32 %v8349_v30, 0.0  ;;  %v9463_v37 = vld [vmem:[%s12486_s19 + $0x44] ss:$28 sps:$4 sm:$0xff]  }
 0x738   :  { %v5072_v49 = vmax.f32 %v8348_v44, 0.0  ;;  %v5074_v50 = vmax.f32 %v8350_v39, 0.0  ;;  %v9458_v40 = vld [vmem:[%s12486_s19 + $0x38] ss:$28 sps:$4 sm:$0xff]   ;;  %v9461_v42 = vld [vmem:[%s12486_s19 + $0x40] ss:$28 sps:$4 sm:$0xff]  }
 0x739   :  { %v5075_v20 = vpack.c.bf16 %v5071_v52, %v5071_v52  ;;  %v5077_v26 = vpack.c.bf16 %v5073_v35, %v5073_v35  ;;  %v9466_v44 = vld [vmem:[%s12486_s19 + $0x74] ss:$28 sps:$4 sm:$0xff]   ;;  %v9469_v39 = vld [vmem:[%s12486_s19 + $0x7c] ss:$28 sps:$4 sm:$0xff]   ;;  %v9472_v52 = vld [vmem:[%s12486_s19 + $0xac] ss:$28 sps:$4 sm:$0xff]  }
 0x73a   :  { %v5076_v51 = vpack.c.bf16 %v5072_v49, %v5072_v49  ;;  %v5078_v59 = vpack.c.bf16 %v5074_v50, %v5074_v50  ;;  %v9464_v46 = vld [vmem:[%s12486_s19 + $0x70] ss:$28 sps:$4 sm:$0xff]   ;;  %v9467_v47 = vld [vmem:[%s12486_s19 + $0x78] ss:$28 sps:$4 sm:$0xff]   ;;  %v9470_v48 = vld [vmem:[%s12486_s19 + $0xa8] ss:$28 sps:$4 sm:$0xff]  }
 0x73b   :  { %v9475_v12 = vld [vmem:[%s12486_s19 + $0xb4] ss:$28 sps:$4 sm:$0xff]   ;;  %v9478_v50 = vld [vmem:[%s12486_s19 + $0xe4] ss:$28 sps:$4 sm:$0xff]  }
 0x73c   :  { %5736 = vmatprep.mubr.bf16.mxu1 %v5076_v51  ;;  %5818 = vmatprep.mubr.bf16.mxu0 %v5076_v51  ;;  %v9473_v49 = vld [vmem:[%s12486_s19 + $0xb0] ss:$28 sps:$4 sm:$0xff]   ;;  %v9518_v9 = vld [vmem:[%s12486_s19 + $0x268] ss:$28 sps:$4 sm:$0xff]  }
 0x73d   :  { %5737 = vmatmul.mubr.bf16.vlgmr.msra.gmra.mrb[44].mxu1 %v5075_v20  ;;  %5819 = vmatmul.mubr.bf16.vlgmr.msra.gmra.mrb[40].mxu0 %v5075_v20  ;;  %v9481_v51 = vld [vmem:[%s12486_s19 + $0xec] ss:$28 sps:$4 sm:$0xff]   ;;  %v9484_v20 = vld [vmem:[%s12486_s19 + $0x11c] ss:$28 sps:$4 sm:$0xff]   ;;  %v9538_v35 = vld [vmem:[%s12486_s19 + $0x314] ss:$28 sps:$4 sm:$0xff]  }
 0x73e   :  { %5746 = vmatpush1.bf16.msra.mxu1 %v9398_v53  ;;  %5828 = vmatpush1.bf16.msra.mxu0 %v9401_v55  ;;  %v9476_v53 = vld [vmem:[%s12486_s19 + $0xe0] ss:$28 sps:$4 sm:$0xff]   ;;  %v9479_v55 = vld [vmem:[%s12486_s19 + $0xe8] ss:$28 sps:$4 sm:$0xff]  }
 0x73f   :  { %8127 = vmatprep.mubr.msk.bf16.mxu1 %vm1495_vm2, %v5078_v59  ;;  %8128 = vmatprep.mubr.msk.bf16.mxu0 %vm1495_vm2, %v5078_v59  ;;  %v9485_v59 = vld [vmem:[%s12486_s19 + $0x120] ss:$28 sps:$4 sm:$0xff]   ;;  %v9527_v30 = vld [vmem:[%s12486_s19 + $0x2a8] ss:$28 sps:$4 sm:$0xff]  }
 0x740   :  { %5747 = vmatprep.subr.bf16.mxu1 %v9406_v57  ;;  %5829 = vmatprep.subr.bf16.mxu0 %v9409_v58  ;;  %v9487_v57 = vld [vmem:[%s12486_s19 + $0x124] ss:$28 sps:$4 sm:$0xff]   ;;  %v9482_v58 = vld [vmem:[%s12486_s19 + $0x118] ss:$28 sps:$4 sm:$0xff]  }
 0x742   :  { %5748 = vmatpush1.bf16.msra.mxu1 %v9404_v60  ;;  %5830 = vmatpush1.bf16.msra.mxu0 %v9407_v61  ;;  %v9490_v60 = vld [vmem:[%s12486_s19 + $0x154] ss:$28 sps:$4 sm:$0xff]   ;;  %v9493_v61 = vld [vmem:[%s12486_s19 + $0x15c] ss:$28 sps:$4 sm:$0xff]  }
 0x743   :  { %5749 = vmatprep.subr.bf16.mxu1 %v9412_v62  ;;  %5831 = vmatprep.subr.bf16.mxu0 %v9415_v63  ;;  %v9488_v62 = vld [vmem:[%s12486_s19 + $0x150] ss:$28 sps:$4 sm:$0xff]   ;;  %v9491_v63 = vld [vmem:[%s12486_s19 + $0x158] ss:$28 sps:$4 sm:$0xff]  }
 0x746   :  { %5750 = vmatpush1.bf16.msra.mxu1 %v9410_v2  ;;  %5832 = vmatpush1.bf16.msra.mxu0 %v9413_v3  ;;  %v9496_v2 = vld [vmem:[%s12486_s19 + $0x18c] ss:$28 sps:$4 sm:$0xff]   ;;  %v9499_v3 = vld [vmem:[%s12486_s19 + $0x194] ss:$28 sps:$4 sm:$0xff]  }
 0x747   :  { %5751 = vmatprep.subr.bf16.mxu1 %v9418_v5  ;;  %5833 = vmatprep.subr.bf16.mxu0 %v9421_v7  ;;  %v9494_v5 = vld [vmem:[%s12486_s19 + $0x188] ss:$28 sps:$4 sm:$0xff]   ;;  %v9497_v7 = vld [vmem:[%s12486_s19 + $0x190] ss:$28 sps:$4 sm:$0xff]  }
 0x74a   :  { %5752 = vmatpush1.bf16.msra.mxu1 %v9416_v10  ;;  %5834 = vmatpush1.bf16.msra.mxu0 %v9419_v56  ;;  %v9502_v10 = vld [vmem:[%s12486_s19 + $0x1c4] ss:$28 sps:$4 sm:$0xff]   ;;  %v9505_v56 = vld [vmem:[%s12486_s19 + $0x1cc] ss:$28 sps:$4 sm:$0xff]  }
 0x74b   :  { %5753 = vmatprep.subr.bf16.mxu1 %v9424_v15  ;;  %5835 = vmatprep.subr.bf16.mxu0 %v9427_v16  ;;  %v9500_v15 = vld [vmem:[%s12486_s19 + $0x1c0] ss:$28 sps:$4 sm:$0xff]   ;;  %v9503_v16 = vld [vmem:[%s12486_s19 + $0x1c8] ss:$28 sps:$4 sm:$0xff]  }
 0x74e   :  { %5754 = vmatpush1.bf16.msra.mxu1 %v9422_v17  ;;  %5836 = vmatpush1.bf16.msra.mxu0 %v9425_v1  ;;  %v9508_v17 = vld [vmem:[%s12486_s19 + $0x1fc] ss:$28 sps:$4 sm:$0xff]   ;;  %v9511_v1 = vld [vmem:[%s12486_s19 + $0x204] ss:$28 sps:$4 sm:$0xff]  }
 0x74f   :  { %5755 = vmatprep.subr.bf16.mxu1 %v9430_v18  ;;  %5837 = vmatprep.subr.bf16.mxu0 %v9433_v19  ;;  %v9506_v18 = vld [vmem:[%s12486_s19 + $0x1f8] ss:$28 sps:$4 sm:$0xff]   ;;  %v9509_v19 = vld [vmem:[%s12486_s19 + $0x200] ss:$28 sps:$4 sm:$0xff]  }
 0x752   :  { %5756 = vmatpush1.bf16.msra.mxu1 %v9428_v4  ;;  %5838 = vmatpush1.bf16.msra.mxu0 %v9431_v43  ;;  %v9514_v4 = vld [vmem:[%s12486_s19 + $0x234] ss:$28 sps:$4 sm:$0xff]   ;;  %v9517_v43 = vld [vmem:[%s12486_s19 + $0x23c] ss:$28 sps:$4 sm:$0xff]  }
 0x753   :  { %5757 = vmatprep.subr.bf16.mxu1 %v9436_v21  ;;  %5839 = vmatprep.subr.bf16.mxu0 %v9439_v23  ;;  %v9512_v21 = vld [vmem:[%s12486_s19 + $0x230] ss:$28 sps:$4 sm:$0xff]   ;;  %v9515_v23 = vld [vmem:[%s12486_s19 + $0x238] ss:$28 sps:$4 sm:$0xff]  }
 0x756   :  { %5758 = vmatpush1.bf16.msra.mxu1 %v9434_v25  ;;  %5840 = vmatpush1.bf16.msra.mxu0 %v9437_v27  ;;  %v9520_v25 = vld [vmem:[%s12486_s19 + $0x26c] ss:$28 sps:$4 sm:$0xff]   ;;  %v9523_v27 = vld [vmem:[%s12486_s19 + $0x274] ss:$28 sps:$4 sm:$0xff]  }
 0x757   :  { %5759 = vmatprep.subr.bf16.mxu1 %v9442_v28  ;;  %5841 = vmatprep.subr.bf16.mxu0 %v9445_v45  ;;  %v9521_v28 = vld [vmem:[%s12486_s19 + $0x270] ss:$28 sps:$4 sm:$0xff]   ;;  %v9526_v45 = vld [vmem:[%s12486_s19 + $0x2a4] ss:$28 sps:$4 sm:$0xff]  }
 0x75a   :  { %5760 = vmatpush1.bf16.msra.mxu1 %v9440_v29  ;;  %5842 = vmatpush1.bf16.msra.mxu0 %v9443_v11  ;;  %v9529_v29 = vld [vmem:[%s12486_s19 + $0x2ac] ss:$28 sps:$4 sm:$0xff]   ;;  %v9524_v11 = vld [vmem:[%s12486_s19 + $0x2a0] ss:$28 sps:$4 sm:$0xff]  }
 0x75b   :  { %5761 = vmatprep.subr.bf16.mxu1 %v9448_v31  ;;  %5843 = vmatprep.subr.bf16.mxu0 %v9451_v32  ;;  %v9532_v31 = vld [vmem:[%s12486_s19 + $0x2dc] ss:$28 sps:$4 sm:$0xff]   ;;  %v9535_v32 = vld [vmem:[%s12486_s19 + $0x2e4] ss:$28 sps:$4 sm:$0xff]  }
 0x75e   :  { %5762 = vmatpush1.bf16.msra.mxu1 %v9446_v33  ;;  %5844 = vmatpush1.bf16.msra.mxu0 %v9449_v34  ;;  %v9530_v33 = vld [vmem:[%s12486_s19 + $0x2d8] ss:$28 sps:$4 sm:$0xff]   ;;  %v9533_v34 = vld [vmem:[%s12486_s19 + $0x2e0] ss:$28 sps:$4 sm:$0xff]  }
 0x75f   :  { %7016 = vmatprep.subr.bf16.mxu1 %v9454_v36  ;;  %7098 = vmatprep.subr.bf16.mxu0 %v9457_v38  ;;  %v9541_v36 = vld [vmem:[%s12486_s19 + $0x31c] ss:$28 sps:$4 sm:$0xff]   ;;  %v9536_v38 = vld [vmem:[%s12486_s19 + $0x310] ss:$28 sps:$4 sm:$0xff]  }
 0x761   :  { %5778 = vmatmul.mubr.bf16.vlgmr.msra.gmra.mrb[44].mxu1 %v5077_v26  ;;  %5860 = vmatmul.mubr.bf16.vlgmr.msra.gmra.mrb[40].mxu0 %v5077_v26  ;;  %v9547_v26 = vld [vmem:[%s12486_s19 + $0x354] ss:$28 sps:$4 sm:$0xff]  }
 0x762   :  { %7017 = vmatpush1.bf16.msra.mxu1 %v9452_v8  ;;  %7099 = vmatpush1.bf16.msra.mxu0 %v9455_v13  ;;  %v9539_v8 = vld [vmem:[%s12486_s19 + $0x318] ss:$28 sps:$4 sm:$0xff]   ;;  %v9544_v13 = vld [vmem:[%s12486_s19 + $0x34c] ss:$28 sps:$4 sm:$0xff]  }
 0x763   :  { %7018 = vmatprep.subr.bf16.mxu1 %v9460_v41  ;;  %7100 = vmatprep.subr.bf16.mxu0 %v9463_v37  ;;  %v9542_v41 = vld [vmem:[%s12486_s19 + $0x348] ss:$28 sps:$4 sm:$0xff]   ;;  %v9545_v37 = vld [vmem:[%s12486_s19 + $0x350] ss:$28 sps:$4 sm:$0xff]  }
 0x766   :  { %7019 = vmatpush1.bf16.msra.mxu1 %v9458_v40  ;;  %7101 = vmatpush1.bf16.msra.mxu0 %v9461_v42  ;;  %v9550_v40 = vld [vmem:[%s12486_s19 + $0x384] ss:$28 sps:$4 sm:$0xff]   ;;  %v9553_v42 = vld [vmem:[%s12486_s19 + $0x38c] ss:$28 sps:$4 sm:$0xff]  }
 0x767   :  { %7020 = vmatprep.subr.bf16.mxu1 %v9466_v44  ;;  %7102 = vmatprep.subr.bf16.mxu0 %v9469_v39  ;;  %v12047_v44 = vld [vmem:[#allocation16] sm:$0xf] }
 0x768   :  { %v5184_v39 = vrot.slane %v12047_v44, %v11084_v54 }
 0x76a   :  { %7021 = vmatpush1.bf16.msra.mxu1 %v9464_v46  ;;  %7103 = vmatpush1.bf16.msra.mxu0 %v9467_v47  ;;  %v5188_v46 = vrot.slane %v12047_v44, %v11087_v14  ;;  %v5196_v47 = vrot.slane %v12047_v44, %v11207_v24 }
 0x76b   :  { %7022 = vmatprep.subr.bf16.mxu1 %v9472_v52  ;;  %7104 = vmatprep.subr.bf16.mxu0 %v9475_v12 }
 0x76e   :  { %7023 = vmatpush1.bf16.msra.mxu1 %v9470_v48  ;;  %7105 = vmatpush1.bf16.msra.mxu0 %v9473_v49 }
 0x76f   :  { %7024 = vmatprep.subr.bf16.mxu1 %v9478_v50  ;;  %7106 = vmatprep.subr.bf16.mxu0 %v9481_v51 }
 0x772   :  { %7025 = vmatpush1.bf16.msra.mxu1 %v9476_v53  ;;  %7107 = vmatpush1.bf16.msra.mxu0 %v9479_v55 }
 0x773   :  { %7026 = vmatprep.subr.bf16.mxu1 %v9484_v20  ;;  %7108 = vmatprep.subr.bf16.mxu0 %v9487_v57 }
 0x776   :  { %7027 = vmatpush1.bf16.msra.mxu1 %v9482_v58  ;;  %7109 = vmatpush1.bf16.msra.mxu0 %v9485_v59 }
 0x777   :  { %7028 = vmatprep.subr.bf16.mxu1 %v9490_v60  ;;  %7110 = vmatprep.subr.bf16.mxu0 %v9493_v61 }
 0x77a   :  { %7029 = vmatpush1.bf16.msra.mxu1 %v9488_v62  ;;  %7111 = vmatpush1.bf16.msra.mxu0 %v9491_v63  ;;  %v9548_v63 = vld [vmem:[%s12486_s19 + $0x380] ss:$28 sps:$4 sm:$0xff]  }
 0x77b   :  { %7030 = vmatprep.subr.bf16.mxu1 %v9496_v2  ;;  %7112 = vmatprep.subr.bf16.mxu0 %v9499_v3  ;;  %v9551_v2 = vld [vmem:[%s12486_s19 + $0x388] ss:$28 sps:$4 sm:$0xff]  }
 0x77e   :  { %7031 = vmatpush1.bf16.msra.mxu1 %v9494_v5  ;;  %7113 = vmatpush1.bf16.msra.mxu0 %v9497_v7  ;;  %v9556_v5 = vld [vmem:[%s12486_s19 + $0x3bc] ss:$28 sps:$4 sm:$0xff]   ;;  %v9559_v7 = vld [vmem:[%s12486_s19 + $0x3c4] ss:$28 sps:$4 sm:$0xff]  }
 0x77f   :  { %7032 = vmatprep.subr.bf16.mxu1 %v9502_v10  ;;  %7114 = vmatprep.subr.bf16.mxu0 %v9505_v56  ;;  %v9554_v56 = vld [vmem:[%s12486_s19 + $0x3b8] ss:$28 sps:$4 sm:$0xff]  }
 0x782   :  { %7033 = vmatpush1.bf16.msra.mxu1 %v9500_v15  ;;  %7115 = vmatpush1.bf16.msra.mxu0 %v9503_v16  ;;  %v9557_v15 = vld [vmem:[%s12486_s19 + $0x3c0] ss:$28 sps:$4 sm:$0xff]   ;;  %v9562_v16 = vld [vmem:[%s12486_s19 + $0x3f4] ss:$28 sps:$4 sm:$0xff]  }
 0x783   :  { %7034 = vmatprep.subr.bf16.mxu1 %v9508_v17  ;;  %7116 = vmatprep.subr.bf16.mxu0 %v9511_v1  ;;  %v9565_v17 = vld [vmem:[%s12486_s19 + $0x3fc] ss:$28 sps:$4 sm:$0xff]   ;;  %v9560_v1 = vld [vmem:[%s12486_s19 + $0x3f0] ss:$28 sps:$4 sm:$0xff]  }
 0x786   :  { %7035 = vmatpush1.bf16.msra.mxu1 %v9506_v18  ;;  %7117 = vmatpush1.bf16.msra.mxu0 %v9509_v19  ;;  %v9563_v18 = vld [vmem:[%s12486_s19 + $0x3f8] ss:$28 sps:$4 sm:$0xff]   ;;  %v9568_v19 = vld [vmem:[%s12486_s19 + $0x42c] ss:$28 sps:$4 sm:$0xff]  }
 0x787   :  { %7036 = vmatprep.subr.bf16.mxu1 %v9514_v4  ;;  %7118 = vmatprep.subr.bf16.mxu0 %v9517_v43  ;;  %v9571_v4 = vld [vmem:[%s12486_s19 + $0x434] ss:$28 sps:$4 sm:$0xff]   ;;  %v9566_v43 = vld [vmem:[%s12486_s19 + $0x428] ss:$28 sps:$4 sm:$0xff]  }
 0x78a   :  { %7037 = vmatpush1.bf16.msra.mxu1 %v9512_v21  ;;  %7119 = vmatpush1.bf16.msra.mxu0 %v9515_v23  ;;  %v9569_v21 = vld [vmem:[%s12486_s19 + $0x430] ss:$28 sps:$4 sm:$0xff]   ;;  %v9574_v23 = vld [vmem:[%s12486_s19 + $0x464] ss:$28 sps:$4 sm:$0xff]  }
 0x78b   :  { %7038 = vmatprep.subr.bf16.mxu1 %v9520_v25  ;;  %7120 = vmatprep.subr.bf16.mxu0 %v9523_v27  ;;  %v9577_v25 = vld [vmem:[%s12486_s19 + $0x46c] ss:$28 sps:$4 sm:$0xff]   ;;  %v9572_v27 = vld [vmem:[%s12486_s19 + $0x460] ss:$28 sps:$4 sm:$0xff]  }
 0x78e   :  { %7039 = vmatpush1.bf16.msra.mxu1 %v9518_v9  ;;  %7121 = vmatpush1.bf16.msra.mxu0 %v9521_v28  ;;  %v9575_v9 = vld [vmem:[%s12486_s19 + $0x468] ss:$28 sps:$4 sm:$0xff]   ;;  %v9580_v28 = vld [vmem:[%s12486_s19 + $0x49c] ss:$28 sps:$4 sm:$0xff]  }
 0x78f   :  { %7040 = vmatprep.subr.bf16.mxu1 %v9526_v45  ;;  %7122 = vmatprep.subr.bf16.mxu0 %v9529_v29  ;;  %v9583_v45 = vld [vmem:[%s12486_s19 + $0x4a4] ss:$28 sps:$4 sm:$0xff]   ;;  %v9578_v29 = vld [vmem:[%s12486_s19 + $0x498] ss:$28 sps:$4 sm:$0xff]  }
 0x792   :  { %7041 = vmatpush1.bf16.msra.mxu1 %v9524_v11  ;;  %7123 = vmatpush1.bf16.msra.mxu0 %v9527_v30  ;;  %v9581_v11 = vld [vmem:[%s12486_s19 + $0x4a0] ss:$28 sps:$4 sm:$0xff]   ;;  %v9586_v30 = vld [vmem:[%s12486_s19 + $0x4d4] ss:$28 sps:$4 sm:$0xff]  }
 0x793   :  { %7042 = vmatprep.subr.bf16.mxu1 %v9532_v31  ;;  %7124 = vmatprep.subr.bf16.mxu0 %v9535_v32  ;;  %v9589_v31 = vld [vmem:[%s12486_s19 + $0x4dc] ss:$28 sps:$4 sm:$0xff]   ;;  %v9584_v32 = vld [vmem:[%s12486_s19 + $0x4d0] ss:$28 sps:$4 sm:$0xff]  }
 0x796   :  { %7043 = vmatpush1.bf16.msra.mxu1 %v9530_v33  ;;  %7125 = vmatpush1.bf16.msra.mxu0 %v9533_v34  ;;  %v9587_v33 = vld [vmem:[%s12486_s19 + $0x4d8] ss:$28 sps:$4 sm:$0xff]   ;;  %v5192_v34 = vrot.slane %v12047_v44, %v11204_v22 }
 0x797   :  { %7044 = vmatprep.subr.bf16.mxu1 %v9538_v35  ;;  %7126 = vmatprep.subr.bf16.mxu0 %v9541_v36  ;;  %v9592_v35 = vld [vmem:[%s12486_s19 + $0x50c] ss:$28 sps:$4 sm:$0xff]   ;;  %v9595_v36 = vld [vmem:[%s12486_s19 + $0x514] ss:$28 sps:$4 sm:$0xff]  }
 0x798   :  { %v9604_v44 = vld [vmem:[%s12486_s19 + $0x14] ss:$28 sps:$4 sm:$0xff]  }
 0x79a   :  { %7045 = vmatpush1.bf16.msra.mxu1 %v9536_v38  ;;  %7127 = vmatpush1.bf16.msra.mxu0 %v9539_v8  ;;  %v9590_v38 = vld [vmem:[%s12486_s19 + $0x508] ss:$28 sps:$4 sm:$0xff]   ;;  %v9593_v8 = vld [vmem:[%s12486_s19 + $0x510] ss:$28 sps:$4 sm:$0xff]  }
 0x79b   :  { %7046 = vmatprep.subr.bf16.mxu1 %v9544_v13  ;;  %7128 = vmatprep.subr.bf16.mxu0 %v9547_v26  ;;  %v9598_v26 = vld [vmem:[%s12486_s19 + $0x544] ss:$28 sps:$4 sm:$0xff]  }
 0x79e   :  { %7047 = vmatpush1.bf16.msra.mxu1 %v9542_v41  ;;  %7129 = vmatpush1.bf16.msra.mxu0 %v9545_v37  ;;  %v9601_v41 = vld [vmem:[%s12486_s19 + $0x54c] ss:$28 sps:$4 sm:$0xff]   ;;  %v9596_v37 = vld [vmem:[%s12486_s19 + $0x540] ss:$28 sps:$4 sm:$0xff]  }
 0x79f   :  { %7057 = vmatprep.subr.bf16.mxu1 %v9550_v40  ;;  %7139 = vmatprep.subr.bf16.mxu0 %v9553_v42  ;;  %v9599_v40 = vld [vmem:[%s12486_s19 + $0x548] ss:$28 sps:$4 sm:$0xff]  }
 0x834   :  { %v5779_v52 = vpop.f32.mrb[44].mxu1  ;;  %v12055_v12 = vpop.f32.mrb[40].mxu0 }
 0x835   :  { %v8351_v48 = vadd.f32 %v5779_v52, %v5184_v39  ;;  %v5781_v49 = vpop.f32.mrb[45].mxu1  ;;  %v5863_v50 = vpop.f32.mrb[41].mxu0  ;;  %v8353_v13 = vadd.f32 %v12055_v12, %v5192_v34  ;;  %v9605_v39 = vld [vmem:[%s12486_s19 + $0x1d8] ss:$28 sps:$4 sm:$0xff]   ;;  %v9609_v12 = vld [vmem:[%s12486_s19 + $0x4c] ss:$28 sps:$4 sm:$0xff]  }
 0x836   :  { %v8352_v51 = vadd.f32 %v5781_v49, %v5188_v46  ;;  %v8354_v53 = vadd.f32 %v5863_v50, %v5196_v47  ;;  %v5783_v55 = vpop.f32.mrb[46].mxu1  ;;  %v5865_v20 = vpop.f32.mrb[42].mxu0  ;;  %v9602_v46 = vld [vmem:[%s12486_s19 + $0x10] ss:$28 sps:$4 sm:$0xff]   ;;  %v9606_v52 = vld [vmem:[%s12486_s19 + $0x18] ss:$28 sps:$4 sm:$0xff]  }
 0x837   :  { %v5868_v57 = vmax.f32 %v8351_v48, 0.0  ;;  %v5784_v58 = vpop.f32.mrb[47].mxu1  ;;  %v5866_v59 = vpop.f32.mrb[43].mxu0  ;;  %v5870_v42 = vmax.f32 %v8353_v13, 0.0  ;;  %v9610_v48 = vld [vmem:[%s12486_s19 + $0x210] ss:$28 sps:$4 sm:$0xff]  }
 0x838   :  { %v5869_v60 = vmax.f32 %v8352_v51, 0.0  ;;  %v5871_v61 = vmax.f32 %v8354_v53, 0.0  ;;  %v9607_v49 = vld [vmem:[%s12486_s19 + $0x48] ss:$28 sps:$4 sm:$0xff]   ;;  %v9611_v50 = vld [vmem:[%s12486_s19 + $0x50] ss:$28 sps:$4 sm:$0xff]  }
 0x839   :  { %v12065_v3 = vpack.c.bf16 %v5868_v57, %v5868_v57  ;;  %v12185_v47 = vpack.c.bf16 %v5870_v42, %v5870_v42  ;;  %v9614_v51 = vld [vmem:[%s12486_s19 + $0x84] ss:$28 sps:$4 sm:$0xff]   ;;  %v9619_v57 = vld [vmem:[%s12486_s19 + $0xbc] ss:$28 sps:$4 sm:$0xff]   ;;  %v9660_v34 = vld [vmem:[%s12486_s19 + $0x2b4] ss:$28 sps:$4 sm:$0xff]  }
 0x83a   :  { %v12057_v62 = vpack.c.bf16 %v5869_v60, %v5869_v60  ;;  %v12075_v10 = vpack.c.bf16 %v5871_v61, %v5871_v61  ;;  %v9615_v53 = vld [vmem:[%s12486_s19 + $0x248] ss:$28 sps:$4 sm:$0xff]   ;;  %v9612_v55 = vld [vmem:[%s12486_s19 + $0x80] ss:$28 sps:$4 sm:$0xff]   ;;  %v9617_v59 = vld [vmem:[%s12486_s19 + $0xb8] ss:$28 sps:$4 sm:$0xff]  }
 0x83b   :  { %v9616_v20 = vld [vmem:[%s12486_s19 + $0x88] ss:$28 sps:$4 sm:$0xff]   ;;  %v9620_v58 = vld [vmem:[%s12486_s19 + $0x280] ss:$28 sps:$4 sm:$0xff]   ;;  %v9624_v61 = vld [vmem:[%s12486_s19 + $0xf4] ss:$28 sps:$4 sm:$0xff]  }
 0x83c   :  { %7048 = vmatprep.mubr.bf16.mxu1 %v12057_v62  ;;  %7130 = vmatprep.mubr.bf16.mxu0 %v12057_v62  ;;  %v9621_v60 = vld [vmem:[%s12486_s19 + $0xc0] ss:$28 sps:$4 sm:$0xff]   ;;  %v9665_v13 = vld [vmem:[%s12486_s19 + $0x4b0] ss:$28 sps:$4 sm:$0xff]   ;;  %v9670_v42 = vld [vmem:[%s12486_s19 + $0x358] ss:$28 sps:$4 sm:$0xff]  }
 0x83d   :  { %7049 = vmatmul.mubr.bf16.vlgmr.msra.gmra.mrb[48].mxu1 %v12065_v3  ;;  %7131 = vmatmul.mubr.bf16.vlgmr.msra.gmra.mrb[44].mxu0 %v12065_v3 }
 0x83e   :  { %7058 = vmatpush1.bf16.msra.mxu1 %v9548_v63  ;;  %7140 = vmatpush1.bf16.msra.mxu0 %v9551_v2  ;;  %v9622_v63 = vld [vmem:[%s12486_s19 + $0xf0] ss:$28 sps:$4 sm:$0xff]   ;;  %v9626_v2 = vld [vmem:[%s12486_s19 + $0xf8] ss:$28 sps:$4 sm:$0xff]  }
 0x83f   :  { %8304 = vmatprep.mubr.msk.bf16.mxu1 %vm1495_vm2, %v12075_v10  ;;  %8305 = vmatprep.mubr.msk.bf16.mxu0 %vm1495_vm2, %v12075_v10 }
 0x840   :  { %7059 = vmatprep.subr.bf16.mxu1 %v9556_v5  ;;  %7141 = vmatprep.subr.bf16.mxu0 %v9559_v7  ;;  %v9629_v5 = vld [vmem:[%s12486_s19 + $0x12c] ss:$28 sps:$4 sm:$0xff]  }
 0x841   :  { %v9630_v7 = vld [vmem:[%s12486_s19 + $0x2f0] ss:$28 sps:$4 sm:$0xff]  }
 0x842   :  { %7060 = vmatpush1.bf16.msra.mxu1 %v9554_v56  ;;  %7142 = vmatpush1.bf16.msra.mxu0 %v9557_v15  ;;  %v9627_v56 = vld [vmem:[%s12486_s19 + $0x128] ss:$28 sps:$4 sm:$0xff]   ;;  %v9631_v15 = vld [vmem:[%s12486_s19 + $0x130] ss:$28 sps:$4 sm:$0xff]  }
 0x843   :  { %7061 = vmatprep.subr.bf16.mxu1 %v9562_v16  ;;  %7143 = vmatprep.subr.bf16.mxu0 %v9565_v17  ;;  %v9634_v16 = vld [vmem:[%s12486_s19 + $0x164] ss:$28 sps:$4 sm:$0xff]  }
 0x844   :  { %v9635_v17 = vld [vmem:[%s12486_s19 + $0x328] ss:$28 sps:$4 sm:$0xff]  }
 0x846   :  { %7062 = vmatpush1.bf16.msra.mxu1 %v9560_v1  ;;  %7144 = vmatpush1.bf16.msra.mxu0 %v9563_v18  ;;  %v9632_v1 = vld [vmem:[%s12486_s19 + $0x160] ss:$28 sps:$4 sm:$0xff]   ;;  %v9636_v18 = vld [vmem:[%s12486_s19 + $0x168] ss:$28 sps:$4 sm:$0xff]  }
 0x847   :  { %7063 = vmatprep.subr.bf16.mxu1 %v9568_v19  ;;  %7145 = vmatprep.subr.bf16.mxu0 %v9571_v4  ;;  %v9639_v19 = vld [vmem:[%s12486_s19 + $0x19c] ss:$28 sps:$4 sm:$0xff]  }
 0x848   :  { %v9640_v4 = vld [vmem:[%s12486_s19 + $0x360] ss:$28 sps:$4 sm:$0xff]  }
 0x84a   :  { %7064 = vmatpush1.bf16.msra.mxu1 %v9566_v43  ;;  %7146 = vmatpush1.bf16.msra.mxu0 %v9569_v21  ;;  %v9637_v43 = vld [vmem:[%s12486_s19 + $0x198] ss:$28 sps:$4 sm:$0xff]   ;;  %v9641_v21 = vld [vmem:[%s12486_s19 + $0x1a0] ss:$28 sps:$4 sm:$0xff]  }
 0x84b   :  { %7065 = vmatprep.subr.bf16.mxu1 %v9574_v23  ;;  %7147 = vmatprep.subr.bf16.mxu0 %v9577_v25  ;;  %v9644_v23 = vld [vmem:[%s12486_s19 + $0x1d4] ss:$28 sps:$4 sm:$0xff]  }
 0x84c   :  { %v9642_v25 = vld [vmem:[%s12486_s19 + $0x1d0] ss:$28 sps:$4 sm:$0xff]  }
 0x84e   :  { %7066 = vmatpush1.bf16.msra.mxu1 %v9572_v27  ;;  %7148 = vmatpush1.bf16.msra.mxu0 %v9575_v9  ;;  %v9645_v27 = vld [vmem:[%s12486_s19 + $0x398] ss:$28 sps:$4 sm:$0xff]   ;;  %v9648_v9 = vld [vmem:[%s12486_s19 + $0x20c] ss:$28 sps:$4 sm:$0xff]  }
 0x84f   :  { %7067 = vmatprep.subr.bf16.mxu1 %v9580_v28  ;;  %7149 = vmatprep.subr.bf16.mxu0 %v9583_v45  ;;  %v9646_v28 = vld [vmem:[%s12486_s19 + $0x208] ss:$28 sps:$4 sm:$0xff]   ;;  %v9649_v45 = vld [vmem:[%s12486_s19 + $0x3d0] ss:$28 sps:$4 sm:$0xff]  }
 0x852   :  { %7068 = vmatpush1.bf16.msra.mxu1 %v9578_v29  ;;  %7150 = vmatpush1.bf16.msra.mxu0 %v9581_v11  ;;  %v9652_v29 = vld [vmem:[%s12486_s19 + $0x244] ss:$28 sps:$4 sm:$0xff]  }
 0x853   :  { %7069 = vmatprep.subr.bf16.mxu1 %v9586_v30  ;;  %7151 = vmatprep.subr.bf16.mxu0 %v9589_v31  ;;  %v9650_v11 = vld [vmem:[%s12486_s19 + $0x240] ss:$28 sps:$4 sm:$0xff]   ;;  %v9653_v30 = vld [vmem:[%s12486_s19 + $0x408] ss:$28 sps:$4 sm:$0xff]  }
 0x854   :  { %v9656_v31 = vld [vmem:[%s12486_s19 + $0x27c] ss:$28 sps:$4 sm:$0xff]  }
 0x856   :  { %7070 = vmatpush1.bf16.msra.mxu1 %v9584_v32  ;;  %7152 = vmatpush1.bf16.msra.mxu0 %v9587_v33  ;;  %v9654_v32 = vld [vmem:[%s12486_s19 + $0x278] ss:$28 sps:$4 sm:$0xff]   ;;  %v9657_v33 = vld [vmem:[%s12486_s19 + $0x440] ss:$28 sps:$4 sm:$0xff]  }
 0x857   :  { %7071 = vmatprep.subr.bf16.mxu1 %v9592_v35  ;;  %7153 = vmatprep.subr.bf16.mxu0 %v9595_v36  ;;  %v9658_v35 = vld [vmem:[%s12486_s19 + $0x2b0] ss:$28 sps:$4 sm:$0xff]   ;;  %v9661_v36 = vld [vmem:[%s12486_s19 + $0x478] ss:$28 sps:$4 sm:$0xff]  }
 0x85a   :  { %7072 = vmatpush1.bf16.msra.mxu1 %v9590_v38  ;;  %7154 = vmatpush1.bf16.msra.mxu0 %v9593_v8  ;;  %v9664_v38 = vld [vmem:[%s12486_s19 + $0x2ec] ss:$28 sps:$4 sm:$0xff]  }
 0x85b   :  { %7073 = vmatprep.subr.bf16.mxu1 %v9598_v26  ;;  %7155 = vmatprep.subr.bf16.mxu0 %v9601_v41  ;;  %v9662_v8 = vld [vmem:[%s12486_s19 + $0x2e8] ss:$28 sps:$4 sm:$0xff]   ;;  %v9666_v41 = vld [vmem:[%s12486_s19 + $0x320] ss:$28 sps:$4 sm:$0xff]  }
 0x85c   :  { %v9668_v26 = vld [vmem:[%s12486_s19 + $0x324] ss:$28 sps:$4 sm:$0xff]  }
 0x85e   :  { %7074 = vmatpush1.bf16.msra.mxu1 %v9596_v37  ;;  %7156 = vmatpush1.bf16.msra.mxu0 %v9599_v40  ;;  %v9669_v37 = vld [vmem:[%s12486_s19 + $0x4e8] ss:$28 sps:$4 sm:$0xff]   ;;  %v9672_v40 = vld [vmem:[%s12486_s19 + $0x35c] ss:$28 sps:$4 sm:$0xff]  }
 0x85f   :  { %7180 = vmatprep.subr.bf16.mxu1 %v9604_v44  ;;  %8315 = vmatprep.subr.bf16.mxu0 %v9605_v39  ;;  %v9673_v44 = vld [vmem:[%s12486_s19 + $0x520] ss:$28 sps:$4 sm:$0xff]   ;;  %v9676_v39 = vld [vmem:[%s12486_s19 + $0x394] ss:$28 sps:$4 sm:$0xff]  }
 0x861   :  { %7090 = vmatmul.mubr.bf16.vlgmr.msra.gmra.mrb[48].mxu1 %v12185_v47  ;;  %7172 = vmatmul.mubr.bf16.vlgmr.msra.gmra.mrb[44].mxu0 %v12185_v47 }
 0x862   :  { %7181 = vmatpush1.bf16.msra.mxu1 %v9602_v46  ;;  %7212 = vmatprep.mubr.bf16.mxu1 %v12057_v62  ;;  %v9674_v46 = vld [vmem:[%s12486_s19 + $0x390] ss:$28 sps:$4 sm:$0xff]  }
 0x863   :  { %8316 = vmatpush3.bf16.msra.mxu0 %v9606_v52  ;;  %7294 = vmatprep.mubr.bf16.mxu0 %v12057_v62  ;;  %v9625_v62 = vld [vmem:[%s12486_s19 + $0x2b8] ss:$28 sps:$4 sm:$0xff]  }
 0x864   :  { %7182 = vmatprep.subr.bf16.mxu1 %v9609_v12  ;;  %8317 = vmatprep.subr.bf16.mxu0 %v9610_v48  ;;  %v9677_v52 = vld [vmem:[%s12486_s19 + $0x558] ss:$28 sps:$4 sm:$0xff]   ;;  %v9680_v12 = vld [vmem:[%s12486_s19 + $0x3cc] ss:$28 sps:$4 sm:$0xff]  }
 0x865   :  { %v9678_v48 = vld [vmem:[%s12486_s19 + $0x3c8] ss:$28 sps:$4 sm:$0xff]  }
 0x866   :  { %7183 = vmatpush1.bf16.msra.mxu1 %v9607_v49  ;;  %v9683_v49 = vld [vmem:[%s12486_s19 + $0x404] ss:$28 sps:$4 sm:$0xff]  }
 0x867   :  { %8318 = vmatpush3.bf16.msra.mxu0 %v9611_v50  ;;  %7184 = vmatprep.subr.bf16.mxu1 %v9614_v51  ;;  %v9689_v50 = vld [vmem:[%s12486_s19 + $0x474] ss:$28 sps:$4 sm:$0xff]  }
 0x868   :  { %8319 = vmatprep.subr.bf16.mxu0 %v9615_v53  ;;  %v9687_v51 = vld [vmem:[%s12486_s19 + $0x470] ss:$28 sps:$4 sm:$0xff]  }
 0x869   :  { %v9692_v53 = vld [vmem:[%s12486_s19 + $0x4ac] ss:$28 sps:$4 sm:$0xff]  }
 0x86a   :  { %7185 = vmatpush1.bf16.msra.mxu1 %v9612_v55  ;;  %v9690_v55 = vld [vmem:[%s12486_s19 + $0x4a8] ss:$28 sps:$4 sm:$0xff]  }
 0x86b   :  { %8320 = vmatpush3.bf16.msra.mxu0 %v9616_v20  ;;  %7186 = vmatprep.subr.bf16.mxu1 %v9619_v57  ;;  %v9695_v20 = vld [vmem:[%s12486_s19 + $0x4e4] ss:$28 sps:$4 sm:$0xff]  }
 0x86c   :  { %8321 = vmatprep.subr.bf16.mxu0 %v9620_v58  ;;  %v9693_v57 = vld [vmem:[%s12486_s19 + $0x4e0] ss:$28 sps:$4 sm:$0xff]  }
 0x86d   :  { %v9698_v58 = vld [vmem:[%s12486_s19 + $0x51c] ss:$28 sps:$4 sm:$0xff]  }
 0x86e   :  { %7187 = vmatpush1.bf16.msra.mxu1 %v9617_v59  ;;  %v9696_v59 = vld [vmem:[%s12486_s19 + $0x518] ss:$28 sps:$4 sm:$0xff]  }
 0x86f   :  { %8322 = vmatpush3.bf16.msra.mxu0 %v9621_v60  ;;  %7188 = vmatprep.subr.bf16.mxu1 %v9624_v61  ;;  %v9701_v60 = vld [vmem:[%s12486_s19 + $0x554] ss:$28 sps:$4 sm:$0xff]  }
 0x870   :  { %8323 = vmatprep.subr.bf16.mxu0 %v9625_v62  ;;  %v9699_v61 = vld [vmem:[%s12486_s19 + $0x550] ss:$28 sps:$4 sm:$0xff]   ;;  %v12427_v62 = vld [vmem:[%s12487_s20] sm:$0xff] }
 0x872   :  { %7189 = vmatpush1.bf16.msra.mxu1 %v9622_v63  ;;  %v6081_v63 = vrot.slane %v12427_v62, %v11084_v54 }
 0x873   :  { %8324 = vmatpush3.bf16.msra.mxu0 %v9626_v2  ;;  %7190 = vmatprep.subr.bf16.mxu1 %v9629_v5  ;;  %v6089_v2 = vrot.slane %v12427_v62, %v11204_v22  ;;  %v6085_v5 = vrot.slane %v12427_v62, %v11087_v14 }
 0x874   :  { %8325 = vmatprep.subr.bf16.mxu0 %v9630_v7  ;;  %v6093_v7 = vrot.slane %v12427_v62, %v11207_v24 }
 0x876   :  { %7191 = vmatpush1.bf16.msra.mxu1 %v9627_v56 }
 0x877   :  { %8326 = vmatpush3.bf16.msra.mxu0 %v9631_v15  ;;  %7192 = vmatprep.subr.bf16.mxu1 %v9634_v16 }
 0x878   :  { %8327 = vmatprep.subr.bf16.mxu0 %v9635_v17 }
 0x87a   :  { %7193 = vmatpush1.bf16.msra.mxu1 %v9632_v1 }
 0x87b   :  { %8328 = vmatpush3.bf16.msra.mxu0 %v9636_v18  ;;  %7194 = vmatprep.subr.bf16.mxu1 %v9639_v19 }
 0x87c   :  { %8329 = vmatprep.subr.bf16.mxu0 %v9640_v4 }
 0x87e   :  { %7195 = vmatpush1.bf16.msra.mxu1 %v9637_v43 }
 0x87f   :  { %8330 = vmatpush3.bf16.msra.mxu0 %v9641_v21  ;;  %7196 = vmatprep.subr.bf16.mxu1 %v9644_v23 }
 0x880   :  { %7302 = vmatprep.subr.bf16.mxu0 %v9999_v0 }
 0x882   :  { %7295 = vmatmul.mubr.bf16.vlgmr.msra.gmra.mrb[48].mxu0 %v12065_v3  ;;  %7197 = vmatpush1.bf16.msra.mxu1 %v9642_v25 }
 0x883   :  { %7303 = vmatpush1.bf16.msra.mxu0 %v9645_v27  ;;  %8307 = vmatprep.mubr.msk.bf16.mxu0 %vm1495_vm2, %v12075_v10 }
 0x884   :  { %7198 = vmatprep.subr.bf16.mxu1 %v9648_v9  ;;  %7304 = vmatprep.subr.bf16.mxu0 %v9999_v0 }
 0x886   :  { %7199 = vmatpush1.bf16.msra.mxu1 %v9646_v28 }
 0x887   :  { %7305 = vmatpush1.bf16.msra.mxu0 %v9649_v45  ;;  %7200 = vmatprep.subr.bf16.mxu1 %v9652_v29 }
 0x888   :  { %7306 = vmatprep.subr.bf16.mxu0 %v9999_v0 }
 0x88a   :  { %7201 = vmatpush1.bf16.msra.mxu1 %v9650_v11 }
 0x88b   :  { %7307 = vmatpush1.bf16.msra.mxu0 %v9653_v30  ;;  %7202 = vmatprep.subr.bf16.mxu1 %v9656_v31 }
 0x88c   :  { %7308 = vmatprep.subr.bf16.mxu0 %v9999_v0 }
 0x88e   :  { %7203 = vmatpush1.bf16.msra.mxu1 %v9654_v32 }
 0x88f   :  { %7309 = vmatpush1.bf16.msra.mxu0 %v9657_v33  ;;  %7204 = vmatprep.subr.bf16.mxu1 %v9660_v34 }
 0x890   :  { %7310 = vmatprep.subr.bf16.mxu0 %v9999_v0 }
 0x892   :  { %7205 = vmatpush1.bf16.msra.mxu1 %v9658_v35 }
 0x893   :  { %7311 = vmatpush1.bf16.msra.mxu0 %v9661_v36  ;;  %7206 = vmatprep.subr.bf16.mxu1 %v9664_v38 }
 0x894   :  { %7312 = vmatprep.subr.bf16.mxu0 %v9999_v0 }
 0x896   :  { %7207 = vmatpush1.bf16.msra.mxu1 %v9662_v8 }
 0x897   :  { %7313 = vmatpush1.bf16.msra.mxu0 %v9665_v13  ;;  %7208 = vmatprep.subr.bf16.mxu1 %v9668_v26 }
 0x898   :  { %7314 = vmatprep.subr.bf16.mxu0 %v9999_v0 }
 0x89a   :  { %7209 = vmatpush1.bf16.msra.mxu1 %v9666_v41 }
 0x89b   :  { %7315 = vmatpush1.bf16.msra.mxu0 %v9669_v37  ;;  %7210 = vmatprep.subr.bf16.mxu1 %v9672_v40 }
 0x89c   :  { %7316 = vmatprep.subr.bf16.mxu0 %v9999_v0 }
 0x89e   :  { %7211 = vmatpush1.bf16.msra.mxu1 %v9670_v42 }
 0x89f   :  { %7317 = vmatpush1.bf16.msra.mxu0 %v9673_v44  ;;  %7221 = vmatprep.subr.bf16.mxu1 %v9676_v39 }
 0x8a0   :  { %7318 = vmatprep.subr.bf16.mxu0 %v9999_v0  ;;  %v9681_v0 = vld [vmem:[%s12486_s19 + $0x400] ss:$28 sps:$4 sm:$0xff]  }
 0x8a1   :  { %7213 = vmatmul.mubr.bf16.vlgmr.msra.gmra.mrb[52].mxu1 %v12065_v3  ;;  %v9686_v3 = vld [vmem:[%s12486_s19 + $0x43c] ss:$28 sps:$4 sm:$0xff]  }
 0x8a2   :  { %7222 = vmatpush1.bf16.msra.mxu1 %v9674_v46  ;;  %8306 = vmatprep.mubr.msk.bf16.mxu1 %vm1495_vm2, %v12075_v10  ;;  %v9684_v10 = vld [vmem:[%s12486_s19 + $0x438] ss:$28 sps:$4 sm:$0xff]   ;;  %s10000_s19 = smov [#allocation18]  }
 0x8a3   :  { %7319 = vmatpush1.bf16.msra.mxu0 %v9677_v52  ;;  %7223 = vmatprep.subr.bf16.mxu1 %v9680_v12  ;;  %s7407_s20 = sshll.u32 %s10000_s19, 4  ;;  %s7408_s20 = int_to_ptr.vmem [resolvable:$true] %s7407_s20 }
 0x8a4   :  { %s9930_s13 = scalar_lea.vmem %s7408_s20, 256  ;;  %p9935_p3 = scmp.lt.s32.totalorder %s7408_s20, %s7408_s20 }
 0x8a5   :  { %p9931_p2 = scmp.ne.s32.totalorder %s7408_s20, %s9930_s13  ;;  %p9936_p4 = scmp.lt.s32.totalorder %s9930_s13, %s9930_s13 }
 0x8a6   :  { %7335 = vmatmul.mubr.bf16.vlgmr.msra.gmra.mrb[52].mxu0 %v12185_v47  ;;  %7224 = vmatpush1.bf16.msra.mxu1 %v9678_v48 }
 0x8a7   :  { %7225 = vmatprep.subr.bf16.mxu1 %v9683_v49  ;;  %p9937_p5 = por %p9936_p4, %p9935_p3 }
 0x8a9   :  { %p9938_p6 = pnand %p9937_p5, %p9931_p2 }
 0x8aa   :  { %7226 = vmatpush1.bf16.msra.mxu1 %v9681_v0 }
 0x8ab   :  { %7227 = vmatprep.subr.bf16.mxu1 %v9686_v3 }
 0x8ae   :  { %7228 = vmatpush1.bf16.msra.mxu1 %v9684_v10 }
 0x8af   :  { %7229 = vmatprep.subr.bf16.mxu1 %v9689_v50 }
 0x8b2   :  { %7230 = vmatpush1.bf16.msra.mxu1 %v9687_v51 }
 0x8b3   :  { %7231 = vmatprep.subr.bf16.mxu1 %v9692_v53 }
 0x8b6   :  { %7232 = vmatpush1.bf16.msra.mxu1 %v9690_v55 }
 0x8b7   :  { %7233 = vmatprep.subr.bf16.mxu1 %v9695_v20 }
 0x8ba   :  { %7234 = vmatpush1.bf16.msra.mxu1 %v9693_v57 }
 0x8bb   :  { %7235 = vmatprep.subr.bf16.mxu1 %v9698_v58 }
 0x8be   :  { %7236 = vmatpush1.bf16.msra.mxu1 %v9696_v59 }
 0x8bf   :  { %7237 = vmatprep.subr.bf16.mxu1 %v9701_v60 }
 0x8c2   :  { %7238 = vmatpush1.bf16.msra.mxu1 %v9699_v61 }
 0x8c5   :  { %7254 = vmatmul.mubr.bf16.vlgmr.msra.gmra.mrb[52].mxu1 %v12185_v47 }
 0x934   :  { %v7091_v56 = vpop.f32.mrb[48].mxu1  ;;  %v7173_v15 = vpop.f32.mrb[44].mxu0 }
 0x935   :  { %v8355_v47 = vadd.f32 %v7091_v56, %v6081_v63  ;;  %v8357_v16 = vadd.f32 %v7173_v15, %v6089_v2  ;;  %v7093_v17 = vpop.f32.mrb[49].mxu1  ;;  %v7175_v1 = vpop.f32.mrb[45].mxu0 }
 0x936   :  { %v8356_v18 = vadd.f32 %v7093_v17, %v6085_v5  ;;  %v8358_v19 = vadd.f32 %v7175_v1, %v6093_v7  ;;  %v7095_v4 = vpop.f32.mrb[50].mxu1  ;;  %v7177_v43 = vpop.f32.mrb[46].mxu0 }
 0x937   :  { %v8308_v54 = vmul.f32 -1.442695, %v8355_v47  ;;  %v8310_v21 = vmul.f32 -1.442695, %v8357_v16  ;;  %v7096_v23 = vpop.f32.mrb[51].mxu1  ;;  %v7178_v22 = vpop.f32.mrb[47].mxu0 }
 0x938   :  { %v8309_v25 = vmul.f32 -1.442695, %v8356_v18  ;;  %v8311_v27 = vmul.f32 -1.442695, %v8358_v19 }
 0x939   :  { %9704 = vpow2.f32 %v8308_v54 }
 0x93a   :  { %9706 = vpow2.f32 %v8310_v21 }
 0x93b   :  { %9941 = shalt.err (!%p9938_p6)
}
 0x93c   :  { %s12513_s8 = sld [smem:[#allocation35_spill]] }
 0x942   :  { %s9942_s24 = scalar_lea.hbm %s12513_s8, 256 }
 0x943   :  { %p9943_p7 = scmp.ne.s32.totalorder %s12513_s8, %s9942_s24  ;;  %p9946_p8 = scmp.lt.u32.totalorder %s9942_s24, %s12513_s8 }
 0x945   :  { %p9948_p9 = pnand %p9946_p8, %p9943_p7 }
 0x947   :  { %9951 = shalt.err (!%p9948_p9)
}
 0x948   :  { %7410 = dma.vmem_to_hbm [thread:$0]  %s7408_s20, 256, %s12513_s8, [#allocation19]   ;;  %9708 = vpow2.f32 %v8309_v25  ;;  %v9705_v14 = vpop.eup %9704  ;;  %v6104_v26 = vsub.s32 6, %v11073_v6  ;;  %v6096_v49 = vsub.s32 4, %v11073_v6  ;;  %v6100_v0 = vsub.s32 5, %v11073_v6 }
 0x949   :  { %9710 = vpow2.f32 %v8311_v27  ;;  %v9707_v24 = vpop.eup %9706  ;;  %v7363_v9 = vadd.f32 1.0, %v9705_v14  ;;  %s10001_s27 = smov [#allocation17]  }
 0x94a   :  { %v7365_v45 = vadd.f32 1.0, %v9707_v24  ;;  %v6105_v41 = vrot.slane %v12427_v62, %v6104_v26  ;;  %v6097_v10 = vrot.slane %v12427_v62, %v6096_v49  ;;  %v6101_v50 = vrot.slane %v12427_v62, %v6100_v0  ;;  %s7397_s3 = sshll.u32 %s10001_s27, 4  ;;  %s7398_s3 = int_to_ptr.vmem [resolvable:$true] %s7397_s3 }
 0x94b   :  { %9712 = vrcp.f32 %v7363_v9  ;;  %s9952_s9 = scalar_lea.vmem %s7398_s3, 896  ;;  %p9957_p11 = scmp.lt.s32.totalorder %s7398_s3, %s7398_s3 }
 0x94c   :  { %9714 = vrcp.f32 %v7365_v45  ;;  %p9953_p10 = scmp.ne.s32.totalorder %s7398_s3, %s9952_s9  ;;  %p9958_p12 = scmp.lt.s32.totalorder %s9952_s9, %s9952_s9 }
 0x94e   :  { %p9959_p13 = por %p9958_p12, %p9957_p11 }
 0x950   :  { %p9960_p0 = pnand %p9959_p13, %p9953_p10 }
 0x952   :  { %v9709_v28 = vpop.eup %9708 }
 0x953   :  { %v9711_v29 = vpop.eup %9710  ;;  %v7364_v11 = vadd.f32 1.0, %v9709_v28 }
 0x954   :  { %v7366_v30 = vadd.f32 1.0, %v9711_v29 }
 0x955   :  { %9716 = vrcp.f32 %v7364_v11  ;;  %v9713_v31 = vpop.eup %9712  ;;  %v8331_v35 = vpop.f32.mrb[48].mxu0 }
 0x956   :  { %9718 = vrcp.f32 %v7366_v30  ;;  %v9715_v32 = vpop.eup %9714  ;;  %7384 = vst [vmem:[#allocation17] sm:$0xff] %v9713_v31  ;;  %v8332_v36 = vpop.f32.mrb[49].mxu0 }
 0x957   :  { %7386 = vst [vmem:[#allocation17 + $0x10] sm:$0xff] %v9715_v32  ;;  %v8333_v38 = vadd.f32 %v8332_v36, %v8331_v35  ;;  %v8334_v8 = vpop.f32.mrb[50].mxu0 }
 0x958   :  { %v8335_v13 = vpop.f32.mrb[51].mxu0 }
 0x959   :  { %v7297_v37 = vadd.f32 %v8333_v38, %v6105_v41 }
 0x95f   :  { %v9717_v33 = vpop.eup %9716 }
 0x960   :  { %v9719_v34 = vpop.eup %9718  ;;  %7385 = vst [vmem:[#allocation17 + $0x8] sm:$0xff] %v9717_v33 }
 0x961   :  { %7387 = vst [vmem:[#allocation17 + $0x18] sm:$0xff] %v9719_v34 }
 0x979   :  { %v7336_v40 = vpop.f32.mrb[52].mxu0 }
 0x97a   :  { %v7337_v42 = vadd.f32 %v7336_v40, %v7297_v37  ;;  %v7338_v44 = vpop.f32.mrb[53].mxu0 }
 0x97b   :  { %v7339_v39 = vpop.f32.mrb[54].mxu0 }
 0x97c   :  { %v8314_v46 = vmul.f32 -1.442695, %v7337_v42  ;;  %v7340_v52 = vpop.f32.mrb[55].mxu0 }
 0x97e   :  { %9720 = vpow2.f32 %v8314_v46 }
 0x988   :  { %v9721_v12 = vpop.eup %9720 }
 0x989   :  { %v7369_v48 = vadd.f32 1.0, %v9721_v12 }
 0x98b   :  { %9722 = vrcp.f32 %v7369_v48 }
 0x995   :  { %v9723_v3 = vpop.eup %9722 }
 0x996   :  { %7390 = vst [vmem:[#allocation17 + $0x30] sm:$0xff] %v9723_v3 }
 0x998   :  { %v7255_v51 = vpop.f32.mrb[52].mxu1 }
 0x999   :  { %v8359_v53 = vadd.f32 %v7255_v51, %v6097_v10  ;;  %v7257_v55 = vpop.f32.mrb[53].mxu1 }
 0x99a   :  { %v8360_v20 = vadd.f32 %v7257_v55, %v6101_v50  ;;  %v7259_v57 = vpop.f32.mrb[54].mxu1 }
 0x99b   :  { %v8312_v58 = vmul.f32 -1.442695, %v8359_v53  ;;  %v7260_v59 = vpop.f32.mrb[55].mxu1 }
 0x99c   :  { %v8313_v60 = vmul.f32 -1.442695, %v8360_v20 }
 0x99d   :  { %9724 = vpow2.f32 %v8312_v58 }
 0x99e   :  { %9726 = vpow2.f32 %v8313_v60 }
 0x9a7   :  { %v9725_v61 = vpop.eup %9724 }
 0x9a8   :  { %v9727_v63 = vpop.eup %9726  ;;  %v7367_v2 = vadd.f32 1.0, %v9725_v61 }
 0x9a9   :  { %v7368_v6 = vadd.f32 1.0, %v9727_v63 }
 0x9aa   :  { %9728 = vrcp.f32 %v7367_v2 }
 0x9ab   :  { %9730 = vrcp.f32 %v7368_v6 }
 0x9b4   :  { %v9729_v5 = vpop.eup %9728 }
 0x9b5   :  { %v9731_v62 = vpop.eup %9730  ;;  %7388 = vst [vmem:[#allocation17 + $0x20] sm:$0xff] %v9729_v5 }
 0x9b6   :  { %7389 = vst [vmem:[#allocation17 + $0x28] sm:$0xff] %v9731_v62 }
 0x9b7   :  { %9963 = shalt.err (!%p9960_p0)
}
 0x9b8   :  { %s12514_s17 = sld [smem:[#allocation34_spill]] }
 0x9be   :  { %s9964_s25 = scalar_lea.hbm %s12514_s17, 896 }
 0x9bf   :  { %p9965_p1 = scmp.ne.s32.totalorder %s12514_s17, %s9964_s25  ;;  %p9968_p2 = scmp.lt.u32.totalorder %s9964_s25, %s12514_s17 }
 0x9c1   :  { %p9970_p3 = pnand %p9968_p2, %p9965_p1 }
 0x9c3   :  { %9973 = shalt.err (!%p9970_p3)
}
 0x9c4   :  { %7400 = dma.vmem_to_hbm [thread:$0]  %s7398_s3, 896, %s12514_s17, [#allocation4]  }
 0x9c5   :  { %9984 = dma.done.wait [#allocation4], 896  }
 0x9c6   :  { %9985 = vsyncadd [#allocation4], 4294966400 }
 0x9c7   :  { %9986 = dma.done.wait [#allocation19], 256  }
 0x9c8   :  { %9987 = vsyncadd [#allocation19], 4294967040 }
 0x9c9   :  { %7417 = vsyncpa [#allocation3], 1 }
 0x9ca   :  { %7418 = vsyncpa [#allocation6], 1 }
 0x9cb   :  { %7419 = vsyncpa [#allocation9], 1 }
 0x9cc   :  { %7420 = vsyncpa [#allocation12], 1 }
 0x9cd   :  { %7421 = vsyncpa [#allocation15], 1 }
 0x9ce   :  { %7422 = vsyncpa [#allocation4], 1 }
 0x9cf   :  { %7423 = vsyncpa [#allocation19], 1 }

</bundles_post_ra>
